<compile_context>
chip_gen: v6e
topology: v6e:2x2x1
jax: 0.10.0
libtpu: 0.0.40
codegen_flags: <defaults>
</compile_context>

<pallas_src>
import functools

import jax
import jax.numpy as jnp
from jax.experimental import pallas as pl
from jax.experimental.pallas import tpu as pltpu


def _round_up(x, m):
    return ((x + m - 1) // m) * m


# ----------------------------------------------------------------------------
# Pallas kernel: one invocation processes the whole message.
# ----------------------------------------------------------------------------
def rnn_receiver_gs_kernel(
    # inputs (pre-laid-out by the wrapper)
    msg_ref,      # (L*B, V)        message, step-major rows (row = t*B + b)
    inp_ref,      # (B*C_pad, F)    candidates (zero rows for padded candidates)
    w_inp_ref,    # (F, H_pad)      input_encoder weight (transposed, lane-padded)
    b_inp_ref,    # (1, H_pad)
    w_msg_ref,    # (V, E)          message_encoder weight (transposed)
    b_msg_ref,    # (1, E)
    w_i_ref,      # (E, 3*H_pad)    fused GRU input weights   [r | z | n]
    b_i_ref,      # (1, 3*H_pad)    fused biases [b_ir+b_hr | b_iz+b_hz | b_in]
    w_h_ref,      # (H_pad, 3*H_pad) fused GRU hidden weights [r | z | n]
    b_hn_ref,     # (1, H_pad)      b_hn (added inside the n gate)
    # outputs
    out_ref,      # (B, L, C_pad)   per-step log-softmax (lane-dense store)
    # scratch
    gi_scr,       # (L, B, 3*H_pad) input-side gate pre-activations, all steps
    h_all_scr,    # (L, B, H_pad)   hidden state of every step
    emb_in_scr,   # (B, C_pad, H_pad) candidate embeddings
    *,
    L, B, C, C_pad, H_pad, use_bf16,
):
    f32 = jnp.float32
    mx = (lambda x: x.astype(jnp.bfloat16)) if use_bf16 else (lambda x: x)

    # --- one-time precompute (off the recurrent chain) -----------------------
    # candidate embeddings: tanh(Linear(_input))              -> (B, C_pad, H_pad)
    emb_in = jnp.tanh(
        jnp.dot(mx(inp_ref[...]), mx(w_inp_ref[...]), preferred_element_type=f32)
        + b_inp_ref[...])
    emb_in_scr[...] = emb_in.reshape(B, C_pad, H_pad)

    # message embeddings for all L steps in one matmul          -> (L*B, E)
    emb_msg = (jnp.dot(mx(msg_ref[...]), mx(w_msg_ref[...]),
                       preferred_element_type=f32) + b_msg_ref[...])
    # fused input-side GRU gate pre-activations for all steps   -> (L, B, 3*H_pad)
    gi_scr[...] = (jnp.dot(mx(emb_msg), mx(w_i_ref[...]),
                           preferred_element_type=f32)
                   + b_i_ref[...]).reshape(L, B, 3 * H_pad)

    b_hn = b_hn_ref[...]

    # --- recurrent chain (GRUCell semantics, gate order r, z, n) -------------
    def step(t, h):
        gi = gi_scr[t]                                               # (B, 3*H_pad)
        gh = jnp.dot(h, w_h_ref[...], preferred_element_type=f32)    # (B, 3*H_pad)
        r = jax.nn.sigmoid(gi[:, 0:H_pad] + gh[:, 0:H_pad])
        z = jax.nn.sigmoid(gi[:, H_pad:2 * H_pad] + gh[:, H_pad:2 * H_pad])
        n = jnp.tanh(gi[:, 2 * H_pad:] + r * (gh[:, 2 * H_pad:] + b_hn))
        h_new = (1.0 - z) * n + z * h                                # (B, H_pad)
        h_all_scr[t] = h_new
        return h_new

    h0 = jnp.zeros((B, H_pad), dtype=f32)      # prev_hidden = None -> zeros
    jax.lax.fori_loop(0, L, step, h0, unroll=min(L, 8))

    # --- post-loop: energies + log-softmax for ALL steps ---------------------
    if C != C_pad:
        lane = jax.lax.broadcasted_iota(jnp.int32, (L, C_pad), 1)
    for b in range(B):                         # static unroll over batch
        h_b = h_all_scr[:, b, :]                                     # (L, H_pad)
        e_b = jax.lax.dot_general(                                   # (L, C_pad)
            h_b, emb_in_scr[b],
            dimension_numbers=(((1,), (1,)), ((), ())),
            preferred_element_type=f32)
        if C != C_pad:
            e_b = jnp.where(lane < C, e_b, f32(-1e30))   # mask padded candidates
        m = jnp.max(e_b, axis=-1, keepdims=True)
        lse = jnp.log(jnp.sum(jnp.exp(e_b - m), axis=-1, keepdims=True)) + m
        out_ref[b] = (e_b - lse).astype(out_ref.dtype)


# ----------------------------------------------------------------------------
# Wrapper
# ----------------------------------------------------------------------------
def rnn_receiver_gs(message, receiver_input, params, *, use_bf16_matmul=False):
    """message: (B, L, V); receiver_input: (B, C, F). Returns (B, L, C)."""
    (w_msg, b_msg, w_inp, b_inp, w_ih, b_ih, w_hh, b_hh) = params

    B, L, V = message.shape
    _, C, F = receiver_input.shape
    H = w_hh.shape[1]
    E = w_msg.shape[0]
    H_pad = _round_up(H, 128)
    C_pad = _round_up(C, 128)

    def pad_last(x, target):
        return jnp.pad(x, [(0, 0)] * (x.ndim - 1) + [(0, target - x.shape[-1])])

    # --- one-time layout prep in the wrapper (XLA, off the kernel) ----------
    msg2d = jnp.transpose(message, (1, 0, 2)).reshape(L * B, V)      # step-major
    inp2d = jnp.pad(receiver_input,
                    ((0, 0), (0, C_pad - C), (0, 0))).reshape(B * C_pad, F)

    w_inp_t = pad_last(jnp.transpose(w_inp), H_pad)                  # (F, H_pad)
    b_inp_p = pad_last(b_inp, H_pad)                                 # (1, H_pad)
    w_msg_t = jnp.transpose(w_msg)                                   # (V, E)

    # fused, per-gate lane-padded GRU weights (gate order r, z, n);
    # padded columns/rows are zero so padding never leaks into the state.
    w_i_fused = jnp.concatenate(
        [pad_last(jnp.transpose(w_ih[g * H:(g + 1) * H]), H_pad) for g in range(3)],
        axis=1)                                                      # (E, 3*H_pad)
    w_h_fused = jnp.concatenate(
        [jnp.pad(jnp.transpose(w_hh[g * H:(g + 1) * H]),
                 ((0, H_pad - H), (0, H_pad - H))) for g in range(3)],
        axis=1)                                                      # (H_pad, 3*H_pad)
    b_i_fused = jnp.concatenate(
        [pad_last(b_ih[:, 0:H] + b_hh[:, 0:H], H_pad),
         pad_last(b_ih[:, H:2 * H] + b_hh[:, H:2 * H], H_pad),
         pad_last(b_ih[:, 2 * H:3 * H], H_pad)], axis=1)             # (1, 3*H_pad)
    b_hn = pad_last(b_hh[:, 2 * H:3 * H], H_pad)                     # (1, H_pad)

    def full(shape):
        return pl.BlockSpec(shape, lambda *i: (0,) * len(shape))

    grid_spec = pltpu.PrefetchScalarGridSpec(
        num_scalar_prefetch=0,
        grid=(1,),
        in_specs=[
            full((L * B, V)),                       # message (step-major rows)
            full((B * C_pad, F)),                   # receiver input (padded C)
            full((F, H_pad)), full((1, H_pad)),     # input encoder
            full((V, E)), full((1, E)),             # message encoder
            full((E, 3 * H_pad)), full((1, 3 * H_pad)),      # fused GRU input side
            full((H_pad, 3 * H_pad)), full((1, H_pad)),      # fused GRU hidden side
        ],
        out_specs=pl.BlockSpec((B, L, C_pad), lambda i: (0, 0, 0)),
        scratch_shapes=[
            pltpu.VMEM((L, B, 3 * H_pad), jnp.float32),   # gi, all steps
            pltpu.VMEM((L, B, H_pad), jnp.float32),       # h_t, all steps
            pltpu.VMEM((B, C_pad, H_pad), jnp.float32),   # candidate embeddings
        ],
    )

    # explicit VMEM budget (inputs/outputs are double-buffered even at grid=(1,))
    f32b = 4
    B8 = _round_up(B, 8)
    n_in = (L * B * V + B * C_pad * F + F * H_pad + H_pad + V * E + E
            + E * 3 * H_pad + 3 * H_pad + H_pad * 3 * H_pad + H_pad)
    n_out = B * L * C_pad
    n_scratch = L * B8 * 3 * H_pad + L * B8 * H_pad + B * C_pad * H_pad
    vmem_limit = int(2 * (n_in + n_out) * f32b + n_scratch * f32b + (4 << 20))
    vmem_limit = max(16 << 20, min(vmem_limit, 100 << 20))

    out = pl.pallas_call(
        functools.partial(rnn_receiver_gs_kernel, L=L, B=B, C=C,
                          C_pad=C_pad, H_pad=H_pad, use_bf16=use_bf16_matmul),
        out_shape=jax.ShapeDtypeStruct((B, L, C_pad), jnp.float32),
        grid_spec=grid_spec,
        compiler_params=pltpu.CompilerParams(
            dimension_semantics=("arbitrary",),
            vmem_limit_bytes=vmem_limit),
    )(msg2d, inp2d, w_inp_t, b_inp_p, w_msg_t, b_msg,
      w_i_fused, b_i_fused, w_h_fused, b_hn)

    # torch.stack(outputs, dim=1) -> (B, L, C); drop candidate padding
    return out[:, :, :C]


# ----------------------------------------------------------------------------
# Pure-JAX reference (mirrors the PyTorch forward)
# ----------------------------------------------------------------------------
def rnn_receiver_gs_ref(message, receiver_input, params):
    (w_msg, b_msg, w_inp, b_inp, w_ih, b_ih, w_hh, b_hh) = params
    hi = jax.lax.Precision.HIGHEST
    dot = lambda a, b: jnp.matmul(a, b, precision=hi)

    B, L, V = message.shape
    H = w_hh.shape[1]

    emb_in = jnp.tanh(dot(receiver_input, w_inp.T) + b_inp)   # (B, C, H)
    emb_msg = dot(message, w_msg.T) + b_msg                   # (B, L, E)

    h = jnp.zeros((B, H), dtype=jnp.float32)                  # prev_hidden=None
    outs = []
    for t in range(L):
        e_t = emb_msg[:, t]
        gi = dot(e_t, w_ih.T) + b_ih
        gh = dot(h, w_hh.T) + b_hh
        r = jax.nn.sigmoid(gi[:, :H] + gh[:, :H])
        z = jax.nn.sigmoid(gi[:, H:2 * H] + gh[:, H:2 * H])
        n = jnp.tanh(gi[:, 2 * H:] + r * gh[:, 2 * H:])
        h = (1.0 - z) * n + z * h
        energies = jnp.einsum('bch,bh->bc', emb_in, h, precision=hi)
        outs.append(jax.nn.log_softmax(energies, axis=1))
    return jnp.stack(outs, axis=1)                            # (B, L, C)


# ----------------------------------------------------------------------------
if __name__ == "__main__":
    # small opts: vocab_size=10, embedding=16, n_features=16, receiver_hidden=32,
    #             max_len=8, n_candidates=4, receiver_cell='gru', image_input=False
    B, L, V, E, F, H, C = 4, 8, 10, 16, 16, 32, 4

    key = jax.random.PRNGKey(0)
    ks = jax.random.split(key, 10)

    # message: soft (Gumbel-Softmax-like) symbols from a sender
    message = jax.nn.softmax(
        jax.random.normal(ks[0], (B, L, V), dtype=jnp.float32) / 0.7, axis=-1)
    # receiver input: candidate feature vectors
    receiver_input = jax.random.normal(ks[1], (B, C, F), dtype=jnp.float32)

    # deterministic synthetic parameters (PyTorch shapes, biases as (1, N))
    w_msg = 0.2 * jax.random.normal(ks[2], (E, V), dtype=jnp.float32)
    b_msg = 0.1 * jax.random.normal(ks[3], (1, E), dtype=jnp.float32)
    w_inp = 0.2 * jax.random.normal(ks[4], (H, F), dtype=jnp.float32)
    b_inp = 0.1 * jax.random.normal(ks[5], (1, H), dtype=jnp.float32)
    w_ih = 0.2 * jax.random.normal(ks[6], (3 * H, E), dtype=jnp.float32)
    b_ih = 0.1 * jax.random.normal(ks[7], (1, 3 * H), dtype=jnp.float32)
    w_hh = 0.2 * jax.random.normal(ks[8], (3 * H, H), dtype=jnp.float32)
    b_hh = 0.1 * jax.random.normal(ks[9], (1, 3 * H), dtype=jnp.float32)

    params = (w_msg, b_msg, w_inp, b_inp, w_ih, b_ih, w_hh, b_hh)

    out = rnn_receiver_gs(message, receiver_input, params)
    out = jax.block_until_ready(out)

    out_ref = rnn_receiver_gs_ref(message, receiver_input, params)

    assert out.shape == (B, L, C)
    assert jnp.allclose(out, out_ref, atol=2e-3, rtol=2e-3), \
        float(jnp.max(jnp.abs(out - out_ref)))

    print("KERNEL_OK")
</pallas_src>

<mosaic_0001>
module attributes {stable_mosaic.version = 11 : i64} {
  func.func @rnn_receiver_gs_kernel(%arg0: i32, %arg1: memref<32x10xf32, #tpu.memory_space<vmem>>, %arg2: memref<512x16xf32, #tpu.memory_space<vmem>>, %arg3: memref<16x128xf32, #tpu.memory_space<vmem>>, %arg4: memref<1x128xf32, #tpu.memory_space<vmem>>, %arg5: memref<10x16xf32, #tpu.memory_space<vmem>>, %arg6: memref<1x16xf32, #tpu.memory_space<vmem>>, %arg7: memref<16x384xf32, #tpu.memory_space<vmem>>, %arg8: memref<1x384xf32, #tpu.memory_space<vmem>>, %arg9: memref<128x384xf32, #tpu.memory_space<vmem>>, %arg10: memref<1x128xf32, #tpu.memory_space<vmem>>, %arg11: memref<4x8x128xf32, #tpu.memory_space<vmem>>, %arg12: memref<8x4x384xf32, #tpu.memory_space<vmem>>, %arg13: memref<8x4x128xf32, #tpu.memory_space<vmem>>, %arg14: memref<4x128x128xf32, #tpu.memory_space<vmem>>) attributes {dimension_semantics = [#tpu.dimension_semantics<arbitrary>], iteration_bounds = array<i64: 1>, scalar_prefetch = 0 : i64, scratch_operands = 3 : i64, tpu.core_type = #tpu.core_type<tc>, window_params = [{pipeline_mode = #tpu.pipeline_mode<synchronous>, transform_indices = @transform_0, window_bounds = array<i64: 32, 10>}, {pipeline_mode = #tpu.pipeline_mode<synchronous>, transform_indices = @transform_1, window_bounds = array<i64: 512, 16>}, {pipeline_mode = #tpu.pipeline_mode<synchronous>, transform_indices = @transform_2, window_bounds = array<i64: 16, 128>}, {pipeline_mode = #tpu.pipeline_mode<synchronous>, transform_indices = @transform_3, window_bounds = array<i64: 1, 128>}, {pipeline_mode = #tpu.pipeline_mode<synchronous>, transform_indices = @transform_4, window_bounds = array<i64: 10, 16>}, {pipeline_mode = #tpu.pipeline_mode<synchronous>, transform_indices = @transform_5, window_bounds = array<i64: 1, 16>}, {pipeline_mode = #tpu.pipeline_mode<synchronous>, transform_indices = @transform_6, window_bounds = array<i64: 16, 384>}, {pipeline_mode = #tpu.pipeline_mode<synchronous>, transform_indices = @transform_7, window_bounds = array<i64: 1, 384>}, {pipeline_mode = #tpu.pipeline_mode<synchronous>, transform_indices = @transform_8, window_bounds = array<i64: 128, 384>}, {pipeline_mode = #tpu.pipeline_mode<synchronous>, transform_indices = @transform_9, window_bounds = array<i64: 1, 128>}, {pipeline_mode = #tpu.pipeline_mode<synchronous>, transform_indices = @transform_10, window_bounds = array<i64: 4, 8, 128>}]} {
    %c0 = arith.constant 0 : index
    %c0_0 = arith.constant 0 : index
    %0 = vector.load %arg2[%c0, %c0_0] : memref<512x16xf32, #tpu.memory_space<vmem>>, vector<512x16xf32>
    %c0_1 = arith.constant 0 : index
    %c0_2 = arith.constant 0 : index
    %1 = vector.load %arg3[%c0_1, %c0_2] : memref<16x128xf32, #tpu.memory_space<vmem>>, vector<16x128xf32>
    %cst = arith.constant dense<0.000000e+00> : vector<512x128xf32>
    %2 = tpu.matmul %0, %1, %cst {dimension_numbers = #tpu.dot_dimension_numbers<[1], [0], [0], [1], [0, 0, 1, 1], [], []>} : vector<512x16xf32>, vector<16x128xf32>, vector<512x128xf32> -> vector<512x128xf32>
    %c0_3 = arith.constant 0 : index
    %c0_4 = arith.constant 0 : index
    %3 = vector.load %arg4[%c0_3, %c0_4] : memref<1x128xf32, #tpu.memory_space<vmem>>, vector<1x128xf32>
    %4 = vector.broadcast %3 : vector<1x128xf32> to vector<512x128xf32>
    %5 = arith.addf %2, %4 : vector<512x128xf32>
    %6 = math.tanh %5 : vector<512x128xf32>
    %7 = vector.shape_cast %6 : vector<512x128xf32> to vector<4x128x128xf32>
    %c0_5 = arith.constant 0 : index
    %c0_6 = arith.constant 0 : index
    %c0_7 = arith.constant 0 : index
    %8 = vector.load %arg14[%c0_5, %c0_6, %c0_7] : memref<4x128x128xf32, #tpu.memory_space<vmem>>, vector<4x128x128xf32>
    tpu.vector_store %arg14[%c0_5, %c0_6, %c0_7], %7 {strides = array<i32>} : memref<4x128x128xf32, #tpu.memory_space<vmem>>, vector<4x128x128xf32>,
    %c0_8 = arith.constant 0 : index
    %c0_9 = arith.constant 0 : index
    %9 = vector.load %arg1[%c0_8, %c0_9] : memref<32x10xf32, #tpu.memory_space<vmem>>, vector<32x10xf32>
    %c0_10 = arith.constant 0 : index
    %c0_11 = arith.constant 0 : index
    %10 = vector.load %arg5[%c0_10, %c0_11] : memref<10x16xf32, #tpu.memory_space<vmem>>, vector<10x16xf32>
    %cst_12 = arith.constant dense<0.000000e+00> : vector<32x16xf32>
    %11 = tpu.matmul %9, %10, %cst_12 {dimension_numbers = #tpu.dot_dimension_numbers<[1], [0], [0], [1], [0, 0, 1, 1], [], []>} : vector<32x10xf32>, vector<10x16xf32>, vector<32x16xf32> -> vector<32x16xf32>
    %c0_13 = arith.constant 0 : index
    %c0_14 = arith.constant 0 : index
    %12 = vector.load %arg6[%c0_13, %c0_14] : memref<1x16xf32, #tpu.memory_space<vmem>>, vector<1x16xf32>
    %13 = vector.broadcast %12 : vector<1x16xf32> to vector<32x16xf32>
    %14 = arith.addf %11, %13 : vector<32x16xf32>
    %c0_15 = arith.constant 0 : index
    %c0_16 = arith.constant 0 : index
    %15 = vector.load %arg7[%c0_15, %c0_16] : memref<16x384xf32, #tpu.memory_space<vmem>>, vector<16x384xf32>
    %cst_17 = arith.constant dense<0.000000e+00> : vector<32x384xf32>
    %16 = tpu.matmul %14, %15, %cst_17 {dimension_numbers = #tpu.dot_dimension_numbers<[1], [0], [0], [1], [0, 0, 1, 1], [], []>} : vector<32x16xf32>, vector<16x384xf32>, vector<32x384xf32> -> vector<32x384xf32>
    %c0_18 = arith.constant 0 : index
    %c0_19 = arith.constant 0 : index
    %17 = vector.load %arg8[%c0_18, %c0_19] : memref<1x384xf32, #tpu.memory_space<vmem>>, vector<1x384xf32>
    %18 = vector.broadcast %17 : vector<1x384xf32> to vector<32x384xf32>
    %19 = arith.addf %16, %18 : vector<32x384xf32>
    %20 = vector.shape_cast %19 : vector<32x384xf32> to vector<8x4x384xf32>
    %c0_20 = arith.constant 0 : index
    %c0_21 = arith.constant 0 : index
    %c0_22 = arith.constant 0 : index
    %21 = vector.load %arg12[%c0_20, %c0_21, %c0_22] : memref<8x4x384xf32, #tpu.memory_space<vmem>>, vector<8x4x384xf32>
    tpu.vector_store %arg12[%c0_20, %c0_21, %c0_22], %20 {strides = array<i32>} : memref<8x4x384xf32, #tpu.memory_space<vmem>>, vector<8x4x384xf32>,
    %c0_23 = arith.constant 0 : index
    %c0_24 = arith.constant 0 : index
    %22 = vector.load %arg10[%c0_23, %c0_24] : memref<1x128xf32, #tpu.memory_space<vmem>>, vector<1x128xf32>
    %cst_25 = arith.constant 0.000000e+00 : f32
    %23 = vector.broadcast %cst_25 : f32 to vector<4x128xf32>
    %c0_i32 = arith.constant 0 : i32
    %24 = arith.index_cast %c0_i32 : i32 to index
    %c0_26 = arith.constant 0 : index
    %c0_27 = arith.constant 0 : index
    %25 = vector.load %arg12[%24, %c0_26, %c0_27] : memref<8x4x384xf32, #tpu.memory_space<vmem>>, vector<1x4x384xf32>
    %26 = vector.shape_cast %25 : vector<1x4x384xf32> to vector<4x384xf32>
    %c0_28 = arith.constant 0 : index
    %c0_29 = arith.constant 0 : index
    %27 = vector.load %arg9[%c0_28, %c0_29] : memref<128x384xf32, #tpu.memory_space<vmem>>, vector<128x384xf32>
    %cst_30 = arith.constant dense<0.000000e+00> : vector<4x384xf32>
    %28 = tpu.matmul %23, %27, %cst_30 {dimension_numbers = #tpu.dot_dimension_numbers<[1], [0], [0], [1], [0, 0, 1, 1], [], []>} : vector<4x128xf32>, vector<128x384xf32>, vector<4x384xf32> -> vector<4x384xf32>
    %29 = vector.extract_strided_slice %26 {offsets = [0, 0], sizes = [4, 128], strides = [1, 1]} : vector<4x384xf32> to vector<4x128xf32>
    %30 = vector.extract_strided_slice %28 {offsets = [0, 0], sizes = [4, 128], strides = [1, 1]} : vector<4x384xf32> to vector<4x128xf32>
    %31 = arith.addf %29, %30 : vector<4x128xf32>
    %32 = arith.negf %31 : vector<4x128xf32>
    %33 = math.exp %32 : vector<4x128xf32>
    %cst_31 = arith.constant 1.000000e+00 : f32
    %34 = vector.broadcast %cst_31 : f32 to vector<4x128xf32>
    %35 = arith.addf %34, %33 : vector<4x128xf32>
    %36 = arith.divf %34, %35 : vector<4x128xf32>
    %37 = vector.extract_strided_slice %26 {offsets = [0, 128], sizes = [4, 128], strides = [1, 1]} : vector<4x384xf32> to vector<4x128xf32>
    %38 = vector.extract_strided_slice %28 {offsets = [0, 128], sizes = [4, 128], strides = [1, 1]} : vector<4x384xf32> to vector<4x128xf32>
    %39 = arith.addf %37, %38 : vector<4x128xf32>
    %40 = arith.negf %39 : vector<4x128xf32>
    %41 = math.exp %40 : vector<4x128xf32>
    %cst_32 = arith.constant 1.000000e+00 : f32
    %42 = vector.broadcast %cst_32 : f32 to vector<4x128xf32>
    %43 = arith.addf %42, %41 : vector<4x128xf32>
    %44 = arith.divf %42, %43 : vector<4x128xf32>
    %45 = vector.extract_strided_slice %26 {offsets = [0, 256], sizes = [4, 128], strides = [1, 1]} : vector<4x384xf32> to vector<4x128xf32>
    %46 = vector.extract_strided_slice %28 {offsets = [0, 256], sizes = [4, 128], strides = [1, 1]} : vector<4x384xf32> to vector<4x128xf32>
    %47 = vector.broadcast %22 : vector<1x128xf32> to vector<4x128xf32>
    %48 = arith.addf %46, %47 : vector<4x128xf32>
    %49 = arith.mulf %36, %48 : vector<4x128xf32>
    %50 = arith.addf %45, %49 : vector<4x128xf32>
    %51 = math.tanh %50 : vector<4x128xf32>
    %cst_33 = arith.constant 1.000000e+00 : f32
    %52 = vector.broadcast %cst_33 : f32 to vector<4x128xf32>
    %53 = arith.subf %52, %44 : vector<4x128xf32>
    %54 = arith.mulf %53, %51 : vector<4x128xf32>
    %55 = arith.mulf %44, %23 : vector<4x128xf32>
    %56 = arith.addf %54, %55 : vector<4x128xf32>
    %57 = arith.index_cast %c0_i32 : i32 to index
    %c0_34 = arith.constant 0 : index
    %c0_35 = arith.constant 0 : index
    %58 = vector.load %arg13[%57, %c0_34, %c0_35] : memref<8x4x128xf32, #tpu.memory_space<vmem>>, vector<1x4x128xf32>
    %59 = vector.shape_cast %58 : vector<1x4x128xf32> to vector<4x128xf32>
    %60 = vector.shape_cast %56 : vector<4x128xf32> to vector<1x4x128xf32>
    tpu.vector_store %arg13[%57, %c0_34, %c0_35], %60 {strides = array<i32>} : memref<8x4x128xf32, #tpu.memory_space<vmem>>, vector<1x4x128xf32>,
    %c1_i32 = arith.constant 1 : i32
    %61 = arith.index_cast %c1_i32 : i32 to index
    %c0_36 = arith.constant 0 : index
    %c0_37 = arith.constant 0 : index
    %62 = vector.load %arg12[%61, %c0_36, %c0_37] : memref<8x4x384xf32, #tpu.memory_space<vmem>>, vector<1x4x384xf32>
    %63 = vector.shape_cast %62 : vector<1x4x384xf32> to vector<4x384xf32>
    %c0_38 = arith.constant 0 : index
    %c0_39 = arith.constant 0 : index
    %64 = vector.load %arg9[%c0_38, %c0_39] : memref<128x384xf32, #tpu.memory_space<vmem>>, vector<128x384xf32>
    %cst_40 = arith.constant dense<0.000000e+00> : vector<4x384xf32>
    %65 = tpu.matmul %56, %64, %cst_40 {dimension_numbers = #tpu.dot_dimension_numbers<[1], [0], [0], [1], [0, 0, 1, 1], [], []>} : vector<4x128xf32>, vector<128x384xf32>, vector<4x384xf32> -> vector<4x384xf32>
    %66 = vector.extract_strided_slice %63 {offsets = [0, 0], sizes = [4, 128], strides = [1, 1]} : vector<4x384xf32> to vector<4x128xf32>
    %67 = vector.extract_strided_slice %65 {offsets = [0, 0], sizes = [4, 128], strides = [1, 1]} : vector<4x384xf32> to vector<4x128xf32>
    %68 = arith.addf %66, %67 : vector<4x128xf32>
    %69 = arith.negf %68 : vector<4x128xf32>
    %70 = math.exp %69 : vector<4x128xf32>
    %cst_41 = arith.constant 1.000000e+00 : f32
    %71 = vector.broadcast %cst_41 : f32 to vector<4x128xf32>
    %72 = arith.addf %71, %70 : vector<4x128xf32>
    %73 = arith.divf %71, %72 : vector<4x128xf32>
    %74 = vector.extract_strided_slice %63 {offsets = [0, 128], sizes = [4, 128], strides = [1, 1]} : vector<4x384xf32> to vector<4x128xf32>
    %75 = vector.extract_strided_slice %65 {offsets = [0, 128], sizes = [4, 128], strides = [1, 1]} : vector<4x384xf32> to vector<4x128xf32>
    %76 = arith.addf %74, %75 : vector<4x128xf32>
    %77 = arith.negf %76 : vector<4x128xf32>
    %78 = math.exp %77 : vector<4x128xf32>
    %cst_42 = arith.constant 1.000000e+00 : f32
    %79 = vector.broadcast %cst_42 : f32 to vector<4x128xf32>
    %80 = arith.addf %79, %78 : vector<4x128xf32>
    %81 = arith.divf %79, %80 : vector<4x128xf32>
    %82 = vector.extract_strided_slice %63 {offsets = [0, 256], sizes = [4, 128], strides = [1, 1]} : vector<4x384xf32> to vector<4x128xf32>
    %83 = vector.extract_strided_slice %65 {offsets = [0, 256], sizes = [4, 128], strides = [1, 1]} : vector<4x384xf32> to vector<4x128xf32>
    %84 = vector.broadcast %22 : vector<1x128xf32> to vector<4x128xf32>
    %85 = arith.addf %83, %84 : vector<4x128xf32>
    %86 = arith.mulf %73, %85 : vector<4x128xf32>
    %87 = arith.addf %82, %86 : vector<4x128xf32>
    %88 = math.tanh %87 : vector<4x128xf32>
    %cst_43 = arith.constant 1.000000e+00 : f32
    %89 = vector.broadcast %cst_43 : f32 to vector<4x128xf32>
    %90 = arith.subf %89, %81 : vector<4x128xf32>
    %91 = arith.mulf %90, %88 : vector<4x128xf32>
    %92 = arith.mulf %81, %56 : vector<4x128xf32>
    %93 = arith.addf %91, %92 : vector<4x128xf32>
    %94 = arith.index_cast %c1_i32 : i32 to index
    %c0_44 = arith.constant 0 : index
    %c0_45 = arith.constant 0 : index
    %95 = vector.load %arg13[%94, %c0_44, %c0_45] : memref<8x4x128xf32, #tpu.memory_space<vmem>>, vector<1x4x128xf32>
    %96 = vector.shape_cast %95 : vector<1x4x128xf32> to vector<4x128xf32>
    %97 = vector.shape_cast %93 : vector<4x128xf32> to vector<1x4x128xf32>
    tpu.vector_store %arg13[%94, %c0_44, %c0_45], %97 {strides = array<i32>} : memref<8x4x128xf32, #tpu.memory_space<vmem>>, vector<1x4x128xf32>,
    %c2_i32 = arith.constant 2 : i32
    %98 = arith.index_cast %c2_i32 : i32 to index
    %c0_46 = arith.constant 0 : index
    %c0_47 = arith.constant 0 : index
    %99 = vector.load %arg12[%98, %c0_46, %c0_47] : memref<8x4x384xf32, #tpu.memory_space<vmem>>, vector<1x4x384xf32>
    %100 = vector.shape_cast %99 : vector<1x4x384xf32> to vector<4x384xf32>
    %c0_48 = arith.constant 0 : index
    %c0_49 = arith.constant 0 : index
    %101 = vector.load %arg9[%c0_48, %c0_49] : memref<128x384xf32, #tpu.memory_space<vmem>>, vector<128x384xf32>
    %cst_50 = arith.constant dense<0.000000e+00> : vector<4x384xf32>
    %102 = tpu.matmul %93, %101, %cst_50 {dimension_numbers = #tpu.dot_dimension_numbers<[1], [0], [0], [1], [0, 0, 1, 1], [], []>} : vector<4x128xf32>, vector<128x384xf32>, vector<4x384xf32> -> vector<4x384xf32>
    %103 = vector.extract_strided_slice %100 {offsets = [0, 0], sizes = [4, 128], strides = [1, 1]} : vector<4x384xf32> to vector<4x128xf32>
    %104 = vector.extract_strided_slice %102 {offsets = [0, 0], sizes = [4, 128], strides = [1, 1]} : vector<4x384xf32> to vector<4x128xf32>
    %105 = arith.addf %103, %104 : vector<4x128xf32>
    %106 = arith.negf %105 : vector<4x128xf32>
    %107 = math.exp %106 : vector<4x128xf32>
    %cst_51 = arith.constant 1.000000e+00 : f32
    %108 = vector.broadcast %cst_51 : f32 to vector<4x128xf32>
    %109 = arith.addf %108, %107 : vector<4x128xf32>
    %110 = arith.divf %108, %109 : vector<4x128xf32>
    %111 = vector.extract_strided_slice %100 {offsets = [0, 128], sizes = [4, 128], strides = [1, 1]} : vector<4x384xf32> to vector<4x128xf32>
    %112 = vector.extract_strided_slice %102 {offsets = [0, 128], sizes = [4, 128], strides = [1, 1]} : vector<4x384xf32> to vector<4x128xf32>
    %113 = arith.addf %111, %112 : vector<4x128xf32>
    %114 = arith.negf %113 : vector<4x128xf32>
    %115 = math.exp %114 : vector<4x128xf32>
    %cst_52 = arith.constant 1.000000e+00 : f32
    %116 = vector.broadcast %cst_52 : f32 to vector<4x128xf32>
    %117 = arith.addf %116, %115 : vector<4x128xf32>
    %118 = arith.divf %116, %117 : vector<4x128xf32>
    %119 = vector.extract_strided_slice %100 {offsets = [0, 256], sizes = [4, 128], strides = [1, 1]} : vector<4x384xf32> to vector<4x128xf32>
    %120 = vector.extract_strided_slice %102 {offsets = [0, 256], sizes = [4, 128], strides = [1, 1]} : vector<4x384xf32> to vector<4x128xf32>
    %121 = vector.broadcast %22 : vector<1x128xf32> to vector<4x128xf32>
    %122 = arith.addf %120, %121 : vector<4x128xf32>
    %123 = arith.mulf %110, %122 : vector<4x128xf32>
    %124 = arith.addf %119, %123 : vector<4x128xf32>
    %125 = math.tanh %124 : vector<4x128xf32>
    %cst_53 = arith.constant 1.000000e+00 : f32
    %126 = vector.broadcast %cst_53 : f32 to vector<4x128xf32>
    %127 = arith.subf %126, %118 : vector<4x128xf32>
    %128 = arith.mulf %127, %125 : vector<4x128xf32>
    %129 = arith.mulf %118, %93 : vector<4x128xf32>
    %130 = arith.addf %128, %129 : vector<4x128xf32>
    %131 = arith.index_cast %c2_i32 : i32 to index
    %c0_54 = arith.constant 0 : index
    %c0_55 = arith.constant 0 : index
    %132 = vector.load %arg13[%131, %c0_54, %c0_55] : memref<8x4x128xf32, #tpu.memory_space<vmem>>, vector<1x4x128xf32>
    %133 = vector.shape_cast %132 : vector<1x4x128xf32> to vector<4x128xf32>
    %134 = vector.shape_cast %130 : vector<4x128xf32> to vector<1x4x128xf32>
    tpu.vector_store %arg13[%131, %c0_54, %c0_55], %134 {strides = array<i32>} : memref<8x4x128xf32, #tpu.memory_space<vmem>>, vector<1x4x128xf32>,
    %c3_i32 = arith.constant 3 : i32
    %135 = arith.index_cast %c3_i32 : i32 to index
    %c0_56 = arith.constant 0 : index
    %c0_57 = arith.constant 0 : index
    %136 = vector.load %arg12[%135, %c0_56, %c0_57] : memref<8x4x384xf32, #tpu.memory_space<vmem>>, vector<1x4x384xf32>
    %137 = vector.shape_cast %136 : vector<1x4x384xf32> to vector<4x384xf32>
    %c0_58 = arith.constant 0 : index
    %c0_59 = arith.constant 0 : index
    %138 = vector.load %arg9[%c0_58, %c0_59] : memref<128x384xf32, #tpu.memory_space<vmem>>, vector<128x384xf32>
    %cst_60 = arith.constant dense<0.000000e+00> : vector<4x384xf32>
    %139 = tpu.matmul %130, %138, %cst_60 {dimension_numbers = #tpu.dot_dimension_numbers<[1], [0], [0], [1], [0, 0, 1, 1], [], []>} : vector<4x128xf32>, vector<128x384xf32>, vector<4x384xf32> -> vector<4x384xf32>
    %140 = vector.extract_strided_slice %137 {offsets = [0, 0], sizes = [4, 128], strides = [1, 1]} : vector<4x384xf32> to vector<4x128xf32>
    %141 = vector.extract_strided_slice %139 {offsets = [0, 0], sizes = [4, 128], strides = [1, 1]} : vector<4x384xf32> to vector<4x128xf32>
    %142 = arith.addf %140, %141 : vector<4x128xf32>
    %143 = arith.negf %142 : vector<4x128xf32>
    %144 = math.exp %143 : vector<4x128xf32>
    %cst_61 = arith.constant 1.000000e+00 : f32
    %145 = vector.broadcast %cst_61 : f32 to vector<4x128xf32>
    %146 = arith.addf %145, %144 : vector<4x128xf32>
    %147 = arith.divf %145, %146 : vector<4x128xf32>
    %148 = vector.extract_strided_slice %137 {offsets = [0, 128], sizes = [4, 128], strides = [1, 1]} : vector<4x384xf32> to vector<4x128xf32>
    %149 = vector.extract_strided_slice %139 {offsets = [0, 128], sizes = [4, 128], strides = [1, 1]} : vector<4x384xf32> to vector<4x128xf32>
    %150 = arith.addf %148, %149 : vector<4x128xf32>
    %151 = arith.negf %150 : vector<4x128xf32>
    %152 = math.exp %151 : vector<4x128xf32>
    %cst_62 = arith.constant 1.000000e+00 : f32
    %153 = vector.broadcast %cst_62 : f32 to vector<4x128xf32>
    %154 = arith.addf %153, %152 : vector<4x128xf32>
    %155 = arith.divf %153, %154 : vector<4x128xf32>
    %156 = vector.extract_strided_slice %137 {offsets = [0, 256], sizes = [4, 128], strides = [1, 1]} : vector<4x384xf32> to vector<4x128xf32>
    %157 = vector.extract_strided_slice %139 {offsets = [0, 256], sizes = [4, 128], strides = [1, 1]} : vector<4x384xf32> to vector<4x128xf32>
    %158 = vector.broadcast %22 : vector<1x128xf32> to vector<4x128xf32>
    %159 = arith.addf %157, %158 : vector<4x128xf32>
    %160 = arith.mulf %147, %159 : vector<4x128xf32>
    %161 = arith.addf %156, %160 : vector<4x128xf32>
    %162 = math.tanh %161 : vector<4x128xf32>
    %cst_63 = arith.constant 1.000000e+00 : f32
    %163 = vector.broadcast %cst_63 : f32 to vector<4x128xf32>
    %164 = arith.subf %163, %155 : vector<4x128xf32>
    %165 = arith.mulf %164, %162 : vector<4x128xf32>
    %166 = arith.mulf %155, %130 : vector<4x128xf32>
    %167 = arith.addf %165, %166 : vector<4x128xf32>
    %168 = arith.index_cast %c3_i32 : i32 to index
    %c0_64 = arith.constant 0 : index
    %c0_65 = arith.constant 0 : index
    %169 = vector.load %arg13[%168, %c0_64, %c0_65] : memref<8x4x128xf32, #tpu.memory_space<vmem>>, vector<1x4x128xf32>
    %170 = vector.shape_cast %169 : vector<1x4x128xf32> to vector<4x128xf32>
    %171 = vector.shape_cast %167 : vector<4x128xf32> to vector<1x4x128xf32>
    tpu.vector_store %arg13[%168, %c0_64, %c0_65], %171 {strides = array<i32>} : memref<8x4x128xf32, #tpu.memory_space<vmem>>, vector<1x4x128xf32>,
    %c4_i32 = arith.constant 4 : i32
    %172 = arith.index_cast %c4_i32 : i32 to index
    %c0_66 = arith.constant 0 : index
    %c0_67 = arith.constant 0 : index
    %173 = vector.load %arg12[%172, %c0_66, %c0_67] : memref<8x4x384xf32, #tpu.memory_space<vmem>>, vector<1x4x384xf32>
    %174 = vector.shape_cast %173 : vector<1x4x384xf32> to vector<4x384xf32>
    %c0_68 = arith.constant 0 : index
    %c0_69 = arith.constant 0 : index
    %175 = vector.load %arg9[%c0_68, %c0_69] : memref<128x384xf32, #tpu.memory_space<vmem>>, vector<128x384xf32>
    %cst_70 = arith.constant dense<0.000000e+00> : vector<4x384xf32>
    %176 = tpu.matmul %167, %175, %cst_70 {dimension_numbers = #tpu.dot_dimension_numbers<[1], [0], [0], [1], [0, 0, 1, 1], [], []>} : vector<4x128xf32>, vector<128x384xf32>, vector<4x384xf32> -> vector<4x384xf32>
    %177 = vector.extract_strided_slice %174 {offsets = [0, 0], sizes = [4, 128], strides = [1, 1]} : vector<4x384xf32> to vector<4x128xf32>
    %178 = vector.extract_strided_slice %176 {offsets = [0, 0], sizes = [4, 128], strides = [1, 1]} : vector<4x384xf32> to vector<4x128xf32>
    %179 = arith.addf %177, %178 : vector<4x128xf32>
    %180 = arith.negf %179 : vector<4x128xf32>
    %181 = math.exp %180 : vector<4x128xf32>
    %cst_71 = arith.constant 1.000000e+00 : f32
    %182 = vector.broadcast %cst_71 : f32 to vector<4x128xf32>
    %183 = arith.addf %182, %181 : vector<4x128xf32>
    %184 = arith.divf %182, %183 : vector<4x128xf32>
    %185 = vector.extract_strided_slice %174 {offsets = [0, 128], sizes = [4, 128], strides = [1, 1]} : vector<4x384xf32> to vector<4x128xf32>
    %186 = vector.extract_strided_slice %176 {offsets = [0, 128], sizes = [4, 128], strides = [1, 1]} : vector<4x384xf32> to vector<4x128xf32>
    %187 = arith.addf %185, %186 : vector<4x128xf32>
    %188 = arith.negf %187 : vector<4x128xf32>
    %189 = math.exp %188 : vector<4x128xf32>
    %cst_72 = arith.constant 1.000000e+00 : f32
    %190 = vector.broadcast %cst_72 : f32 to vector<4x128xf32>
    %191 = arith.addf %190, %189 : vector<4x128xf32>
    %192 = arith.divf %190, %191 : vector<4x128xf32>
    %193 = vector.extract_strided_slice %174 {offsets = [0, 256], sizes = [4, 128], strides = [1, 1]} : vector<4x384xf32> to vector<4x128xf32>
    %194 = vector.extract_strided_slice %176 {offsets = [0, 256], sizes = [4, 128], strides = [1, 1]} : vector<4x384xf32> to vector<4x128xf32>
    %195 = vector.broadcast %22 : vector<1x128xf32> to vector<4x128xf32>
    %196 = arith.addf %194, %195 : vector<4x128xf32>
    %197 = arith.mulf %184, %196 : vector<4x128xf32>
    %198 = arith.addf %193, %197 : vector<4x128xf32>
    %199 = math.tanh %198 : vector<4x128xf32>
    %cst_73 = arith.constant 1.000000e+00 : f32
    %200 = vector.broadcast %cst_73 : f32 to vector<4x128xf32>
    %201 = arith.subf %200, %192 : vector<4x128xf32>
    %202 = arith.mulf %201, %199 : vector<4x128xf32>
    %203 = arith.mulf %192, %167 : vector<4x128xf32>
    %204 = arith.addf %202, %203 : vector<4x128xf32>
    %205 = arith.index_cast %c4_i32 : i32 to index
    %c0_74 = arith.constant 0 : index
    %c0_75 = arith.constant 0 : index
    %206 = vector.load %arg13[%205, %c0_74, %c0_75] : memref<8x4x128xf32, #tpu.memory_space<vmem>>, vector<1x4x128xf32>
    %207 = vector.shape_cast %206 : vector<1x4x128xf32> to vector<4x128xf32>
    %208 = vector.shape_cast %204 : vector<4x128xf32> to vector<1x4x128xf32>
    tpu.vector_store %arg13[%205, %c0_74, %c0_75], %208 {strides = array<i32>} : memref<8x4x128xf32, #tpu.memory_space<vmem>>, vector<1x4x128xf32>,
    %c5_i32 = arith.constant 5 : i32
    %209 = arith.index_cast %c5_i32 : i32 to index
    %c0_76 = arith.constant 0 : index
    %c0_77 = arith.constant 0 : index
    %210 = vector.load %arg12[%209, %c0_76, %c0_77] : memref<8x4x384xf32, #tpu.memory_space<vmem>>, vector<1x4x384xf32>
    %211 = vector.shape_cast %210 : vector<1x4x384xf32> to vector<4x384xf32>
    %c0_78 = arith.constant 0 : index
    %c0_79 = arith.constant 0 : index
    %212 = vector.load %arg9[%c0_78, %c0_79] : memref<128x384xf32, #tpu.memory_space<vmem>>, vector<128x384xf32>
    %cst_80 = arith.constant dense<0.000000e+00> : vector<4x384xf32>
    %213 = tpu.matmul %204, %212, %cst_80 {dimension_numbers = #tpu.dot_dimension_numbers<[1], [0], [0], [1], [0, 0, 1, 1], [], []>} : vector<4x128xf32>, vector<128x384xf32>, vector<4x384xf32> -> vector<4x384xf32>
    %214 = vector.extract_strided_slice %211 {offsets = [0, 0], sizes = [4, 128], strides = [1, 1]} : vector<4x384xf32> to vector<4x128xf32>
    %215 = vector.extract_strided_slice %213 {offsets = [0, 0], sizes = [4, 128], strides = [1, 1]} : vector<4x384xf32> to vector<4x128xf32>
    %216 = arith.addf %214, %215 : vector<4x128xf32>
    %217 = arith.negf %216 : vector<4x128xf32>
    %218 = math.exp %217 : vector<4x128xf32>
    %cst_81 = arith.constant 1.000000e+00 : f32
    %219 = vector.broadcast %cst_81 : f32 to vector<4x128xf32>
    %220 = arith.addf %219, %218 : vector<4x128xf32>
    %221 = arith.divf %219, %220 : vector<4x128xf32>
    %222 = vector.extract_strided_slice %211 {offsets = [0, 128], sizes = [4, 128], strides = [1, 1]} : vector<4x384xf32> to vector<4x128xf32>
    %223 = vector.extract_strided_slice %213 {offsets = [0, 128], sizes = [4, 128], strides = [1, 1]} : vector<4x384xf32> to vector<4x128xf32>
    %224 = arith.addf %222, %223 : vector<4x128xf32>
    %225 = arith.negf %224 : vector<4x128xf32>
    %226 = math.exp %225 : vector<4x128xf32>
    %cst_82 = arith.constant 1.000000e+00 : f32
    %227 = vector.broadcast %cst_82 : f32 to vector<4x128xf32>
    %228 = arith.addf %227, %226 : vector<4x128xf32>
    %229 = arith.divf %227, %228 : vector<4x128xf32>
    %230 = vector.extract_strided_slice %211 {offsets = [0, 256], sizes = [4, 128], strides = [1, 1]} : vector<4x384xf32> to vector<4x128xf32>
    %231 = vector.extract_strided_slice %213 {offsets = [0, 256], sizes = [4, 128], strides = [1, 1]} : vector<4x384xf32> to vector<4x128xf32>
    %232 = vector.broadcast %22 : vector<1x128xf32> to vector<4x128xf32>
    %233 = arith.addf %231, %232 : vector<4x128xf32>
    %234 = arith.mulf %221, %233 : vector<4x128xf32>
    %235 = arith.addf %230, %234 : vector<4x128xf32>
    %236 = math.tanh %235 : vector<4x128xf32>
    %cst_83 = arith.constant 1.000000e+00 : f32
    %237 = vector.broadcast %cst_83 : f32 to vector<4x128xf32>
    %238 = arith.subf %237, %229 : vector<4x128xf32>
    %239 = arith.mulf %238, %236 : vector<4x128xf32>
    %240 = arith.mulf %229, %204 : vector<4x128xf32>
    %241 = arith.addf %239, %240 : vector<4x128xf32>
    %242 = arith.index_cast %c5_i32 : i32 to index
    %c0_84 = arith.constant 0 : index
    %c0_85 = arith.constant 0 : index
    %243 = vector.load %arg13[%242, %c0_84, %c0_85] : memref<8x4x128xf32, #tpu.memory_space<vmem>>, vector<1x4x128xf32>
    %244 = vector.shape_cast %243 : vector<1x4x128xf32> to vector<4x128xf32>
    %245 = vector.shape_cast %241 : vector<4x128xf32> to vector<1x4x128xf32>
    tpu.vector_store %arg13[%242, %c0_84, %c0_85], %245 {strides = array<i32>} : memref<8x4x128xf32, #tpu.memory_space<vmem>>, vector<1x4x128xf32>,
    %c6_i32 = arith.constant 6 : i32
    %246 = arith.index_cast %c6_i32 : i32 to index
    %c0_86 = arith.constant 0 : index
    %c0_87 = arith.constant 0 : index
    %247 = vector.load %arg12[%246, %c0_86, %c0_87] : memref<8x4x384xf32, #tpu.memory_space<vmem>>, vector<1x4x384xf32>
    %248 = vector.shape_cast %247 : vector<1x4x384xf32> to vector<4x384xf32>
    %c0_88 = arith.constant 0 : index
    %c0_89 = arith.constant 0 : index
    %249 = vector.load %arg9[%c0_88, %c0_89] : memref<128x384xf32, #tpu.memory_space<vmem>>, vector<128x384xf32>
    %cst_90 = arith.constant dense<0.000000e+00> : vector<4x384xf32>
    %250 = tpu.matmul %241, %249, %cst_90 {dimension_numbers = #tpu.dot_dimension_numbers<[1], [0], [0], [1], [0, 0, 1, 1], [], []>} : vector<4x128xf32>, vector<128x384xf32>, vector<4x384xf32> -> vector<4x384xf32>
    %251 = vector.extract_strided_slice %248 {offsets = [0, 0], sizes = [4, 128], strides = [1, 1]} : vector<4x384xf32> to vector<4x128xf32>
    %252 = vector.extract_strided_slice %250 {offsets = [0, 0], sizes = [4, 128], strides = [1, 1]} : vector<4x384xf32> to vector<4x128xf32>
    %253 = arith.addf %251, %252 : vector<4x128xf32>
    %254 = arith.negf %253 : vector<4x128xf32>
    %255 = math.exp %254 : vector<4x128xf32>
    %cst_91 = arith.constant 1.000000e+00 : f32
    %256 = vector.broadcast %cst_91 : f32 to vector<4x128xf32>
    %257 = arith.addf %256, %255 : vector<4x128xf32>
    %258 = arith.divf %256, %257 : vector<4x128xf32>
    %259 = vector.extract_strided_slice %248 {offsets = [0, 128], sizes = [4, 128], strides = [1, 1]} : vector<4x384xf32> to vector<4x128xf32>
    %260 = vector.extract_strided_slice %250 {offsets = [0, 128], sizes = [4, 128], strides = [1, 1]} : vector<4x384xf32> to vector<4x128xf32>
    %261 = arith.addf %259, %260 : vector<4x128xf32>
    %262 = arith.negf %261 : vector<4x128xf32>
    %263 = math.exp %262 : vector<4x128xf32>
    %cst_92 = arith.constant 1.000000e+00 : f32
    %264 = vector.broadcast %cst_92 : f32 to vector<4x128xf32>
    %265 = arith.addf %264, %263 : vector<4x128xf32>
    %266 = arith.divf %264, %265 : vector<4x128xf32>
    %267 = vector.extract_strided_slice %248 {offsets = [0, 256], sizes = [4, 128], strides = [1, 1]} : vector<4x384xf32> to vector<4x128xf32>
    %268 = vector.extract_strided_slice %250 {offsets = [0, 256], sizes = [4, 128], strides = [1, 1]} : vector<4x384xf32> to vector<4x128xf32>
    %269 = vector.broadcast %22 : vector<1x128xf32> to vector<4x128xf32>
    %270 = arith.addf %268, %269 : vector<4x128xf32>
    %271 = arith.mulf %258, %270 : vector<4x128xf32>
    %272 = arith.addf %267, %271 : vector<4x128xf32>
    %273 = math.tanh %272 : vector<4x128xf32>
    %cst_93 = arith.constant 1.000000e+00 : f32
    %274 = vector.broadcast %cst_93 : f32 to vector<4x128xf32>
    %275 = arith.subf %274, %266 : vector<4x128xf32>
    %276 = arith.mulf %275, %273 : vector<4x128xf32>
    %277 = arith.mulf %266, %241 : vector<4x128xf32>
    %278 = arith.addf %276, %277 : vector<4x128xf32>
    %279 = arith.index_cast %c6_i32 : i32 to index
    %c0_94 = arith.constant 0 : index
    %c0_95 = arith.constant 0 : index
    %280 = vector.load %arg13[%279, %c0_94, %c0_95] : memref<8x4x128xf32, #tpu.memory_space<vmem>>, vector<1x4x128xf32>
    %281 = vector.shape_cast %280 : vector<1x4x128xf32> to vector<4x128xf32>
    %282 = vector.shape_cast %278 : vector<4x128xf32> to vector<1x4x128xf32>
    tpu.vector_store %arg13[%279, %c0_94, %c0_95], %282 {strides = array<i32>} : memref<8x4x128xf32, #tpu.memory_space<vmem>>, vector<1x4x128xf32>,
    %c7_i32 = arith.constant 7 : i32
    %283 = arith.index_cast %c7_i32 : i32 to index
    %c0_96 = arith.constant 0 : index
    %c0_97 = arith.constant 0 : index
    %284 = vector.load %arg12[%283, %c0_96, %c0_97] : memref<8x4x384xf32, #tpu.memory_space<vmem>>, vector<1x4x384xf32>
    %285 = vector.shape_cast %284 : vector<1x4x384xf32> to vector<4x384xf32>
    %c0_98 = arith.constant 0 : index
    %c0_99 = arith.constant 0 : index
    %286 = vector.load %arg9[%c0_98, %c0_99] : memref<128x384xf32, #tpu.memory_space<vmem>>, vector<128x384xf32>
    %cst_100 = arith.constant dense<0.000000e+00> : vector<4x384xf32>
    %287 = tpu.matmul %278, %286, %cst_100 {dimension_numbers = #tpu.dot_dimension_numbers<[1], [0], [0], [1], [0, 0, 1, 1], [], []>} : vector<4x128xf32>, vector<128x384xf32>, vector<4x384xf32> -> vector<4x384xf32>
    %288 = vector.extract_strided_slice %285 {offsets = [0, 0], sizes = [4, 128], strides = [1, 1]} : vector<4x384xf32> to vector<4x128xf32>
    %289 = vector.extract_strided_slice %287 {offsets = [0, 0], sizes = [4, 128], strides = [1, 1]} : vector<4x384xf32> to vector<4x128xf32>
    %290 = arith.addf %288, %289 : vector<4x128xf32>
    %291 = arith.negf %290 : vector<4x128xf32>
    %292 = math.exp %291 : vector<4x128xf32>
    %cst_101 = arith.constant 1.000000e+00 : f32
    %293 = vector.broadcast %cst_101 : f32 to vector<4x128xf32>
    %294 = arith.addf %293, %292 : vector<4x128xf32>
    %295 = arith.divf %293, %294 : vector<4x128xf32>
    %296 = vector.extract_strided_slice %285 {offsets = [0, 128], sizes = [4, 128], strides = [1, 1]} : vector<4x384xf32> to vector<4x128xf32>
    %297 = vector.extract_strided_slice %287 {offsets = [0, 128], sizes = [4, 128], strides = [1, 1]} : vector<4x384xf32> to vector<4x128xf32>
    %298 = arith.addf %296, %297 : vector<4x128xf32>
    %299 = arith.negf %298 : vector<4x128xf32>
    %300 = math.exp %299 : vector<4x128xf32>
    %cst_102 = arith.constant 1.000000e+00 : f32
    %301 = vector.broadcast %cst_102 : f32 to vector<4x128xf32>
    %302 = arith.addf %301, %300 : vector<4x128xf32>
    %303 = arith.divf %301, %302 : vector<4x128xf32>
    %304 = vector.extract_strided_slice %285 {offsets = [0, 256], sizes = [4, 128], strides = [1, 1]} : vector<4x384xf32> to vector<4x128xf32>
    %305 = vector.extract_strided_slice %287 {offsets = [0, 256], sizes = [4, 128], strides = [1, 1]} : vector<4x384xf32> to vector<4x128xf32>
    %306 = vector.broadcast %22 : vector<1x128xf32> to vector<4x128xf32>
    %307 = arith.addf %305, %306 : vector<4x128xf32>
    %308 = arith.mulf %295, %307 : vector<4x128xf32>
    %309 = arith.addf %304, %308 : vector<4x128xf32>
    %310 = math.tanh %309 : vector<4x128xf32>
    %cst_103 = arith.constant 1.000000e+00 : f32
    %311 = vector.broadcast %cst_103 : f32 to vector<4x128xf32>
    %312 = arith.subf %311, %303 : vector<4x128xf32>
    %313 = arith.mulf %312, %310 : vector<4x128xf32>
    %314 = arith.mulf %303, %278 : vector<4x128xf32>
    %315 = arith.addf %313, %314 : vector<4x128xf32>
    %316 = arith.index_cast %c7_i32 : i32 to index
    %c0_104 = arith.constant 0 : index
    %c0_105 = arith.constant 0 : index
    %317 = vector.load %arg13[%316, %c0_104, %c0_105] : memref<8x4x128xf32, #tpu.memory_space<vmem>>, vector<1x4x128xf32>
    %318 = vector.shape_cast %317 : vector<1x4x128xf32> to vector<4x128xf32>
    %319 = vector.shape_cast %315 : vector<4x128xf32> to vector<1x4x128xf32>
    tpu.vector_store %arg13[%316, %c0_104, %c0_105], %319 {strides = array<i32>} : memref<8x4x128xf32, #tpu.memory_space<vmem>>, vector<1x4x128xf32>,
    %c8_i32 = arith.constant 8 : i32
    %320 = tpu.iota {dimensions = array<i32: 1>} : vector<8x128xi32>
    %c0_106 = arith.constant 0 : index
    %c0_107 = arith.constant 0 : index
    %c0_108 = arith.constant 0 : index
    %321 = vector.load %arg13[%c0_106, %c0_107, %c0_108] : memref<8x4x128xf32, #tpu.memory_space<vmem>>, vector<8x1x128xf32>
    %322 = vector.shape_cast %321 : vector<8x1x128xf32> to vector<8x128xf32>
    %c0_109 = arith.constant 0 : index
    %c0_110 = arith.constant 0 : index
    %c0_111 = arith.constant 0 : index
    %323 = vector.load %arg14[%c0_109, %c0_110, %c0_111] : memref<4x128x128xf32, #tpu.memory_space<vmem>>, vector<1x128x128xf32>
    %324 = vector.shape_cast %323 : vector<1x128x128xf32> to vector<128x128xf32>
    %cst_112 = arith.constant dense<0.000000e+00> : vector<8x128xf32>
    %325 = tpu.matmul %322, %324, %cst_112 {dimension_numbers = #tpu.dot_dimension_numbers<[1], [1], [0], [0], [0, 0, 1, 0], [], []>} : vector<8x128xf32>, vector<128x128xf32>, vector<8x128xf32> -> vector<8x128xf32>
    %c4_i32_113 = arith.constant 4 : i32
    %326 = vector.broadcast %c4_i32_113 : i32 to vector<8x128xi32>
    %327 = arith.cmpi slt, %320, %326 : vector<8x128xi32>
    %cst_114 = arith.constant -1.000000e+30 : f32
    %328 = vector.broadcast %cst_114 : f32 to vector<8x128xf32>
    %329 = arith.select %327, %325, %328 : vector<8x128xi1>, vector<8x128xf32>
    %cst_115 = arith.constant dense<0xFF800000> : vector<8xf32>
    %330 = vector.multi_reduction <maximumf>, %329, %cst_115 [1] : vector<8x128xf32> to vector<8xf32>
    %331 = vector.shape_cast %330 : vector<8xf32> to vector<8x1xf32>
    %332 = vector.broadcast %331 : vector<8x1xf32> to vector<8x128xf32>
    %333 = arith.subf %329, %332 : vector<8x128xf32>
    %334 = math.exp %333 : vector<8x128xf32>
    %cst_116 = arith.constant dense<0.000000e+00> : vector<8xf32>
    %335 = vector.multi_reduction <add>, %334, %cst_116 [1] : vector<8x128xf32> to vector<8xf32>
    %336 = vector.shape_cast %335 : vector<8xf32> to vector<8x1xf32>
    %337 = math.log %336 : vector<8x1xf32>
    %338 = arith.addf %337, %331 : vector<8x1xf32>
    %339 = vector.broadcast %338 : vector<8x1xf32> to vector<8x128xf32>
    %340 = arith.subf %329, %339 : vector<8x128xf32>
    %c0_117 = arith.constant 0 : index
    %c0_118 = arith.constant 0 : index
    %c0_119 = arith.constant 0 : index
    %341 = vector.load %arg11[%c0_117, %c0_118, %c0_119] : memref<4x8x128xf32, #tpu.memory_space<vmem>>, vector<1x8x128xf32>
    %342 = vector.shape_cast %341 : vector<1x8x128xf32> to vector<8x128xf32>
    %343 = vector.shape_cast %340 : vector<8x128xf32> to vector<1x8x128xf32>
    tpu.vector_store %arg11[%c0_117, %c0_118, %c0_119], %343 {strides = array<i32>} : memref<4x8x128xf32, #tpu.memory_space<vmem>>, vector<1x8x128xf32>,
    %c0_120 = arith.constant 0 : index
    %c1 = arith.constant 1 : index
    %c0_121 = arith.constant 0 : index
    %344 = vector.load %arg13[%c0_120, %c1, %c0_121] : memref<8x4x128xf32, #tpu.memory_space<vmem>>, vector<8x1x128xf32>
    %345 = vector.shape_cast %344 : vector<8x1x128xf32> to vector<8x128xf32>
    %c1_122 = arith.constant 1 : index
    %c0_123 = arith.constant 0 : index
    %c0_124 = arith.constant 0 : index
    %346 = vector.load %arg14[%c1_122, %c0_123, %c0_124] : memref<4x128x128xf32, #tpu.memory_space<vmem>>, vector<1x128x128xf32>
    %347 = vector.shape_cast %346 : vector<1x128x128xf32> to vector<128x128xf32>
    %cst_125 = arith.constant dense<0.000000e+00> : vector<8x128xf32>
    %348 = tpu.matmul %345, %347, %cst_125 {dimension_numbers = #tpu.dot_dimension_numbers<[1], [1], [0], [0], [0, 0, 1, 0], [], []>} : vector<8x128xf32>, vector<128x128xf32>, vector<8x128xf32> -> vector<8x128xf32>
    %c4_i32_126 = arith.constant 4 : i32
    %349 = vector.broadcast %c4_i32_126 : i32 to vector<8x128xi32>
    %350 = arith.cmpi slt, %320, %349 : vector<8x128xi32>
    %cst_127 = arith.constant -1.000000e+30 : f32
    %351 = vector.broadcast %cst_127 : f32 to vector<8x128xf32>
    %352 = arith.select %350, %348, %351 : vector<8x128xi1>, vector<8x128xf32>
    %cst_128 = arith.constant dense<0xFF800000> : vector<8xf32>
    %353 = vector.multi_reduction <maximumf>, %352, %cst_128 [1] : vector<8x128xf32> to vector<8xf32>
    %354 = vector.shape_cast %353 : vector<8xf32> to vector<8x1xf32>
    %355 = vector.broadcast %354 : vector<8x1xf32> to vector<8x128xf32>
    %356 = arith.subf %352, %355 : vector<8x128xf32>
    %357 = math.exp %356 : vector<8x128xf32>
    %cst_129 = arith.constant dense<0.000000e+00> : vector<8xf32>
    %358 = vector.multi_reduction <add>, %357, %cst_129 [1] : vector<8x128xf32> to vector<8xf32>
    %359 = vector.shape_cast %358 : vector<8xf32> to vector<8x1xf32>
    %360 = math.log %359 : vector<8x1xf32>
    %361 = arith.addf %360, %354 : vector<8x1xf32>
    %362 = vector.broadcast %361 : vector<8x1xf32> to vector<8x128xf32>
    %363 = arith.subf %352, %362 : vector<8x128xf32>
    %c1_130 = arith.constant 1 : index
    %c0_131 = arith.constant 0 : index
    %c0_132 = arith.constant 0 : index
    %364 = vector.load %arg11[%c1_130, %c0_131, %c0_132] : memref<4x8x128xf32, #tpu.memory_space<vmem>>, vector<1x8x128xf32>
    %365 = vector.shape_cast %364 : vector<1x8x128xf32> to vector<8x128xf32>
    %366 = vector.shape_cast %363 : vector<8x128xf32> to vector<1x8x128xf32>
    tpu.vector_store %arg11[%c1_130, %c0_131, %c0_132], %366 {strides = array<i32>} : memref<4x8x128xf32, #tpu.memory_space<vmem>>, vector<1x8x128xf32>,
    %c0_133 = arith.constant 0 : index
    %c2 = arith.constant 2 : index
    %c0_134 = arith.constant 0 : index
    %367 = vector.load %arg13[%c0_133, %c2, %c0_134] : memref<8x4x128xf32, #tpu.memory_space<vmem>>, vector<8x1x128xf32>
    %368 = vector.shape_cast %367 : vector<8x1x128xf32> to vector<8x128xf32>
    %c2_135 = arith.constant 2 : index
    %c0_136 = arith.constant 0 : index
    %c0_137 = arith.constant 0 : index
    %369 = vector.load %arg14[%c2_135, %c0_136, %c0_137] : memref<4x128x128xf32, #tpu.memory_space<vmem>>, vector<1x128x128xf32>
    %370 = vector.shape_cast %369 : vector<1x128x128xf32> to vector<128x128xf32>
    %cst_138 = arith.constant dense<0.000000e+00> : vector<8x128xf32>
    %371 = tpu.matmul %368, %370, %cst_138 {dimension_numbers = #tpu.dot_dimension_numbers<[1], [1], [0], [0], [0, 0, 1, 0], [], []>} : vector<8x128xf32>, vector<128x128xf32>, vector<8x128xf32> -> vector<8x128xf32>
    %c4_i32_139 = arith.constant 4 : i32
    %372 = vector.broadcast %c4_i32_139 : i32 to vector<8x128xi32>
    %373 = arith.cmpi slt, %320, %372 : vector<8x128xi32>
    %cst_140 = arith.constant -1.000000e+30 : f32
    %374 = vector.broadcast %cst_140 : f32 to vector<8x128xf32>
    %375 = arith.select %373, %371, %374 : vector<8x128xi1>, vector<8x128xf32>
    %cst_141 = arith.constant dense<0xFF800000> : vector<8xf32>
    %376 = vector.multi_reduction <maximumf>, %375, %cst_141 [1] : vector<8x128xf32> to vector<8xf32>
    %377 = vector.shape_cast %376 : vector<8xf32> to vector<8x1xf32>
    %378 = vector.broadcast %377 : vector<8x1xf32> to vector<8x128xf32>
    %379 = arith.subf %375, %378 : vector<8x128xf32>
    %380 = math.exp %379 : vector<8x128xf32>
    %cst_142 = arith.constant dense<0.000000e+00> : vector<8xf32>
    %381 = vector.multi_reduction <add>, %380, %cst_142 [1] : vector<8x128xf32> to vector<8xf32>
    %382 = vector.shape_cast %381 : vector<8xf32> to vector<8x1xf32>
    %383 = math.log %382 : vector<8x1xf32>
    %384 = arith.addf %383, %377 : vector<8x1xf32>
    %385 = vector.broadcast %384 : vector<8x1xf32> to vector<8x128xf32>
    %386 = arith.subf %375, %385 : vector<8x128xf32>
    %c2_143 = arith.constant 2 : index
    %c0_144 = arith.constant 0 : index
    %c0_145 = arith.constant 0 : index
    %387 = vector.load %arg11[%c2_143, %c0_144, %c0_145] : memref<4x8x128xf32, #tpu.memory_space<vmem>>, vector<1x8x128xf32>
    %388 = vector.shape_cast %387 : vector<1x8x128xf32> to vector<8x128xf32>
    %389 = vector.shape_cast %386 : vector<8x128xf32> to vector<1x8x128xf32>
    tpu.vector_store %arg11[%c2_143, %c0_144, %c0_145], %389 {strides = array<i32>} : memref<4x8x128xf32, #tpu.memory_space<vmem>>, vector<1x8x128xf32>,
    %c0_146 = arith.constant 0 : index
    %c3 = arith.constant 3 : index
    %c0_147 = arith.constant 0 : index
    %390 = vector.load %arg13[%c0_146, %c3, %c0_147] : memref<8x4x128xf32, #tpu.memory_space<vmem>>, vector<8x1x128xf32>
    %391 = vector.shape_cast %390 : vector<8x1x128xf32> to vector<8x128xf32>
    %c3_148 = arith.constant 3 : index
    %c0_149 = arith.constant 0 : index
    %c0_150 = arith.constant 0 : index
    %392 = vector.load %arg14[%c3_148, %c0_149, %c0_150] : memref<4x128x128xf32, #tpu.memory_space<vmem>>, vector<1x128x128xf32>
    %393 = vector.shape_cast %392 : vector<1x128x128xf32> to vector<128x128xf32>
    %cst_151 = arith.constant dense<0.000000e+00> : vector<8x128xf32>
    %394 = tpu.matmul %391, %393, %cst_151 {dimension_numbers = #tpu.dot_dimension_numbers<[1], [1], [0], [0], [0, 0, 1, 0], [], []>} : vector<8x128xf32>, vector<128x128xf32>, vector<8x128xf32> -> vector<8x128xf32>
    %c4_i32_152 = arith.constant 4 : i32
    %395 = vector.broadcast %c4_i32_152 : i32 to vector<8x128xi32>
    %396 = arith.cmpi slt, %320, %395 : vector<8x128xi32>
    %cst_153 = arith.constant -1.000000e+30 : f32
    %397 = vector.broadcast %cst_153 : f32 to vector<8x128xf32>
    %398 = arith.select %396, %394, %397 : vector<8x128xi1>, vector<8x128xf32>
    %cst_154 = arith.constant dense<0xFF800000> : vector<8xf32>
    %399 = vector.multi_reduction <maximumf>, %398, %cst_154 [1] : vector<8x128xf32> to vector<8xf32>
    %400 = vector.shape_cast %399 : vector<8xf32> to vector<8x1xf32>
    %401 = vector.broadcast %400 : vector<8x1xf32> to vector<8x128xf32>
    %402 = arith.subf %398, %401 : vector<8x128xf32>
    %403 = math.exp %402 : vector<8x128xf32>
    %cst_155 = arith.constant dense<0.000000e+00> : vector<8xf32>
    %404 = vector.multi_reduction <add>, %403, %cst_155 [1] : vector<8x128xf32> to vector<8xf32>
    %405 = vector.shape_cast %404 : vector<8xf32> to vector<8x1xf32>
    %406 = math.log %405 : vector<8x1xf32>
    %407 = arith.addf %406, %400 : vector<8x1xf32>
    %408 = vector.broadcast %407 : vector<8x1xf32> to vector<8x128xf32>
    %409 = arith.subf %398, %408 : vector<8x128xf32>
    %c3_156 = arith.constant 3 : index
    %c0_157 = arith.constant 0 : index
    %c0_158 = arith.constant 0 : index
    %410 = vector.load %arg11[%c3_156, %c0_157, %c0_158] : memref<4x8x128xf32, #tpu.memory_space<vmem>>, vector<1x8x128xf32>
    %411 = vector.shape_cast %410 : vector<1x8x128xf32> to vector<8x128xf32>
    %412 = vector.shape_cast %409 : vector<8x128xf32> to vector<1x8x128xf32>
    tpu.vector_store %arg11[%c3_156, %c0_157, %c0_158], %412 {strides = array<i32>} : memref<4x8x128xf32, #tpu.memory_space<vmem>>, vector<1x8x128xf32>,
    return
  }
  func.func @transform_0(%arg0: i32) -> (i32, i32) {
    %c0_i32 = arith.constant 0 : i32
    %c0_i32_0 = arith.constant 0 : i32
    %c0_i32_1 = arith.constant 0 : i32
    return %c0_i32, %c0_i32_0 : i32, i32
  }
  func.func @transform_1(%arg0: i32) -> (i32, i32) {
    %c0_i32 = arith.constant 0 : i32
    %c0_i32_0 = arith.constant 0 : i32
    %c0_i32_1 = arith.constant 0 : i32
    return %c0_i32, %c0_i32_0 : i32, i32
  }
  func.func @transform_2(%arg0: i32) -> (i32, i32) {
    %c0_i32 = arith.constant 0 : i32
    %c0_i32_0 = arith.constant 0 : i32
    %c0_i32_1 = arith.constant 0 : i32
    return %c0_i32, %c0_i32_0 : i32, i32
  }
  func.func @transform_3(%arg0: i32) -> (i32, i32) {
    %c0_i32 = arith.constant 0 : i32
    %c0_i32_0 = arith.constant 0 : i32
    %c0_i32_1 = arith.constant 0 : i32
    return %c0_i32, %c0_i32_0 : i32, i32
  }
  func.func @transform_4(%arg0: i32) -> (i32, i32) {
    %c0_i32 = arith.constant 0 : i32
    %c0_i32_0 = arith.constant 0 : i32
    %c0_i32_1 = arith.constant 0 : i32
    return %c0_i32, %c0_i32_0 : i32, i32
  }
  func.func @transform_5(%arg0: i32) -> (i32, i32) {
    %c0_i32 = arith.constant 0 : i32
    %c0_i32_0 = arith.constant 0 : i32
    %c0_i32_1 = arith.constant 0 : i32
    return %c0_i32, %c0_i32_0 : i32, i32
  }
  func.func @transform_6(%arg0: i32) -> (i32, i32) {
    %c0_i32 = arith.constant 0 : i32
    %c0_i32_0 = arith.constant 0 : i32
    %c0_i32_1 = arith.constant 0 : i32
    return %c0_i32, %c0_i32_0 : i32, i32
  }
  func.func @transform_7(%arg0: i32) -> (i32, i32) {
    %c0_i32 = arith.constant 0 : i32
    %c0_i32_0 = arith.constant 0 : i32
    %c0_i32_1 = arith.constant 0 : i32
    return %c0_i32, %c0_i32_0 : i32, i32
  }
  func.func @transform_8(%arg0: i32) -> (i32, i32) {
    %c0_i32 = arith.constant 0 : i32
    %c0_i32_0 = arith.constant 0 : i32
    %c0_i32_1 = arith.constant 0 : i32
    return %c0_i32, %c0_i32_0 : i32, i32
  }
  func.func @transform_9(%arg0: i32) -> (i32, i32) {
    %c0_i32 = arith.constant 0 : i32
    %c0_i32_0 = arith.constant 0 : i32
    %c0_i32_1 = arith.constant 0 : i32
    return %c0_i32, %c0_i32_0 : i32, i32
  }
  func.func @transform_10(%arg0: i32) -> (i32, i32, i32) {
    %c0_i32 = arith.constant 0 : i32
    %c0_i32_0 = arith.constant 0 : i32
    %c0_i32_1 = arith.constant 0 : i32
    %c0_i32_2 = arith.constant 0 : i32
    return %c0_i32, %c0_i32_0, %c0_i32_1 : i32, i32, i32
  }
}

</mosaic_0001>

<bundles_post_ra>
// kernel: tpu_custom_call.1
= control target key start
LH: loop header
LB: loop body
LE: loop exit
PB: predicated region body
PF: predicated region fallthrough
CT: control target
= control target key end

     0   :  { %vm109_vm0 = vcmask 130048   ;;  %vm841_vm1 = vcmask 1041408   ;;  %vm828_vm2 = vcmask 80896   ;;  %s6782_s0 = inlined_call_operand.vmem [shape: f32[32,10], index: 0, kind: input, shape index: {}]   ;;  %s6783_s1 = inlined_call_operand.vmem [shape: f32[512,16], index: 1, kind: input, shape index: {}]   ;;  %s6784_s2 = inlined_call_operand.vmem [shape: f32[16,128], index: 2, kind: input, shape index: {}]   ;;  %s6785_s3 = inlined_call_operand.vmem [shape: f32[1,128], index: 3, kind: input, shape index: {}]   ;;  %s6786_s4 = inlined_call_operand.vmem [shape: f32[10,16], index: 4, kind: input, shape index: {}]   ;;  %s6787_s5 = inlined_call_operand.vmem [shape: f32[1,16], index: 5, kind: input, shape index: {}]   ;;  %s6788_s6 = inlined_call_operand.vmem [shape: f32[16,384], index: 6, kind: input, shape index: {}]   ;;  %s6789_s7 = inlined_call_operand.vmem [shape: f32[1,384], index: 7, kind: input, shape index: {}]   ;;  %s6790_s8 = inlined_call_operand.vmem [shape: f32[128,384], index: 8, kind: input, shape index: {}]   ;;  %s6791_s9 = inlined_call_operand.vmem [shape: f32[1,128], index: 9, kind: input, shape index: {}]   ;;  %s6792_s10 = inlined_call_operand.hbm [shape: f32[4,8,128], index: 10, kind: output, shape index: {}]  }
   0x1   :  { %v101_v0 = vld [vmem:[%s6784_s2 + $0x8] sm:$0xff]  ;;  %v100_v1 = vld [vmem:[%s6784_s2] sm:$0xff]  ;;  %v98_v2 = vld [vmem:[%s6783_s1 + $0x1f0] sm:$0xff] }
   0x2   :  { %4418 = vmatprep.subr.mxu1 %v101_v0  ;;  %3975 = vmatprep.mubr.msk.f32.mxu1 %vm109_vm0, %v98_v2  ;;  %v99_v3 = vld [vmem:[%s6783_s1 + $0x1f8] sm:$0xff]  ;;  %v820_v4 = vld [vmem:[%s6786_s4 + $0x8] sm:$0x3]  ;;  %v815_v5 = vld [vmem:[%s6782_s0] sm:$0xff] }
   0x3   :  { %4420 = vmatpush3.msra.mxu1 %v101_v0  ;;  %3878 = vmatprep.subr.mxu0 %v101_v0 }
   0x4   :  { %4419 = vmatprep.subr.mxu1 %v100_v1  ;;  %3879 = vmatpush3.msra.mxu0 %v101_v0 }
   0x5   :  { %15 = vsyncpa [#allocation6], 0  ;;  %4421 = vmatpush3.msra.mxu1 %v100_v1  ;;  %v819_v6 = vld [vmem:[%s6786_s4] sm:$0xff]  ;;  %3880 = vmatprep.subr.mxu0 %v100_v1  ;;  %v816_v7 = vld [vmem:[%s6782_s0 + $0x8] sm:$0xff]  ;;  %v6794_v14 = vmov 0.0   ;;  %vm4675_vm3 = vmmov 0  }
   0x6   :  { %3976 = vmatmul.mubr.msk.f32.vlgmr.msra.gmra.mxu1 %vm109_vm0, %v99_v3  ;;  %3978 = vmatprep.subr.msk.mxu1 %vm841_vm1, %v820_v4  ;;  %v817_v8 = vld [vmem:[%s6782_s0 + $0x10] sm:$0xff]  ;;  %v818_v9 = vld [vmem:[%s6782_s0 + $0x18] sm:$0xff]  ;;  %v934_v10 = vld [vmem:[%s6788_s6 + $0x20] sm:$0xff]  ;;  %vm2983_vm4 = vcmask 1041409   ;;  %vm2986_vm5 = vcmask 1042434   ;;  %vm2989_vm6 = vcmask 1043459  }
   0x7   :  { %3979 = vmatpush3.msk.msra.mxu1 %vm841_vm1, %v820_v4  ;;  %3982 = vmatprep.mubr.msk.f32.mxu1 %vm828_vm2, %v815_v5  ;;  %v933_v11 = vld [vmem:[%s6788_s6 + $0x18] sm:$0xff]  ;;  %v931_v12 = vld [vmem:[%s6788_s6 + $0x8] sm:$0xff]  ;;  %v930_v13 = vld [vmem:[%s6788_s6] sm:$0xff]  ;;  %vm2992_vm7 = vcmask 1044484   ;;  %vm2995_vm8 = vcmask 1045509   ;;  %vm2998_vm9 = vcmask 1046534  }
   0x8   :  { %3980 = vmatprep.subr.mxu1 %v819_v6  ;;  %3881 = vmatpush3.msra.mxu0 %v100_v1  ;;  %v4786_v15 = vld [vmem:[%s6788_s6 + $0x28] sm:$0xff]  ;;  %v36_v16 = vld [vmem:[%s6783_s1] sm:$0xff]  ;;  %v38_v18 = vld [vmem:[%s6783_s1 + $0x10] sm:$0xff]  ;;  %vm3001_vm10 = vcmask 1047559  }
   0x9   :  { %3981 = vmatpush3.msra.mxu1 %v819_v6  ;;  %4033 = vmatprep.subr.mxu0 %v6794_v14  ;;  %v37_v17 = vld [vmem:[%s6783_s1 + $0x8] sm:$0xff]  ;;  %v4803_v19 = vld [vmem:[%s6790_s8 + $0x178] sm:$0xff]  ;;  %v4814_v21 = vld [vmem:[%s6790_s8 + $0x160] sm:$0xff] }
   0xa   :  { %3983 = vmatmul.mubr.msk.f32.vlgmr.msra.gmra.mxu1 %vm828_vm2, %v816_v7  ;;  %993 = vmatprep.subr.mxu1 %v934_v10  ;;  %v39_v20 = vld [vmem:[%s6783_s1 + $0x18] sm:$0xff]  ;;  %v40_v22 = vld [vmem:[%s6783_s1 + $0x20] sm:$0xff]  ;;  %v4824_v23 = vld [vmem:[%s6790_s8 + $0x148] sm:$0xff] }
   0xb   :  { %3985 = vmatprep.mubr.msk.f32.mxu1 %vm828_vm2, %v817_v8  ;;  %994 = vmatpush1.msra.mxu1 %v933_v11  ;;  %v41_v24 = vld [vmem:[%s6783_s1 + $0x28] sm:$0xff]  ;;  %v4836_v25 = vld [vmem:[%s6790_s8 + $0x130] sm:$0xff]  ;;  %v4846_v27 = vld [vmem:[%s6790_s8 + $0x118] sm:$0xff] }
   0xc   :  { %995 = vmatprep.subr.mxu1 %v931_v12  ;;  %3882 = vmatprep.mubr.msk.f32.mxu0 %vm109_vm0, %v36_v16  ;;  %v42_v26 = vld [vmem:[%s6783_s1 + $0x30] sm:$0xff]  ;;  %v43_v28 = vld [vmem:[%s6783_s1 + $0x38] sm:$0xff]  ;;  %v4858_v29 = vld [vmem:[%s6790_s8 + $0x100] sm:$0xff] }
   0xd   :  { %996 = vmatpush1.msra.mxu1 %v930_v13  ;;  %3883 = vmatmul.mubr.msk.f32.vlgmr.msra.gmra.mxu0 %vm109_vm0, %v37_v17  ;;  %v44_v30 = vld [vmem:[%s6783_s1 + $0x40] sm:$0xff]  ;;  %v4868_v31 = vld [vmem:[%s6790_s8 + $0xe8] sm:$0xff]  ;;  %v4880_v33 = vld [vmem:[%s6790_s8 + $0xd0] sm:$0xff] }
   0xe   :  { %3986 = vmatmul.mubr.msk.f32.gmra.mxu1 %vm828_vm2, %v818_v9  ;;  %3988 = vmatprep.subr.mxu1 %v4786_v15  ;;  %v45_v32 = vld [vmem:[%s6783_s1 + $0x48] sm:$0xff]  ;;  %v46_v34 = vld [vmem:[%s6783_s1 + $0x50] sm:$0xff]  ;;  %v4890_v35 = vld [vmem:[%s6790_s8 + $0xb8] sm:$0xff] }
   0xf   :  { %1029 = vmatprep.mubr.f32.mxu1 %v6794_v14  ;;  %3885 = vmatprep.mubr.msk.f32.mxu0 %vm109_vm0, %v38_v18  ;;  %v47_v36 = vld [vmem:[%s6783_s1 + $0x58] sm:$0xff]  ;;  %v4902_v37 = vld [vmem:[%s6790_s8 + $0xa0] sm:$0xff]  ;;  %v4909_v38 = vld [vmem:[%s6790_s8 + $0x88] sm:$0xff] }
  0x10   :  { %4034 = vmatpush3.msra.mxu0 %v4803_v19  ;;  %v4917_v39 = vld [vmem:[%s6790_s8 + $0x70] sm:$0xff]  ;;  %v4924_v40 = vld [vmem:[%s6790_s8 + $0x58] sm:$0xff]  ;;  %v4931_v41 = vld [vmem:[%s6790_s8 + $0x40] sm:$0xff] }
  0x11   :  { %4035 = vmatprep.subr.mxu0 %v6794_v14  ;;  %3886 = vmatmul.mubr.msk.f32.gmra.mxu0 %vm109_vm0, %v39_v20  ;;  %v4938_v42 = vld [vmem:[%s6790_s8 + $0x28] sm:$0xff]  ;;  %v4945_v43 = vld [vmem:[%s6790_s8 + $0x10] sm:$0xff]  ;;  %v3565_v47 = vld [vmem:[%s6787_s5] ss:$0 sm:$0xff] }
  0x12   :  { %4036 = vmatpush3.msra.mxu0 %v4814_v21  ;;  %3888 = vmatprep.mubr.msk.f32.mxu0 %vm109_vm0, %v40_v22  ;;  %v932_v51 = vld [vmem:[%s6788_s6 + $0x10] sm:$0xff]  ;;  %v4978_v57 = vld [vmem:[%s6790_s8 + $0x168] sm:$0xff]  ;;  %v4983_v58 = vld [vmem:[%s6790_s8 + $0x158] sm:$0xff] }
  0x13   :  { %4037 = vmatprep.subr.mxu0 %v6794_v14  ;;  %v4966_v52 = vld [vmem:[%s6790_s8 + $0x170] sm:$0xff]  ;;  %v4996_v60 = vld [vmem:[%s6790_s8 + $0x140] sm:$0xff]  ;;  %v5002_v61 = vld [vmem:[%s6790_s8 + $0x138] sm:$0xff] }
  0x14   :  { %4038 = vmatpush3.msra.mxu0 %v4824_v23  ;;  %v4989_v59 = vld [vmem:[%s6790_s8 + $0x150] sm:$0xff]  ;;  %v5008_v62 = vld [vmem:[%s6790_s8 + $0x128] sm:$0xff]  ;;  %v5015_v63 = vld [vmem:[%s6790_s8 + $0x120] sm:$0xff] }
  0x15   :  { %4039 = vmatprep.subr.mxu0 %v6794_v14  ;;  %3889 = vmatmul.mubr.msk.f32.gmra.mxu0 %vm109_vm0, %v41_v24  ;;  %v5021_v0 = vld [vmem:[%s6790_s8 + $0x110] sm:$0xff]  ;;  %v5028_v1 = vld [vmem:[%s6790_s8 + $0x108] sm:$0xff]  ;;  %v5034_v2 = vld [vmem:[%s6790_s8 + $0xf8] sm:$0xff] }
  0x16   :  { %4040 = vmatpush3.msra.mxu0 %v4836_v25  ;;  %3891 = vmatprep.mubr.msk.f32.mxu0 %vm109_vm0, %v42_v26  ;;  %v5040_v3 = vld [vmem:[%s6790_s8 + $0xf0] sm:$0xff]  ;;  %v5046_v4 = vld [vmem:[%s6790_s8 + $0xe0] sm:$0xff]  ;;  %v5052_v5 = vld [vmem:[%s6790_s8 + $0xd8] sm:$0xff] }
  0x17   :  { %4041 = vmatprep.subr.mxu0 %v6794_v14  ;;  %v5058_v6 = vld [vmem:[%s6790_s8 + $0xc8] sm:$0xff]  ;;  %v5064_v7 = vld [vmem:[%s6790_s8 + $0xc0] sm:$0xff]  ;;  %v5070_v8 = vld [vmem:[%s6790_s8 + $0xb0] sm:$0xff] }
  0x18   :  { %4042 = vmatpush3.msra.mxu0 %v4846_v27  ;;  %v5076_v9 = vld [vmem:[%s6790_s8 + $0xa8] sm:$0xff]  ;;  %v5082_v10 = vld [vmem:[%s6790_s8 + $0x98] sm:$0xff]  ;;  %v5088_v11 = vld [vmem:[%s6790_s8 + $0x90] sm:$0xff] }
  0x19   :  { %4043 = vmatprep.subr.mxu0 %v6794_v14  ;;  %3892 = vmatmul.mubr.msk.f32.gmra.mxu0 %vm109_vm0, %v43_v28  ;;  %v5094_v12 = vld [vmem:[%s6790_s8 + $0x80] sm:$0xff]  ;;  %v5100_v13 = vld [vmem:[%s6790_s8 + $0x78] sm:$0xff]  ;;  %v5118_v17 = vld [vmem:[%s6790_s8 + $0x50] sm:$0xff] }
  0x1a   :  { %4044 = vmatpush3.msra.mxu0 %v4858_v29  ;;  %3894 = vmatprep.mubr.msk.f32.mxu0 %vm109_vm0, %v44_v30  ;;  %v5112_v16 = vld [vmem:[%s6790_s8 + $0x60] sm:$0xff]  ;;  %v5124_v18 = vld [vmem:[%s6790_s8 + $0x48] sm:$0xff]  ;;  %v5130_v20 = vld [vmem:[%s6790_s8 + $0x38] sm:$0xff] }
  0x1b   :  { %4045 = vmatprep.subr.mxu0 %v6794_v14  ;;  %v5136_v22 = vld [vmem:[%s6790_s8 + $0x30] sm:$0xff]  ;;  %v5142_v24 = vld [vmem:[%s6790_s8 + $0x20] sm:$0xff]  ;;  %v5148_v26 = vld [vmem:[%s6790_s8 + $0x18] sm:$0xff] }
  0x1c   :  { %4046 = vmatpush3.msra.mxu0 %v4868_v31  ;;  %v5154_v28 = vld [vmem:[%s6790_s8 + $0x8] sm:$0xff]  ;;  %v5160_v30 = vld [vmem:[%s6790_s8] sm:$0xff] }
  0x1d   :  { %4047 = vmatprep.subr.mxu0 %v6794_v14  ;;  %3895 = vmatmul.mubr.msk.f32.gmra.mxu0 %vm109_vm0, %v45_v32  ;;  %v55_v32 = vld [vmem:[%s6783_s1 + $0x98] sm:$0xff] }
  0x1e   :  { %4048 = vmatpush3.msra.mxu0 %v4880_v33  ;;  %3897 = vmatprep.mubr.msk.f32.mxu0 %vm109_vm0, %v46_v34  ;;  %v57_v34 = vld [vmem:[%s6783_s1 + $0xa8] sm:$0xff] }
  0x1f   :  { %4049 = vmatprep.subr.mxu0 %v6794_v14 }
  0x20   :  { %4050 = vmatpush3.msra.mxu0 %v4890_v35 }
  0x21   :  { %4051 = vmatprep.subr.mxu0 %v6794_v14  ;;  %3898 = vmatmul.mubr.msk.f32.gmra.mxu0 %vm109_vm0, %v47_v36  ;;  %v59_v36 = vld [vmem:[%s6783_s1 + $0xb8] sm:$0xff] }
  0x22   :  { %4052 = vmatpush3.msra.mxu0 %v4902_v37 }
  0x23   :  { %4053 = vmatprep.subr.mxu0 %v6794_v14 }
  0x24   :  { %4054 = vmatpush3.msra.mxu0 %v4909_v38 }
  0x25   :  { %4055 = vmatprep.subr.mxu0 %v6794_v14 }
  0x26   :  { %4056 = vmatpush3.msra.mxu0 %v4917_v39 }
  0x27   :  { %4057 = vmatprep.subr.mxu0 %v6794_v14 }
  0x28   :  { %4058 = vmatpush3.msra.mxu0 %v4924_v40 }
  0x29   :  { %4059 = vmatprep.subr.mxu0 %v6794_v14 }
  0x2a   :  { %4060 = vmatpush3.msra.mxu0 %v4931_v41 }
  0x2b   :  { %4061 = vmatprep.subr.mxu0 %v6794_v14 }
  0x2c   :  { %4062 = vmatpush3.msra.mxu0 %v4938_v42 }
  0x2d   :  { %4063 = vmatprep.subr.mxu0 %v6794_v14 }
  0x2e   :  { %4064 = vmatpush3.msra.mxu0 %v4945_v43 }
  0x2f   :  { %4068 = vmatprep.subr.mxu0 %v6794_v14 }
  0xc6   :  { %v4950_v44 = vpop.f32.mrf.mxu1 }
  0xc7   :  { %6814 = vst [vmem:[#allocation8_spill] sm:$0xff] %v4950_v44  ;;  %v5702_v44 = vld [vmem:[%s6790_s8 + $0xb8] sm:$0xff] }
  0xc8   :  { %v4952_v45 = vpop.f32.mrf.mxu1 }
  0xc9   :  { %6815 = vst [vmem:[#allocation9_spill] sm:$0xff] %v4952_v45  ;;  %v5697_v45 = vld [vmem:[%s6790_s8 + $0xa8] sm:$0xff] }
  0xca   :  { %v3984_v46 = vpop.f32.mrf.mxu1 }
  0xcb   :  { %v917_v53 = vadd.f32 %v3984_v46, %v3565_v47  ;;  %v67_v46 = vld [vmem:[%s6783_s1 + $0xf8] sm:$0xff] }
  0xcc   :  { %v911_v48 = vpop.f32.mrf.mxu1 }
  0xcd   :  { %v912_v49 = vadd.f32 %v3565_v47, %v911_v48  ;;  %v69_v48 = vld [vmem:[%s6783_s1 + $0x108] sm:$0xff] }
  0xce   :  { %v3987_v50 = vpop.f32.mrf.mxu1 }
  0xcf   :  { %3571 = vmatmul.mubr.msk.f32.vlgmr.msra.gmra.mxu1 %vm109_vm0, %v912_v49  ;;  %v927_v56 = vadd.f32 %v3987_v50, %v3565_v47  ;;  %v71_v50 = vld [vmem:[%s6783_s1 + $0x118] sm:$0xff] }
  0xd0   :  { %3989 = vmatpush3.msra.mxu1 %v4786_v15  ;;  %1035 = vmatprep.mubr.f32.mxu1 %v6794_v14  ;;  %v921_v54 = vpop.f32.mrf.mxu1  ;;  %v5106_v15 = vld [vmem:[%s6790_s8 + $0x68] sm:$0xff] }
  0xd1   :  { %3990 = vmatprep.subr.mxu1 %v932_v51  ;;  %v922_v55 = vadd.f32 %v3565_v47, %v921_v54  ;;  %v68_v47 = vld [vmem:[%s6783_s1 + $0x100] sm:$0xff]  ;;  %v75_v54 = vld [vmem:[%s6783_s1 + $0x138] sm:$0xff] }
  0xd2   :  { %3991 = vmatpush3.msra.mxu1 %v932_v51  ;;  %v72_v51 = vld [vmem:[%s6783_s1 + $0x120] sm:$0xff] }
  0xd3   :  { %3572 = vmatmul.mubr.msk.f32.gmra.mxu1 %vm109_vm0, %v917_v53  ;;  %1242 = vmatprep.subr.mxu1 %v4966_v52 }
  0xd4   :  { %1041 = vmatprep.mubr.f32.mxu1 %v6794_v14 }
  0xd7   :  { %3573 = vmatmul.mubr.msk.f32.gmra.mxu1 %vm109_vm0, %v922_v55 }
  0xd8   :  { %1047 = vmatprep.mubr.f32.mxu1 %v6794_v14 }
  0xdb   :  { %3574 = vmatmul.mubr.msk.f32.gmra.mxu1 %vm109_vm0, %v927_v56 }
  0xdc   :  { %3992 = vmatprep.mubr.msk.f32.mxu1 %vm109_vm0, %v912_v49  ;;  %v70_v49 = vld [vmem:[%s6783_s1 + $0x110] sm:$0xff] }
  0xdf   :  { %3993 = vmatmul.mubr.msk.f32.vlgmr.msra.gmra.mxu1 %vm109_vm0, %v917_v53  ;;  %v74_v53 = vld [vmem:[%s6783_s1 + $0x130] sm:$0xff] }
  0xe0   :  { %1243 = vmatpush1.msra.mxu1 %v4978_v57  ;;  %3995 = vmatprep.mubr.msk.f32.mxu1 %vm109_vm0, %v922_v55  ;;  %v76_v55 = vld [vmem:[%s6783_s1 + $0x140] sm:$0xff] }
  0xe1   :  { %1244 = vmatprep.subr.mxu1 %v4983_v58 }
  0xe2   :  { %1245 = vmatpush1.msra.mxu1 %v4989_v59 }
  0xe3   :  { %1246 = vmatprep.subr.mxu1 %v4996_v60  ;;  %3996 = vmatmul.mubr.msk.f32.gmra.mxu1 %vm109_vm0, %v927_v56  ;;  %v77_v56 = vld [vmem:[%s6783_s1 + $0x148] sm:$0xff] }
  0xe4   :  { %1247 = vmatpush1.msra.mxu1 %v5002_v61  ;;  %1306 = vmatprep.mubr.f32.mxu1 %v6794_v14 }
  0xe5   :  { %1248 = vmatprep.subr.mxu1 %v5008_v62 }
  0xe6   :  { %1249 = vmatpush1.msra.mxu1 %v5015_v63 }
  0xe7   :  { %1250 = vmatprep.subr.mxu1 %v5021_v0 }
  0xe8   :  { %1251 = vmatpush1.msra.mxu1 %v5028_v1 }
  0xe9   :  { %1252 = vmatprep.subr.mxu1 %v5034_v2 }
  0xea   :  { %1253 = vmatpush1.msra.mxu1 %v5040_v3 }
  0xeb   :  { %1254 = vmatprep.subr.mxu1 %v5046_v4 }
  0xec   :  { %1255 = vmatpush1.msra.mxu1 %v5052_v5 }
  0xed   :  { %1256 = vmatprep.subr.mxu1 %v5058_v6 }
  0xee   :  { %1257 = vmatpush1.msra.mxu1 %v5064_v7 }
  0xef   :  { %1258 = vmatprep.subr.mxu1 %v5070_v8 }
  0xf0   :  { %1259 = vmatpush1.msra.mxu1 %v5076_v9 }
  0xf1   :  { %1260 = vmatprep.subr.mxu1 %v5082_v10 }
  0xf2   :  { %1261 = vmatpush1.msra.mxu1 %v5088_v11 }
  0xf3   :  { %1262 = vmatprep.subr.mxu1 %v5094_v12 }
  0xf4   :  { %1263 = vmatpush1.msra.mxu1 %v5100_v13 }
  0xf5   :  { %1264 = vmatprep.subr.mxu1 %v5106_v15 }
  0xf6   :  { %1265 = vmatpush1.msra.mxu1 %v5112_v16 }
  0xf7   :  { %1266 = vmatprep.subr.mxu1 %v5118_v17 }
  0xf8   :  { %1267 = vmatpush1.msra.mxu1 %v5124_v18 }
  0xf9   :  { %1268 = vmatprep.subr.mxu1 %v5130_v20 }
  0xfa   :  { %1269 = vmatpush1.msra.mxu1 %v5136_v22 }
  0xfb   :  { %1270 = vmatprep.subr.mxu1 %v5142_v24 }
  0xfc   :  { %1271 = vmatpush1.msra.mxu1 %v5148_v26 }
  0xfd   :  { %1272 = vmatprep.subr.mxu1 %v5154_v28 }
  0xfe   :  { %1273 = vmatpush1.msra.mxu1 %v5160_v30 }
  0xff   :  { %1307 = vmatmul.mubr.f32.vlgmr.msra.gmra.mxu1 %v6794_v14  ;;  %3998 = vmatprep.subr.mxu1 %v6794_v14 }
 0x100   :  { %3999 = vmatpush3.msra.mxu1 %v4803_v19  ;;  %4030 = vmatprep.mubr.msk.f32.mxu1 %vm4675_vm3, %v6794_v14  ;;  %v48_v19 = vld [vmem:[%s6783_s1 + $0x60] sm:$0xff] }
 0x101   :  { %4000 = vmatprep.subr.mxu1 %v6794_v14  ;;  %3900 = vmatprep.mubr.msk.f32.mxu0 %vm109_vm0, %v48_v19 }
 0x102   :  { %4001 = vmatpush3.msra.mxu1 %v4814_v21  ;;  %v49_v21 = vld [vmem:[%s6783_s1 + $0x68] sm:$0xff] }
 0x103   :  { %4002 = vmatprep.subr.mxu1 %v6794_v14  ;;  %3901 = vmatmul.mubr.msk.f32.gmra.mxu0 %vm109_vm0, %v49_v21 }
 0x104   :  { %4003 = vmatpush3.msra.mxu1 %v4824_v23  ;;  %v50_v23 = vld [vmem:[%s6783_s1 + $0x70] sm:$0xff] }
 0x105   :  { %4004 = vmatprep.subr.mxu1 %v6794_v14  ;;  %3903 = vmatprep.mubr.msk.f32.mxu0 %vm109_vm0, %v50_v23 }
 0x106   :  { %4005 = vmatpush3.msra.mxu1 %v4836_v25  ;;  %v51_v25 = vld [vmem:[%s6783_s1 + $0x78] sm:$0xff] }
 0x107   :  { %4006 = vmatprep.subr.mxu1 %v6794_v14  ;;  %3904 = vmatmul.mubr.msk.f32.gmra.mxu0 %vm109_vm0, %v51_v25 }
 0x108   :  { %4007 = vmatpush3.msra.mxu1 %v4846_v27  ;;  %v52_v27 = vld [vmem:[%s6783_s1 + $0x80] sm:$0xff] }
 0x109   :  { %4008 = vmatprep.subr.mxu1 %v6794_v14  ;;  %3906 = vmatprep.mubr.msk.f32.mxu0 %vm109_vm0, %v52_v27 }
 0x10a   :  { %4009 = vmatpush3.msra.mxu1 %v4858_v29  ;;  %v53_v29 = vld [vmem:[%s6783_s1 + $0x88] sm:$0xff] }
 0x10b   :  { %4010 = vmatprep.subr.mxu1 %v6794_v14  ;;  %3907 = vmatmul.mubr.msk.f32.gmra.mxu0 %vm109_vm0, %v53_v29 }
 0x10c   :  { %4011 = vmatpush3.msra.mxu1 %v4868_v31  ;;  %v54_v31 = vld [vmem:[%s6783_s1 + $0x90] sm:$0xff] }
 0x10d   :  { %4012 = vmatprep.subr.mxu1 %v6794_v14  ;;  %3909 = vmatprep.mubr.msk.f32.mxu0 %vm109_vm0, %v54_v31 }
 0x10e   :  { %4013 = vmatpush3.msra.mxu1 %v4880_v33  ;;  %v56_v33 = vld [vmem:[%s6783_s1 + $0xa0] sm:$0xff] }
 0x10f   :  { %4014 = vmatprep.subr.mxu1 %v6794_v14  ;;  %3910 = vmatmul.mubr.msk.f32.gmra.mxu0 %vm109_vm0, %v55_v32 }
 0x110   :  { %4015 = vmatpush3.msra.mxu1 %v4890_v35  ;;  %3912 = vmatprep.mubr.msk.f32.mxu0 %vm109_vm0, %v56_v33  ;;  %v58_v35 = vld [vmem:[%s6783_s1 + $0xb0] sm:$0xff] }
 0x111   :  { %4016 = vmatprep.subr.mxu1 %v6794_v14 }
 0x112   :  { %4017 = vmatpush3.msra.mxu1 %v4902_v37  ;;  %v60_v37 = vld [vmem:[%s6783_s1 + $0xc0] sm:$0xff] }
 0x113   :  { %4018 = vmatprep.subr.mxu1 %v6794_v14  ;;  %3913 = vmatmul.mubr.msk.f32.gmra.mxu0 %vm109_vm0, %v57_v34 }
 0x114   :  { %4019 = vmatpush3.msra.mxu1 %v4909_v38  ;;  %3915 = vmatprep.mubr.msk.f32.mxu0 %vm109_vm0, %v58_v35  ;;  %v61_v38 = vld [vmem:[%s6783_s1 + $0xc8] sm:$0xff] }
 0x115   :  { %4020 = vmatprep.subr.mxu1 %v6794_v14 }
 0x116   :  { %4021 = vmatpush3.msra.mxu1 %v4917_v39  ;;  %v62_v39 = vld [vmem:[%s6783_s1 + $0xd0] sm:$0xff] }
 0x117   :  { %4022 = vmatprep.subr.mxu1 %v6794_v14  ;;  %3916 = vmatmul.mubr.msk.f32.gmra.mxu0 %vm109_vm0, %v59_v36 }
 0x118   :  { %4023 = vmatpush3.msra.mxu1 %v4924_v40  ;;  %3918 = vmatprep.mubr.msk.f32.mxu0 %vm109_vm0, %v60_v37  ;;  %v63_v40 = vld [vmem:[%s6783_s1 + $0xd8] sm:$0xff] }
 0x119   :  { %4024 = vmatprep.subr.mxu1 %v6794_v14 }
 0x11a   :  { %4025 = vmatpush3.msra.mxu1 %v4931_v41  ;;  %v64_v41 = vld [vmem:[%s6783_s1 + $0xe0] sm:$0xff] }
 0x11b   :  { %4026 = vmatprep.subr.mxu1 %v6794_v14  ;;  %3919 = vmatmul.mubr.msk.f32.gmra.mxu0 %vm109_vm0, %v61_v38 }
 0x11c   :  { %4027 = vmatpush3.msra.mxu1 %v4938_v42  ;;  %3921 = vmatprep.mubr.msk.f32.mxu0 %vm109_vm0, %v62_v39  ;;  %v65_v42 = vld [vmem:[%s6783_s1 + $0xe8] sm:$0xff] }
 0x11d   :  { %4028 = vmatprep.subr.mxu1 %v6794_v14 }
 0x11e   :  { %4029 = vmatpush3.msra.mxu1 %v4945_v43  ;;  %v66_v43 = vld [vmem:[%s6783_s1 + $0xf0] sm:$0xff] }
 0x11f   :  { %4031 = vmatmul.mubr.f32.vlgmr.msra.gmra.mxu1 %v6794_v14  ;;  %1466 = vmatprep.subr.mxu1 %v4966_v52  ;;  %v73_v52 = vld [vmem:[%s6783_s1 + $0x128] sm:$0xff] }
 0x120   :  { %1467 = vmatpush1.msra.mxu1 %v4978_v57  ;;  %1530 = vmatprep.mubr.f32.mxu1 %v6794_v14  ;;  %v78_v57 = vld [vmem:[%s6783_s1 + $0x150] sm:$0xff] }
 0x121   :  { %1468 = vmatprep.subr.mxu1 %v4983_v58  ;;  %3922 = vmatmul.mubr.msk.f32.gmra.mxu0 %vm109_vm0, %v63_v40  ;;  %v79_v58 = vld [vmem:[%s6783_s1 + $0x158] sm:$0xff] }
 0x122   :  { %1469 = vmatpush1.msra.mxu1 %v4989_v59  ;;  %3924 = vmatprep.mubr.msk.f32.mxu0 %vm109_vm0, %v64_v41  ;;  %v80_v59 = vld [vmem:[%s6783_s1 + $0x160] sm:$0xff] }
 0x123   :  { %1470 = vmatprep.subr.mxu1 %v4996_v60  ;;  %v81_v60 = vld [vmem:[%s6783_s1 + $0x168] sm:$0xff] }
 0x124   :  { %1471 = vmatpush1.msra.mxu1 %v5002_v61  ;;  %v82_v61 = vld [vmem:[%s6783_s1 + $0x170] sm:$0xff] }
 0x125   :  { %1472 = vmatprep.subr.mxu1 %v5008_v62  ;;  %3925 = vmatmul.mubr.msk.f32.gmra.mxu0 %vm109_vm0, %v65_v42  ;;  %v83_v62 = vld [vmem:[%s6783_s1 + $0x178] sm:$0xff] }
 0x126   :  { %1473 = vmatpush1.msra.mxu1 %v5015_v63  ;;  %3927 = vmatprep.mubr.msk.f32.mxu0 %vm109_vm0, %v66_v43  ;;  %v84_v63 = vld [vmem:[%s6783_s1 + $0x180] sm:$0xff] }
 0x127   :  { %1474 = vmatprep.subr.mxu1 %v5021_v0  ;;  %v85_v0 = vld [vmem:[%s6783_s1 + $0x188] sm:$0xff] }
 0x128   :  { %1475 = vmatpush1.msra.mxu1 %v5028_v1  ;;  %v86_v1 = vld [vmem:[%s6783_s1 + $0x190] sm:$0xff] }
 0x129   :  { %1476 = vmatprep.subr.mxu1 %v5034_v2  ;;  %3928 = vmatmul.mubr.msk.f32.gmra.mxu0 %vm109_vm0, %v67_v46  ;;  %v87_v2 = vld [vmem:[%s6783_s1 + $0x198] sm:$0xff] }
 0x12a   :  { %1477 = vmatpush1.msra.mxu1 %v5040_v3  ;;  %3930 = vmatprep.mubr.msk.f32.mxu0 %vm109_vm0, %v68_v47  ;;  %v88_v3 = vld [vmem:[%s6783_s1 + $0x1a0] sm:$0xff] }
 0x12b   :  { %1478 = vmatprep.subr.mxu1 %v5046_v4  ;;  %v89_v4 = vld [vmem:[%s6783_s1 + $0x1a8] sm:$0xff] }
 0x12c   :  { %1479 = vmatpush1.msra.mxu1 %v5052_v5  ;;  %v90_v5 = vld [vmem:[%s6783_s1 + $0x1b0] sm:$0xff] }
 0x12d   :  { %1480 = vmatprep.subr.mxu1 %v5058_v6  ;;  %3931 = vmatmul.mubr.msk.f32.gmra.mxu0 %vm109_vm0, %v69_v48  ;;  %v91_v6 = vld [vmem:[%s6783_s1 + $0x1b8] sm:$0xff] }
 0x12e   :  { %1481 = vmatpush1.msra.mxu1 %v5064_v7  ;;  %3933 = vmatprep.mubr.msk.f32.mxu0 %vm109_vm0, %v70_v49  ;;  %v92_v7 = vld [vmem:[%s6783_s1 + $0x1c0] sm:$0xff] }
 0x12f   :  { %1482 = vmatprep.subr.mxu1 %v5070_v8  ;;  %v93_v8 = vld [vmem:[%s6783_s1 + $0x1c8] sm:$0xff] }
 0x130   :  { %1483 = vmatpush1.msra.mxu1 %v5076_v9  ;;  %v94_v9 = vld [vmem:[%s6783_s1 + $0x1d0] sm:$0xff] }
 0x131   :  { %1484 = vmatprep.subr.mxu1 %v5082_v10  ;;  %3934 = vmatmul.mubr.msk.f32.gmra.mxu0 %vm109_vm0, %v71_v50  ;;  %v95_v10 = vld [vmem:[%s6783_s1 + $0x1d8] sm:$0xff] }
 0x132   :  { %1485 = vmatpush1.msra.mxu1 %v5088_v11  ;;  %3936 = vmatprep.mubr.msk.f32.mxu0 %vm109_vm0, %v72_v51  ;;  %v96_v11 = vld [vmem:[%s6783_s1 + $0x1e0] sm:$0xff] }
 0x133   :  { %1486 = vmatprep.subr.mxu1 %v5094_v12  ;;  %v97_v12 = vld [vmem:[%s6783_s1 + $0x1e8] sm:$0xff] }
 0x134   :  { %1487 = vmatpush1.msra.mxu1 %v5100_v13  ;;  %v6793_v13 = vlaneseq }
 0x135   :  { %1488 = vmatprep.subr.mxu1 %v5106_v15  ;;  %3937 = vmatmul.mubr.msk.f32.gmra.mxu0 %vm109_vm0, %v73_v52 }
 0x136   :  { %1489 = vmatpush1.msra.mxu1 %v5112_v16  ;;  %3939 = vmatprep.mubr.msk.f32.mxu0 %vm109_vm0, %v74_v53  ;;  %v939_v15 = vshrl.u32 %v6793_v13, 7 }
 0x137   :  { %1490 = vmatprep.subr.mxu1 %v5118_v17 }
 0x138   :  { %1491 = vmatpush1.msra.mxu1 %v5124_v18  ;;  %v940_v16 = vsub.s32 0, %v939_v15  ;;  %v944_v17 = vsub.s32 1, %v939_v15  ;;  %v936_v18 = vld [vmem:[%s6789_s7] sm:$0x7]  ;;  %v948_v34 = vsub.s32 2, %v939_v15 }
 0x139   :  { %1492 = vmatprep.subr.mxu1 %v5130_v20  ;;  %3940 = vmatmul.mubr.msk.f32.gmra.mxu0 %vm109_vm0, %v75_v54 }
 0x13a   :  { %1493 = vmatpush1.msra.mxu1 %v5136_v22  ;;  %3942 = vmatprep.mubr.msk.f32.mxu0 %vm109_vm0, %v76_v55  ;;  %v941_v20 = vrot.slane %v936_v18, %v940_v16  ;;  %v945_v22 = vrot.slane %v936_v18, %v944_v17  ;;  %v949_v41 = vrot.slane %v936_v18, %v948_v34  ;;  %v5461_v17 = vld [vmem:[%s6791_s9] ss:$0 sm:$0xff] }
 0x13b   :  { %1494 = vmatprep.subr.mxu1 %v5142_v24 }
 0x13c   :  { %1495 = vmatpush1.msra.mxu1 %v5148_v26 }
 0x13d   :  { %1496 = vmatprep.subr.mxu1 %v5154_v28  ;;  %3943 = vmatmul.mubr.msk.f32.gmra.mxu0 %vm109_vm0, %v77_v56 }
 0x13e   :  { %1497 = vmatpush1.msra.mxu1 %v5160_v30  ;;  %3945 = vmatprep.mubr.msk.f32.mxu0 %vm109_vm0, %v78_v57 }
 0x141   :  { %3946 = vmatmul.mubr.msk.f32.gmra.mxu0 %vm109_vm0, %v79_v58 }
 0x142   :  { %3948 = vmatprep.mubr.msk.f32.mxu0 %vm109_vm0, %v80_v59 }
 0x145   :  { %3949 = vmatmul.mubr.msk.f32.gmra.mxu0 %vm109_vm0, %v81_v60 }
 0x146   :  { %3951 = vmatprep.mubr.msk.f32.mxu0 %vm109_vm0, %v82_v61 }
 0x149   :  { %3952 = vmatmul.mubr.msk.f32.gmra.mxu0 %vm109_vm0, %v83_v62 }
 0x14a   :  { %3954 = vmatprep.mubr.msk.f32.mxu0 %vm109_vm0, %v84_v63  ;;  %v5442_v63 = vpop.f32.mrf.mxu0 }
 0x14b   :  { %6816 = vst [vmem:[#allocation10_spill] sm:$0xff] %v5442_v63  ;;  %v5733_v63 = vld [vmem:[%s6790_s8 + $0x78] sm:$0xff] }
 0x14d   :  { %3955 = vmatmul.mubr.msk.f32.gmra.mxu0 %vm109_vm0, %v85_v0 }
 0x14e   :  { %3957 = vmatprep.mubr.msk.f32.mxu0 %vm109_vm0, %v86_v1 }
 0x151   :  { %3958 = vmatmul.mubr.msk.f32.gmra.mxu0 %vm109_vm0, %v87_v2 }
 0x152   :  { %3960 = vmatprep.mubr.msk.f32.mxu0 %vm109_vm0, %v88_v3  ;;  %v5444_v3 = vpop.f32.mrf.mxu0 }
 0x153   :  { %6817 = vst [vmem:[#allocation11_spill] sm:$0xff] %v5444_v3  ;;  %v5719_v3 = vld [vmem:[%s6790_s8 + $0xa0] sm:$0xff] }
 0x155   :  { %3961 = vmatmul.mubr.msk.f32.gmra.mxu0 %vm109_vm0, %v89_v4 }
 0x156   :  { %3963 = vmatprep.mubr.msk.f32.mxu0 %vm109_vm0, %v90_v5  ;;  %v5446_v5 = vpop.f32.mrf.mxu0 }
 0x157   :  { %6818 = vst [vmem:[#allocation12_spill] sm:$0xff] %v5446_v5  ;;  %v5754_v5 = vld [vmem:[%s6790_s8 + $0x60] sm:$0xff] }
 0x159   :  { %3964 = vmatmul.mubr.msk.f32.gmra.mxu0 %vm109_vm0, %v91_v6 }
 0x15a   :  { %3966 = vmatprep.mubr.msk.f32.mxu0 %vm109_vm0, %v92_v7  ;;  %v5448_v7 = vpop.f32.mrf.mxu0 }
 0x15b   :  { %6819 = vst [vmem:[#allocation13_spill] sm:$0xff] %v5448_v7 }
 0x15d   :  { %3967 = vmatmul.mubr.msk.f32.gmra.mxu0 %vm109_vm0, %v93_v8  ;;  %v5450_v8 = vpop.f32.mrf.mxu0 }
 0x15e   :  { %3969 = vmatprep.mubr.msk.f32.mxu0 %vm109_vm0, %v94_v9  ;;  %6820 = vst [vmem:[#allocation14_spill] sm:$0xff] %v5450_v8 }
 0x161   :  { %3970 = vmatmul.mubr.msk.f32.gmra.mxu0 %vm109_vm0, %v95_v10 }
 0x162   :  { %3972 = vmatprep.mubr.msk.f32.mxu0 %vm109_vm0, %v96_v11  ;;  %v5452_v11 = vpop.f32.mrf.mxu0 }
 0x163   :  { %6821 = vst [vmem:[#allocation15_spill] sm:$0xff] %v5452_v11  ;;  %v5773_v11 = vld [vmem:[%s6790_s8 + $0x48] sm:$0xff] }
 0x165   :  { %3973 = vmatmul.mubr.msk.f32.gmra.mxu0 %vm109_vm0, %v97_v12  ;;  %v5454_v12 = vpop.f32.mrf.mxu0 }
 0x166   :  { %4065 = vmatprep.mubr.msk.f32.mxu0 %vm4675_vm3, %v6794_v14  ;;  %6822 = vst [vmem:[#allocation16_spill] sm:$0xff] %v5454_v12  ;;  %v5813_v12 = vld [vmem:[%s6790_s8 + $0x18] sm:$0xff] }
 0x167   :  { %v5456_v16 = vpop.f32.mrf.mxu0  ;;  %6862 = vst [vmem:[#allocation55_spill] sm:$0xff] %v5813_v12 }
 0x168   :  { %6823 = vst [vmem:[#allocation17_spill] sm:$0xff] %v5456_v16  ;;  %v5794_v16 = vld [vmem:[%s6790_s8 + $0x30] sm:$0xff] }
 0x18f   :  { %v1031_v24 = vpop.f32.mrf.mxu1 }
 0x190   :  { %v1032_v28 = vadd.f32 %v1031_v24, %v941_v20  ;;  %v5464_v24 = vpop.f32.mrf.mxu0 }
 0x191   :  { %v1033_v26 = vpop.f32.mrf.mxu1  ;;  %6824 = vst [vmem:[#allocation18_spill] sm:$0xff] %v5464_v24  ;;  %v5834_v24 = vld [vmem:[%s6790_s8] sm:$0xff] }
 0x192   :  { %v1034_v30 = vadd.f32 %v1033_v26, %v945_v22  ;;  %6866 = vst [vmem:[#allocation59_spill] sm:$0xff] %v5834_v24 }
 0x193   :  { %v1037_v19 = vpop.f32.mrf.mxu1 }
 0x194   :  { %v1151_v21 = vcombine.low %v1032_v28, %v1034_v30  ;;  %v5440_v23 = vcombine.high %v1032_v28, %v1034_v30  ;;  %v1038_v27 = vadd.f32 %v1037_v19, %v941_v20 }
 0x195   :  { %v1039_v25 = vpop.f32.mrf.mxu1 }
 0x196   :  { %v1040_v29 = vadd.f32 %v1039_v25, %v945_v22  ;;  %v1391_v2 = vrot.slane %v1151_v21, 4  ;;  %v5466_v25 = vpop.f32.mrf.mxu0 }
 0x197   :  { %v1043_v31 = vpop.f32.mrf.mxu1  ;;  %6825 = vst [vmem:[#allocation19_spill] sm:$0xff] %v5466_v25 }
 0x198   :  { %v1154_v32 = vcombine.low %v1038_v27, %v1040_v29  ;;  %v1155_v33 = vcombine.high %v1038_v27, %v1040_v29  ;;  %v1044_v36 = vadd.f32 %v1043_v31, %v941_v20  ;;  %v5468_v27 = vpop.f32.mrf.mxu0 }
 0x199   :  { %v1045_v35 = vpop.f32.mrf.mxu1  ;;  %6826 = vst [vmem:[#allocation20_spill] sm:$0xff] %v5468_v27 }
 0x19a   :  { %1179 = vst [vmem:[#allocation2 + $0x18] sm:$0xff] %v1154_v32  ;;  %1181 = vst [vmem:[#allocation2 + $0x24] sm:$0xff] %v1155_v33  ;;  %v1046_v37 = vadd.f32 %v1045_v35, %v945_v22  ;;  %v5470_v29 = vpop.f32.mrf.mxu0 }
 0x19b   :  { %v1049_v38 = vpop.f32.mrf.mxu1  ;;  %6827 = vst [vmem:[#allocation21_spill] sm:$0xff] %v5470_v29 }
 0x19c   :  { %v1157_v39 = vcombine.low %v1044_v36, %v1046_v37  ;;  %v1158_v40 = vcombine.high %v1044_v36, %v1046_v37  ;;  %v1050_v43 = vadd.f32 %v1049_v38, %v941_v20 }
 0x19d   :  { %v1051_v42 = vpop.f32.mrf.mxu1 }
 0x19e   :  { %1183 = vst [vmem:[#allocation2 + $0x30] sm:$0xff] %v1157_v39  ;;  %1185 = vst [vmem:[#allocation2 + $0x3c] sm:$0xff] %v1158_v40  ;;  %v1052_v46 = vadd.f32 %v1051_v42, %v945_v22 }
 0x19f   :  { %v3994_v47 = vpop.f32.mrf.mxu1 }
 0x1a0   :  { %v1160_v48 = vcombine.low %v1050_v43, %v1052_v46  ;;  %v1161_v49 = vcombine.high %v1050_v43, %v1052_v46  ;;  %v1126_v50 = vadd.f32 %v3994_v47, %v949_v41 }
 0x1a1   :  { %v1120_v51 = vpop.f32.mrf.mxu1 }
 0x1a2   :  { %1187 = vst [vmem:[#allocation2 + $0x48] sm:$0xff] %v1160_v48  ;;  %1189 = vst [vmem:[#allocation2 + $0x54] sm:$0xff] %v1161_v49  ;;  %v1156_v52 = vcombine.high %v1126_v50, %v1126_v50  ;;  %v1121_v53 = vadd.f32 %v1120_v51, %v949_v41 }
 0x1a3   :  { %1180 = vst [vmem:[#allocation2 + $0x20] sm:$0xf] %v1126_v50  ;;  %v3997_v54 = vpop.f32.mrf.mxu1 }
 0x1a4   :  { %1182 = vst [vmem:[#allocation2 + $0x2c] sm:$0xf] %v1156_v52  ;;  %v1153_v55 = vcombine.high %v1121_v53, %v1121_v53  ;;  %1176 = vst [vmem:[#allocation2 + $0x8] sm:$0xf] %v1121_v53  ;;  %v1136_v56 = vadd.f32 %v3997_v54, %v949_v41 }
 0x1a5   :  { %v1130_v57 = vpop.f32.mrf.mxu1 }
 0x1a6   :  { %1178 = vst [vmem:[#allocation2 + $0x14] sm:$0xf] %v1153_v55  ;;  %v1162_v58 = vcombine.high %v1136_v56, %v1136_v56  ;;  %1188 = vst [vmem:[#allocation2 + $0x50] sm:$0xf] %v1136_v56  ;;  %v1131_v59 = vadd.f32 %v1130_v57, %v949_v41 }
 0x1a8   :  { %1190 = vst [vmem:[#allocation2 + $0x5c] sm:$0xf] %v1162_v58  ;;  %v1159_v60 = vcombine.high %v1131_v59, %v1131_v59  ;;  %1184 = vst [vmem:[#allocation2 + $0x38] sm:$0xf] %v1131_v59 }
 0x1aa   :  { %1186 = vst [vmem:[#allocation2 + $0x44] sm:$0xf] %v1159_v60 }
 0x1ab   :  { %v1193_v19 = vld [vmem:[#allocation2 + $0x8] sm:$0xf] }
 0x1bf   :  { %v1308_v61 = vpop.f32.mrf.mxu1 }
 0x1c0   :  { %v1383_v62 = vadd.f32 %v1308_v61, %v1151_v21 }
 0x1c1   :  { %v1310_v1 = vpop.f32.mrf.mxu1 }
 0x1c2   :  { %v3579_v0 = vmul.f32 -1.442695, %v1383_v62  ;;  %v1393_v4 = vadd.f32 %v1391_v2, %v1310_v1  ;;  %v5533_v1 = vld [vmem:[%s6790_s8 + $0x170] sm:$0xff]  ;;  %v5539_v2 = vld [vmem:[%s6790_s8 + $0x168] sm:$0xff] }
 0x1c3   :  { %v5472_v32 = vpop.f32.mrf.mxu0  ;;  %6853 = vst [vmem:[#allocation47_spill] sm:$0xff] %v5533_v1  ;;  %1685 = vmatprep.subr.mxu1 %v5533_v1 }
 0x1c4   :  { %4427 = vpow2.f32 %v3579_v0  ;;  %v3580_v6 = vmul.f32 -1.442695, %v1393_v4  ;;  %6828 = vst [vmem:[#allocation22_spill] sm:$0xff] %v5472_v32  ;;  %v5544_v4 = vld [vmem:[%s6790_s8 + $0x178] sm:$0xff] }
 0x1c5   :  { %v5474_v37 = vpop.f32.mrf.mxu0 }
 0x1c6   :  { %4429 = vpow2.f32 %v3580_v6  ;;  %6829 = vst [vmem:[#allocation23_spill] sm:$0xff] %v5474_v37  ;;  %v5551_v6 = vld [vmem:[%s6790_s8 + $0x158] sm:$0xff] }
 0x1c7   :  { %v5481_v39 = vpop.f32.mrf.mxu0 }
 0x1c8   :  { %6830 = vst [vmem:[#allocation24_spill] sm:$0xff] %v5481_v39 }
 0x1c9   :  { %v5486_v40 = vpop.f32.mrf.mxu0 }
 0x1ca   :  { %6831 = vst [vmem:[#allocation25_spill] sm:$0xff] %v5486_v40 }
 0x1cb   :  { %v5488_v41 = vpop.f32.mrf.mxu0 }
 0x1cc   :  { %6832 = vst [vmem:[#allocation26_spill] sm:$0xff] %v5488_v41  ;;  %v5726_v41 = vld [vmem:[%s6790_s8 + $0x80] sm:$0xff] }
 0x1cd   :  { %v5490_v42 = vpop.f32.mrf.mxu0 }
 0x1ce   :  { %6833 = vst [vmem:[#allocation27_spill] sm:$0xff] %v5490_v42  ;;  %v5707_v42 = vld [vmem:[%s6790_s8 + $0x98] sm:$0xff] }
 0x1cf   :  { %v5492_v43 = vpop.f32.mrf.mxu0 }
 0x1d0   :  { %6834 = vst [vmem:[#allocation28_spill] sm:$0xff] %v5492_v43  ;;  %v5747_v43 = vld [vmem:[%s6790_s8 + $0x68] sm:$0xff] }
 0x1d1   :  { %v4428_v9 = vpop.eup %4427  ;;  %v5494_v46 = vpop.f32.mrf.mxu0 }
 0x1d2   :  { %v1387_v10 = vadd.f32 1.0, %v4428_v9  ;;  %6835 = vst [vmem:[#allocation29_spill] sm:$0xff] %v5494_v46  ;;  %v5558_v9 = vld [vmem:[%s6790_s8 + $0x150] sm:$0xff]  ;;  %v5738_v46 = vld [vmem:[%s6790_s8 + $0x88] sm:$0xff] }
 0x1d3   :  { %v4430_v15 = vpop.eup %4429  ;;  %v5496_v47 = vpop.f32.mrf.mxu0 }
 0x1d4   :  { %4431 = vrcp.f32 %v1387_v10  ;;  %v1397_v18 = vadd.f32 1.0, %v4430_v15  ;;  %6836 = vst [vmem:[#allocation30_spill] sm:$0xff] %v5496_v47  ;;  %v5563_v10 = vld [vmem:[%s6790_s8 + $0x160] sm:$0xff]  ;;  %v5778_v47 = vld [vmem:[%s6790_s8 + $0x58] sm:$0xff] }
 0x1d5   :  { %v5498_v48 = vpop.f32.mrf.mxu0 }
 0x1d6   :  { %4433 = vrcp.f32 %v1397_v18  ;;  %6837 = vst [vmem:[#allocation31_spill] sm:$0xff] %v5498_v48  ;;  %v5572_v18 = vld [vmem:[%s6790_s8 + $0x140] sm:$0xff]  ;;  %v5766_v48 = vld [vmem:[%s6790_s8 + $0x50] sm:$0xff] }
 0x1d7   :  { %v5500_v49 = vpop.f32.mrf.mxu0 }
 0x1d8   :  { %6838 = vst [vmem:[#allocation32_spill] sm:$0xff] %v5500_v49  ;;  %v5806_v49 = vld [vmem:[%s6790_s8 + $0x20] sm:$0xff] }
 0x1d9   :  { %v5502_v50 = vpop.f32.mrf.mxu0  ;;  %6861 = vst [vmem:[#allocation54_spill] sm:$0xff] %v5806_v49 }
 0x1da   :  { %6839 = vst [vmem:[#allocation33_spill] sm:$0xff] %v5502_v50  ;;  %v5787_v50 = vld [vmem:[%s6790_s8 + $0x38] sm:$0xff] }
 0x1db   :  { %v5504_v51 = vpop.f32.mrf.mxu0 }
 0x1dc   :  { %6840 = vst [vmem:[#allocation34_spill] sm:$0xff] %v5504_v51  ;;  %v5827_v51 = vld [vmem:[%s6790_s8 + $0x8] sm:$0xff] }
 0x1dd   :  { %v5506_v52 = vpop.f32.mrf.mxu0  ;;  %6865 = vst [vmem:[#allocation58_spill] sm:$0xff] %v5827_v51 }
 0x1de   :  { %6841 = vst [vmem:[#allocation35_spill] sm:$0xff] %v5506_v52  ;;  %v5818_v52 = vld [vmem:[%s6790_s8 + $0x28] sm:$0xff] }
 0x1df   :  { %v1379_v20 = vpop.f32.mrf.mxu1  ;;  %6863 = vst [vmem:[#allocation56_spill] sm:$0xff] %v5818_v52 }
 0x1e0   :  { %v1406_v22 = vadd.f32 %v5461_v17, %v1379_v20  ;;  %v5579_v20 = vld [vmem:[%s6790_s8 + $0x138] sm:$0xff] }
 0x1e1   :  { %v4432_v26 = vpop.eup %4431  ;;  %v4032_v28 = vpop.f32.mrf.mxu1 }
 0x1e2   :  { %v1407_v30 = vmul.f32 %v4432_v26, %v1406_v22  ;;  %v5508_v53 = vpop.f32.mrf.mxu0  ;;  %v5584_v22 = vld [vmem:[%s6790_s8 + $0x148] sm:$0xff]  ;;  %v5598_v28 = vld [vmem:[%s6790_s8 + $0x120] sm:$0xff] }
 0x1e3   :  { %v4434_v31 = vpop.eup %4433  ;;  %6842 = vst [vmem:[#allocation36_spill] sm:$0xff] %v5508_v53  ;;  %v5591_v26 = vld [vmem:[%s6790_s8 + $0x128] sm:$0xff] }
 0x1e4   :  { %v1408_v21 = vadd.f32 %v1407_v30, %v1193_v19  ;;  %v1410_v33 = vsub.f32 1.0, %v4434_v31  ;;  %v1412_v36 = vmul.f32 0.0, %v4434_v31  ;;  %v5510_v54 = vpop.f32.mrf.mxu0  ;;  %v5603_v30 = vld [vmem:[%s6790_s8 + $0x130] sm:$0xff]  ;;  %v5619_v31 = vld [vmem:[%s6790_s8 + $0x108] sm:$0xff] }
 0x1e5   :  { %6843 = vst [vmem:[#allocation37_spill] sm:$0xff] %v5510_v54 }
 0x1e6   :  { %4435 = vtanh.f32 %v1408_v21  ;;  %v5512_v55 = vpop.f32.mrf.mxu0  ;;  %v5612_v21 = vld [vmem:[%s6790_s8 + $0x110] sm:$0xff] }
 0x1e7   :  { %6844 = vst [vmem:[#allocation38_spill] sm:$0xff] %v5512_v55 }
 0x1e8   :  { %v5514_v56 = vpop.f32.mrf.mxu0 }
 0x1e9   :  { %6845 = vst [vmem:[#allocation39_spill] sm:$0xff] %v5514_v56 }
 0x1ea   :  { %v5516_v57 = vpop.f32.mrf.mxu0 }
 0x1eb   :  { %6846 = vst [vmem:[#allocation40_spill] sm:$0xff] %v5516_v57 }
 0x1ec   :  { %v5518_v58 = vpop.f32.mrf.mxu0 }
 0x1ed   :  { %6847 = vst [vmem:[#allocation41_spill] sm:$0xff] %v5518_v58 }
 0x1ee   :  { %v5520_v59 = vpop.f32.mrf.mxu0 }
 0x1ef   :  { %6848 = vst [vmem:[#allocation42_spill] sm:$0xff] %v5520_v59  ;;  %v5659_v59 = vld [vmem:[%s6790_s8 + $0xd8] sm:$0xff] }
 0x1f0   :  { %v5522_v60 = vpop.f32.mrf.mxu0 }
 0x1f1   :  { %6849 = vst [vmem:[#allocation43_spill] sm:$0xff] %v5522_v60  ;;  %v6857_v60 = vmov 0.0  }
 0x1f2   :  { %v5524_v61 = vpop.f32.mrf.mxu0 }
 0x1f3   :  { %v4436_v34 = vpop.eup %4435  ;;  %6850 = vst [vmem:[#allocation44_spill] sm:$0xff] %v5524_v61  ;;  %v5671_v61 = vld [vmem:[%s6790_s8 + $0xc8] sm:$0xff] }
 0x1f4   :  { %v1411_v35 = vmul.f32 %v4436_v34, %v1410_v33  ;;  %v5526_v62 = vpop.f32.mrf.mxu0  ;;  %v5624_v33 = vld [vmem:[%s6790_s8 + $0x118] sm:$0xff] }
 0x1f5   :  { %6851 = vst [vmem:[#allocation45_spill] sm:$0xff] %v5526_v62  ;;  %v5631_v34 = vld [vmem:[%s6790_s8 + $0xf8] sm:$0xff]  ;;  %v5664_v62 = vld [vmem:[%s6790_s8 + $0xe8] sm:$0xff] }
 0x1f6   :  { %v5476_v38 = vadd.f32 %v1412_v36, %v1411_v35  ;;  %v5528_v0 = vpop.f32.mrf.mxu0  ;;  %v5638_v35 = vld [vmem:[%s6790_s8 + $0xf0] sm:$0xff]  ;;  %v5643_v36 = vld [vmem:[%s6790_s8 + $0x100] sm:$0xff] }
 0x1f7   :  { %6852 = vst [vmem:[#allocation46_spill] sm:$0xff] %v5528_v0  ;;  %v5683_v0 = vld [vmem:[%s6790_s8 + $0xd0] sm:$0xff] }
 0x1f8   :  { %1414 = vst [vmem:[#allocation3] sm:$0xf] %v5476_v38  ;;  %1531 = vmatmul.mubr.f32.vlgmr.msra.gmra.mxu1 %v5476_v38  ;;  %4066 = vmatmul.mubr.f32.vlgmr.msra.gmra.mxu0 %v5476_v38  ;;  %v5565_v15 = vpop.f32.mrf.mxu0 }
 0x1f9   :  { %1749 = vmatprep.mubr.f32.mxu1 %v6794_v14  ;;  %4100 = vmatprep.mubr.msk.f32.mxu0 %vm4675_vm3, %v6794_v14  ;;  %6854 = vst [vmem:[#allocation48_spill] sm:$0xff] %v5565_v15  ;;  %v5678_v15 = vld [vmem:[%s6790_s8 + $0xc0] sm:$0xff] }
 0x1fa   :  { %1686 = vmatpush1.msra.mxu1 %v5539_v2  ;;  %4069 = vmatpush3.msra.mxu0 %v5544_v4  ;;  %v5605_v19 = vpop.f32.mrf.mxu0 }
 0x1fb   :  { %1687 = vmatprep.subr.mxu1 %v5551_v6  ;;  %4070 = vmatprep.subr.mxu0 %v6794_v14  ;;  %6855 = vst [vmem:[#allocation49_spill] sm:$0xff] %v5605_v19 }
 0x1fc   :  { %1688 = vmatpush1.msra.mxu1 %v5558_v9  ;;  %4071 = vmatpush3.msra.mxu0 %v5563_v10  ;;  %v5645_v13 = vpop.f32.mrf.mxu0 }
 0x1fd   :  { %1689 = vmatprep.subr.mxu1 %v5572_v18  ;;  %4072 = vmatprep.subr.mxu0 %v6794_v14  ;;  %6856 = vst [vmem:[#allocation50_spill] sm:$0xff] %v5645_v13  ;;  %v5688_v13 = vld [vmem:[%s6790_s8 + $0xb0] sm:$0xff] }
 0x1fe   :  { %1690 = vmatpush1.msra.mxu1 %v5579_v20  ;;  %4073 = vmatpush3.msra.mxu0 %v5584_v22  ;;  %v5690_v19 = vpop.f32.mrf.mxu0 }
 0x1ff   :  { %1691 = vmatprep.subr.mxu1 %v5591_v26  ;;  %4074 = vmatprep.subr.mxu0 %v6794_v14  ;;  %6858 = vst [vmem:[#allocation51_spill] sm:$0xff] %v5690_v19  ;;  %v5714_v19 = vld [vmem:[%s6790_s8 + $0x90] sm:$0xff] }
 0x200   :  { %1692 = vmatpush1.msra.mxu1 %v5598_v28  ;;  %4075 = vmatpush3.msra.mxu0 %v5603_v30  ;;  %v5740_v7 = vpop.f32.mrf.mxu0 }
 0x201   :  { %1693 = vmatprep.subr.mxu1 %v5612_v21  ;;  %4076 = vmatprep.subr.mxu0 %v6794_v14  ;;  %6859 = vst [vmem:[#allocation52_spill] sm:$0xff] %v5740_v7  ;;  %v5759_v7 = vld [vmem:[%s6790_s8 + $0x70] sm:$0xff] }
 0x202   :  { %1694 = vmatpush1.msra.mxu1 %v5619_v31  ;;  %4077 = vmatpush3.msra.mxu0 %v5624_v33  ;;  %v5780_v8 = vpop.f32.mrf.mxu0 }
 0x203   :  { %1695 = vmatprep.subr.mxu1 %v5631_v34  ;;  %4078 = vmatprep.subr.mxu0 %v6794_v14  ;;  %v5652_v14 = vld [vmem:[%s6790_s8 + $0xe0] sm:$0xff]  ;;  %6860 = vst [vmem:[#allocation53_spill] sm:$0xff] %v5780_v8 }
 0x204   :  { %1696 = vmatpush1.msra.mxu1 %v5638_v35  ;;  %4079 = vmatpush3.msra.mxu0 %v5643_v36  ;;  %v5799_v8 = vld [vmem:[%s6790_s8 + $0x40] sm:$0xff]  ;;  %v5820_v25 = vpop.f32.mrf.mxu0 }
 0x205   :  { %1697 = vmatprep.subr.mxu1 %v5652_v14  ;;  %4080 = vmatprep.subr.mxu0 %v6857_v60  ;;  %6864 = vst [vmem:[#allocation57_spill] sm:$0xff] %v5820_v25  ;;  %v5839_v25 = vld [vmem:[%s6790_s8 + $0x10] sm:$0xff] }
 0x206   :  { %1698 = vmatpush1.msra.mxu1 %v5659_v59  ;;  %4081 = vmatpush3.msra.mxu0 %v5664_v62  ;;  %6867 = vst [vmem:[#allocation60_spill] sm:$0xff] %v5839_v25  ;;  %v5845_v54 = vpop.f32.mrf.mxu0 }
 0x207   :  { %1699 = vmatprep.subr.mxu1 %v5671_v61  ;;  %4082 = vmatprep.subr.mxu0 %v6857_v60  ;;  %6868 = vst [vmem:[#allocation61_spill] sm:$0xff] %v5845_v54 }
 0x208   :  { %1700 = vmatpush1.msra.mxu1 %v5678_v15  ;;  %4083 = vmatpush3.msra.mxu0 %v5683_v0  ;;  %v5851_v29 = vpop.f32.mrf.mxu0 }
 0x209   :  { %1701 = vmatprep.subr.mxu1 %v5688_v13  ;;  %4084 = vmatprep.subr.mxu0 %v6857_v60  ;;  %6869 = vst [vmem:[#allocation62_spill] sm:$0xff] %v5851_v29 }
 0x20a   :  { %1702 = vmatpush1.msra.mxu1 %v5697_v45  ;;  %4085 = vmatpush3.msra.mxu0 %v5702_v44  ;;  %v5853_v53 = vpop.f32.mrf.mxu0 }
 0x20b   :  { %1703 = vmatprep.subr.mxu1 %v5707_v42  ;;  %4086 = vmatprep.subr.mxu0 %v6857_v60  ;;  %6870 = vst [vmem:[#allocation63_spill] sm:$0xff] %v5853_v53 }
 0x20c   :  { %1704 = vmatpush1.msra.mxu1 %v5714_v19  ;;  %4087 = vmatpush3.msra.mxu0 %v5719_v3  ;;  %v5855_v27 = vpop.f32.mrf.mxu0 }
 0x20d   :  { %1705 = vmatprep.subr.mxu1 %v5726_v41  ;;  %4088 = vmatprep.subr.mxu0 %v6857_v60  ;;  %6871 = vst [vmem:[#allocation64_spill] sm:$0xff] %v5855_v27 }
 0x20e   :  { %1706 = vmatpush1.msra.mxu1 %v5733_v63  ;;  %4089 = vmatpush3.msra.mxu0 %v5738_v46  ;;  %v5857_v56 = vpop.f32.mrf.mxu0 }
 0x20f   :  { %1707 = vmatprep.subr.mxu1 %v5747_v43  ;;  %4090 = vmatprep.subr.mxu0 %v6857_v60  ;;  %6872 = vst [vmem:[#allocation65_spill] sm:$0xff] %v5857_v56 }
 0x210   :  { %1708 = vmatpush1.msra.mxu1 %v5754_v5  ;;  %4091 = vmatpush3.msra.mxu0 %v5759_v7  ;;  %v5859_v37 = vpop.f32.mrf.mxu0 }
 0x211   :  { %1709 = vmatprep.subr.mxu1 %v5766_v48  ;;  %4092 = vmatprep.subr.mxu0 %v6857_v60  ;;  %6873 = vst [vmem:[#allocation66_spill] sm:$0xff] %v5859_v37 }
 0x212   :  { %1710 = vmatpush1.msra.mxu1 %v5773_v11  ;;  %4093 = vmatpush3.msra.mxu0 %v5778_v47  ;;  %v5861_v55 = vpop.f32.mrf.mxu0 }
 0x213   :  { %1711 = vmatprep.subr.mxu1 %v5787_v50  ;;  %4094 = vmatprep.subr.mxu0 %v6857_v60  ;;  %6874 = vst [vmem:[#allocation67_spill] sm:$0xff] %v5861_v55 }
 0x214   :  { %1712 = vmatpush1.msra.mxu1 %v5794_v16  ;;  %4095 = vmatpush3.msra.mxu0 %v5799_v8  ;;  %v5863_v54 = vpop.f32.mrf.mxu0 }
 0x215   :  { %1713 = vmatprep.subr.mxu1 %v5806_v49  ;;  %4096 = vmatprep.subr.mxu0 %v6857_v60  ;;  %6875 = vst [vmem:[#allocation68_spill] sm:$0xff] %v5863_v54 }
 0x216   :  { %1714 = vmatpush1.msra.mxu1 %v5813_v12  ;;  %4097 = vmatpush3.msra.mxu0 %v5818_v52  ;;  %v5865_v32 = vpop.f32.mrf.mxu0 }
 0x217   :  { %1715 = vmatprep.subr.mxu1 %v5827_v51  ;;  %4098 = vmatprep.subr.mxu0 %v6857_v60  ;;  %6876 = vst [vmem:[#allocation69_spill] sm:$0xff] %v5865_v32 }
 0x218   :  { %1716 = vmatpush1.msra.mxu1 %v5834_v24  ;;  %4099 = vmatpush3.msra.mxu0 %v5839_v25  ;;  %v5867_v58 = vpop.f32.mrf.mxu0 }
 0x219   :  { %1904 = vmatprep.subr.mxu1 %v5533_v1  ;;  %4103 = vmatprep.subr.mxu0 %v6857_v60  ;;  %6877 = vst [vmem:[#allocation70_spill] sm:$0xff] %v5867_v58 }
 0x21a   :  { %v5869_v40 = vpop.f32.mrf.mxu0 }
 0x21b   :  { %6878 = vst [vmem:[#allocation71_spill] sm:$0xff] %v5869_v40 }
 0x21c   :  { %v5871_v57 = vpop.f32.mrf.mxu0 }
 0x21d   :  { %6879 = vst [vmem:[#allocation72_spill] sm:$0xff] %v5871_v57  ;;  %v1615_v57 = vrot.slane %v5440_v23, 4 }
 0x21e   :  { %v5873_v29 = vpop.f32.mrf.mxu0 }
 0x21f   :  { %6880 = vst [vmem:[#allocation73_spill] sm:$0xff] %v5873_v29 }
 0x220   :  { %v5875_v53 = vpop.f32.mrf.mxu0 }
 0x221   :  { %6881 = vst [vmem:[#allocation74_spill] sm:$0xff] %v5875_v53 }
 0x222   :  { %v5877_v27 = vpop.f32.mrf.mxu0 }
 0x223   :  { %6882 = vst [vmem:[#allocation75_spill] sm:$0xff] %v5877_v27 }
 0x224   :  { %v5879_v56 = vpop.f32.mrf.mxu0 }
 0x225   :  { %6883 = vst [vmem:[#allocation76_spill] sm:$0xff] %v5879_v56 }
 0x226   :  { %v5881_v37 = vpop.f32.mrf.mxu0 }
 0x227   :  { %6884 = vst [vmem:[#allocation77_spill] sm:$0xff] %v5881_v37 }
 0x228   :  { %v5883_v55 = vpop.f32.mrf.mxu0 }
 0x229   :  { %6885 = vst [vmem:[#allocation78_spill] sm:$0xff] %v5883_v55 }
 0x2b8   :  { %v1532_v54 = vpop.f32.mrf.mxu1  ;;  %v1603_v32 = vpop.f32.mrf.mxu0 }
 0x2b9   :  { %v1607_v58 = vadd.f32 %v1532_v54, %v5440_v23  ;;  %v1624_v55 = vadd.f32 %v5461_v17, %v1603_v32  ;;  %v1417_v54 = vld [vmem:[#allocation2 + $0x14] sm:$0xf]  ;;  %v6889_v32 = vld [vmem:[#allocation60_spill] sm:$0xff] }
 0x2ba   :  { %v4067_v39 = vpop.f32.mrf.mxu0  ;;  %v1534_v1 = vpop.f32.mrf.mxu1 }
 0x2bb   :  { %v3582_v40 = vmul.f32 -1.442695, %v1607_v58  ;;  %v1617_v29 = vadd.f32 %v1615_v57, %v1534_v1 }
 0x2bd   :  { %4437 = vpow2.f32 %v3582_v40  ;;  %v3583_v53 = vmul.f32 -1.442695, %v1617_v29 }
 0x2bf   :  { %4439 = vpow2.f32 %v3583_v53 }
 0x2ca   :  { %v4438_v27 = vpop.eup %4437 }
 0x2cb   :  { %v1611_v25 = vadd.f32 1.0, %v4438_v27  ;;  %v6888_v27 = vld [vmem:[#allocation59_spill] sm:$0xff] }
 0x2cc   :  { %v4440_v56 = vpop.eup %4439 }
 0x2cd   :  { %4441 = vrcp.f32 %v1611_v25  ;;  %v1621_v37 = vadd.f32 1.0, %v4440_v56  ;;  %v6887_v25 = vld [vmem:[#allocation58_spill] sm:$0xff] }
 0x2cf   :  { %4443 = vrcp.f32 %v1621_v37  ;;  %v6890_v37 = vld [vmem:[#allocation47_spill] sm:$0xff] }
 0x2da   :  { %v4442_v24 = vpop.eup %4441 }
 0x2db   :  { %v1625_v51 = vmul.f32 %v4442_v24, %v1624_v55  ;;  %v6886_v24 = vld [vmem:[#allocation56_spill] sm:$0xff] }
 0x2dc   :  { %v4444_v58 = vpop.eup %4443 }
 0x2dd   :  { %v1626_v39 = vadd.f32 %v1625_v51, %v1417_v54  ;;  %v1628_v40 = vsub.f32 1.0, %v4444_v58  ;;  %v1630_v29 = vmul.f32 %v4444_v58, %v5476_v38  ;;  %v1635_v38 = vld [vmem:[#allocation2 + $0x18] sm:$0xff] }
 0x2de   :  { %v1834_v54 = vrot.slane %v1635_v38, 4 }
 0x2df   :  { %4445 = vtanh.f32 %v1626_v39 }
 0x2ec   :  { %v4446_v52 = vpop.eup %4445 }
 0x2ed   :  { %v1629_v23 = vmul.f32 %v4446_v52, %v1628_v40 }
 0x2ef   :  { %v5889_v53 = vadd.f32 %v1630_v29, %v1629_v23 }
 0x2f1   :  { %1633 = vst [vmem:[#allocation3 + $0x4] sm:$0xf] %v5889_v53  ;;  %1750 = vmatmul.mubr.f32.vlgmr.msra.gmra.mxu1 %v5889_v53  ;;  %4101 = vmatmul.mubr.f32.vlgmr.msra.gmra.mxu0 %v5889_v53 }
 0x2f2   :  { %1905 = vmatpush1.msra.mxu1 %v5539_v2  ;;  %4104 = vmatpush3.msra.mxu0 %v5544_v4 }
 0x2f3   :  { %1906 = vmatprep.subr.mxu1 %v5551_v6  ;;  %4105 = vmatprep.subr.mxu0 %v6857_v60 }
 0x2f4   :  { %1907 = vmatpush1.msra.mxu1 %v5558_v9  ;;  %4106 = vmatpush3.msra.mxu0 %v5563_v10 }
 0x2f5   :  { %1908 = vmatprep.subr.mxu1 %v5572_v18  ;;  %4107 = vmatprep.subr.mxu0 %v6857_v60 }
 0x2f6   :  { %1909 = vmatpush1.msra.mxu1 %v5579_v20  ;;  %4108 = vmatpush3.msra.mxu0 %v5584_v22 }
 0x2f7   :  { %1910 = vmatprep.subr.mxu1 %v5591_v26  ;;  %4109 = vmatprep.subr.mxu0 %v6857_v60 }
 0x2f8   :  { %1911 = vmatpush1.msra.mxu1 %v5598_v28  ;;  %4110 = vmatpush3.msra.mxu0 %v5603_v30 }
 0x2f9   :  { %1912 = vmatprep.subr.mxu1 %v5612_v21  ;;  %4111 = vmatprep.subr.mxu0 %v6857_v60 }
 0x2fa   :  { %1913 = vmatpush1.msra.mxu1 %v5619_v31  ;;  %4112 = vmatpush3.msra.mxu0 %v5624_v33 }
 0x2fb   :  { %1914 = vmatprep.subr.mxu1 %v5631_v34  ;;  %4113 = vmatprep.subr.mxu0 %v6857_v60 }
 0x2fc   :  { %1915 = vmatpush1.msra.mxu1 %v5638_v35  ;;  %4114 = vmatpush3.msra.mxu0 %v5643_v36 }
 0x2fd   :  { %1916 = vmatprep.subr.mxu1 %v5652_v14  ;;  %4115 = vmatprep.subr.mxu0 %v6857_v60 }
 0x2fe   :  { %1917 = vmatpush1.msra.mxu1 %v5659_v59  ;;  %4116 = vmatpush3.msra.mxu0 %v5664_v62 }
 0x2ff   :  { %1918 = vmatprep.subr.mxu1 %v5671_v61  ;;  %4117 = vmatprep.subr.mxu0 %v6857_v60 }
 0x300   :  { %1919 = vmatpush1.msra.mxu1 %v5678_v15  ;;  %4118 = vmatpush3.msra.mxu0 %v5683_v0 }
 0x301   :  { %1920 = vmatprep.subr.mxu1 %v5688_v13  ;;  %4119 = vmatprep.subr.mxu0 %v6857_v60 }
 0x302   :  { %1921 = vmatpush1.msra.mxu1 %v5697_v45  ;;  %4120 = vmatpush3.msra.mxu0 %v5702_v44 }
 0x303   :  { %1922 = vmatprep.subr.mxu1 %v5707_v42  ;;  %4121 = vmatprep.subr.mxu0 %v6857_v60 }
 0x304   :  { %1923 = vmatpush1.msra.mxu1 %v5714_v19  ;;  %4122 = vmatpush3.msra.mxu0 %v5719_v3 }
 0x305   :  { %1924 = vmatprep.subr.mxu1 %v5726_v41  ;;  %4123 = vmatprep.subr.mxu0 %v6857_v60 }
 0x306   :  { %1925 = vmatpush1.msra.mxu1 %v5733_v63  ;;  %4124 = vmatpush3.msra.mxu0 %v5738_v46 }
 0x307   :  { %1926 = vmatprep.subr.mxu1 %v5747_v43  ;;  %4125 = vmatprep.subr.mxu0 %v6857_v60 }
 0x308   :  { %1927 = vmatpush1.msra.mxu1 %v5754_v5  ;;  %4126 = vmatpush3.msra.mxu0 %v5759_v7 }
 0x309   :  { %1928 = vmatprep.subr.mxu1 %v5766_v48  ;;  %4127 = vmatprep.subr.mxu0 %v6857_v60 }
 0x30a   :  { %1929 = vmatpush1.msra.mxu1 %v5773_v11  ;;  %4128 = vmatpush3.msra.mxu0 %v5778_v47 }
 0x30b   :  { %1930 = vmatprep.subr.mxu1 %v5787_v50  ;;  %4129 = vmatprep.subr.mxu0 %v6857_v60 }
 0x30c   :  { %1931 = vmatpush1.msra.mxu1 %v5794_v16  ;;  %4130 = vmatpush3.msra.mxu0 %v5799_v8 }
 0x30d   :  { %1932 = vmatprep.subr.mxu1 %v5806_v49  ;;  %4131 = vmatprep.subr.mxu0 %v6857_v60 }
 0x30e   :  { %1933 = vmatpush1.msra.mxu1 %v5813_v12  ;;  %4132 = vmatpush3.msra.mxu0 %v6886_v24  ;;  %v1636_v24 = vld [vmem:[#allocation2 + $0x20] sm:$0xf] }
 0x30f   :  { %1934 = vmatprep.subr.mxu1 %v6887_v25  ;;  %4133 = vmatprep.subr.mxu0 %v6857_v60 }
 0x310   :  { %1935 = vmatpush1.msra.mxu1 %v6888_v27  ;;  %1968 = vmatprep.mubr.f32.mxu1 %v6857_v60 }
 0x311   :  { %4134 = vmatpush3.msra.mxu0 %v6889_v32  ;;  %4135 = vmatprep.mubr.msk.f32.mxu0 %vm4675_vm3, %v6857_v60 }
 0x312   :  { %2123 = vmatprep.subr.mxu1 %v6890_v37  ;;  %4138 = vmatprep.subr.mxu0 %v6857_v60 }
 0x3b1   :  { %v1751_v51 = vpop.f32.mrf.mxu1  ;;  %v1822_v52 = vpop.f32.mrf.mxu0 }
 0x3b2   :  { %v1826_v55 = vadd.f32 %v1751_v51, %v1635_v38  ;;  %v1843_v37 = vadd.f32 %v5461_v17, %v1822_v52 }
 0x3b3   :  { %v4102_v56 = vpop.f32.mrf.mxu0  ;;  %v1753_v1 = vpop.f32.mrf.mxu1 }
 0x3b4   :  { %v3584_v57 = vmul.f32 -1.442695, %v1826_v55  ;;  %v1836_v39 = vadd.f32 %v1834_v54, %v1753_v1 }
 0x3b6   :  { %4447 = vpow2.f32 %v3584_v57  ;;  %v3585_v58 = vmul.f32 -1.442695, %v1836_v39 }
 0x3b8   :  { %4449 = vpow2.f32 %v3585_v58 }
 0x3c3   :  { %v4448_v40 = vpop.eup %4447 }
 0x3c4   :  { %v1830_v23 = vadd.f32 1.0, %v4448_v40  ;;  %v3352_v40 = vld [vmem:[#allocation3 + $0x3] sm:$0x1] }
 0x3c5   :  { %v4450_v29 = vpop.eup %4449 }
 0x3c6   :  { %4451 = vrcp.f32 %v1830_v23  ;;  %v1840_v32 = vadd.f32 1.0, %v4450_v29 }
 0x3c8   :  { %4453 = vrcp.f32 %v1840_v32 }
 0x3d3   :  { %v4452_v27 = vpop.eup %4451 }
 0x3d4   :  { %v1844_v25 = vmul.f32 %v4452_v27, %v1843_v37  ;;  %v3220_v37 = vld [vmem:[#allocation3 + $0x2] sm:$0x1] }
 0x3d5   :  { %v4454_v55 = vpop.eup %4453 }
 0x3d6   :  { %v1845_v51 = vadd.f32 %v1844_v25, %v1636_v24  ;;  %v1847_v56 = vsub.f32 1.0, %v4454_v55  ;;  %v1849_v1 = vmul.f32 %v4454_v55, %v5889_v53  ;;  %v3221_v24 = vld [vmem:[#allocation3 + $0x6] sm:$0x1]  ;;  %v3353_v53 = vld [vmem:[#allocation3 + $0x7] sm:$0x1] }
 0x3d7   :  { %v3253_v25 = vrot.slane %v3221_v24, 7  ;;  %v3385_v27 = vrot.slane %v3353_v53, 7  ;;  %v6895_v24 = vld [vmem:[#allocation47_spill] sm:$0xff]  ;;  %v1854_v53 = vld [vmem:[#allocation2 + $0x24] sm:$0xff] }
 0x3d8   :  { %4455 = vtanh.f32 %v1845_v51 }
 0x3d9   :  { %v3254_v58 = vsel %vm2983_vm4, %v3253_v25, %v3220_v37  ;;  %v3386_v51 = vsel %vm2983_vm4, %v3385_v27, %v3352_v40 }
 0x3e5   :  { %v4456_v57 = vpop.eup %4455 }
 0x3e6   :  { %v1848_v38 = vmul.f32 %v4456_v57, %v1847_v56  ;;  %v6891_v56 = vld [vmem:[#allocation56_spill] sm:$0xff]  ;;  %v6892_v57 = vld [vmem:[#allocation58_spill] sm:$0xff] }
 0x3e8   :  { %v5963_v54 = vadd.f32 %v1849_v1, %v1848_v38  ;;  %v6893_v38 = vld [vmem:[#allocation59_spill] sm:$0xff]  ;;  %v6894_v1 = vld [vmem:[#allocation60_spill] sm:$0xff] }
 0x3ea   :  { %1852 = vst [vmem:[#allocation3 + $0x8] sm:$0xf] %v5963_v54  ;;  %1969 = vmatmul.mubr.f32.vlgmr.msra.gmra.mxu1 %v5963_v54  ;;  %4136 = vmatmul.mubr.f32.vlgmr.msra.gmra.mxu0 %v5963_v54 }
 0x3eb   :  { %2124 = vmatpush1.msra.mxu1 %v5539_v2  ;;  %4139 = vmatpush3.msra.mxu0 %v5544_v4 }
 0x3ec   :  { %2125 = vmatprep.subr.mxu1 %v5551_v6  ;;  %4140 = vmatprep.subr.mxu0 %v6857_v60 }
 0x3ed   :  { %2126 = vmatpush1.msra.mxu1 %v5558_v9  ;;  %4141 = vmatpush3.msra.mxu0 %v5563_v10 }
 0x3ee   :  { %2127 = vmatprep.subr.mxu1 %v5572_v18  ;;  %4142 = vmatprep.subr.mxu0 %v6857_v60 }
 0x3ef   :  { %2128 = vmatpush1.msra.mxu1 %v5579_v20  ;;  %4143 = vmatpush3.msra.mxu0 %v5584_v22 }
 0x3f0   :  { %2129 = vmatprep.subr.mxu1 %v5591_v26  ;;  %4144 = vmatprep.subr.mxu0 %v6857_v60 }
 0x3f1   :  { %2130 = vmatpush1.msra.mxu1 %v5598_v28  ;;  %4145 = vmatpush3.msra.mxu0 %v5603_v30  ;;  %v3222_v32 = vld [vmem:[#allocation3 + $0xa] sm:$0x1]  ;;  %v3354_v39 = vld [vmem:[#allocation3 + $0xb] sm:$0x1] }
 0x3f2   :  { %2131 = vmatprep.subr.mxu1 %v5612_v21  ;;  %4146 = vmatprep.subr.mxu0 %v6857_v60  ;;  %v3255_v52 = vrot.slane %v3222_v32, 6  ;;  %v3387_v23 = vrot.slane %v3354_v39, 6 }
 0x3f3   :  { %2132 = vmatpush1.msra.mxu1 %v5619_v31  ;;  %4147 = vmatpush3.msra.mxu0 %v5624_v33 }
 0x3f4   :  { %2133 = vmatprep.subr.mxu1 %v5631_v34  ;;  %4148 = vmatprep.subr.mxu0 %v6857_v60  ;;  %v5990_v29 = vsel %vm2986_vm5, %v3255_v52, %v3254_v58  ;;  %v5996_v55 = vsel %vm2986_vm5, %v3387_v23, %v3386_v51  ;;  %v2053_v58 = vrot.slane %v1854_v53, 4 }
 0x3f5   :  { %2134 = vmatpush1.msra.mxu1 %v5638_v35  ;;  %4149 = vmatpush3.msra.mxu0 %v5643_v36 }
 0x3f6   :  { %2135 = vmatprep.subr.mxu1 %v5652_v14  ;;  %4150 = vmatprep.subr.mxu0 %v6857_v60 }
 0x3f7   :  { %2136 = vmatpush1.msra.mxu1 %v5659_v59  ;;  %4151 = vmatpush3.msra.mxu0 %v5664_v62 }
 0x3f8   :  { %2137 = vmatprep.subr.mxu1 %v5671_v61  ;;  %4152 = vmatprep.subr.mxu0 %v6857_v60 }
 0x3f9   :  { %2138 = vmatpush1.msra.mxu1 %v5678_v15  ;;  %4153 = vmatpush3.msra.mxu0 %v5683_v0 }
 0x3fa   :  { %2139 = vmatprep.subr.mxu1 %v5688_v13  ;;  %4154 = vmatprep.subr.mxu0 %v6857_v60 }
 0x3fb   :  { %2140 = vmatpush1.msra.mxu1 %v5697_v45  ;;  %4155 = vmatpush3.msra.mxu0 %v5702_v44 }
 0x3fc   :  { %2141 = vmatprep.subr.mxu1 %v5707_v42  ;;  %4156 = vmatprep.subr.mxu0 %v6857_v60 }
 0x3fd   :  { %2142 = vmatpush1.msra.mxu1 %v5714_v19  ;;  %4157 = vmatpush3.msra.mxu0 %v5719_v3 }
 0x3fe   :  { %2143 = vmatprep.subr.mxu1 %v5726_v41  ;;  %4158 = vmatprep.subr.mxu0 %v6857_v60 }
 0x3ff   :  { %2144 = vmatpush1.msra.mxu1 %v5733_v63  ;;  %4159 = vmatpush3.msra.mxu0 %v5738_v46 }
 0x400   :  { %2145 = vmatprep.subr.mxu1 %v5747_v43  ;;  %4160 = vmatprep.subr.mxu0 %v6857_v60 }
 0x401   :  { %2146 = vmatpush1.msra.mxu1 %v5754_v5  ;;  %4161 = vmatpush3.msra.mxu0 %v5759_v7 }
 0x402   :  { %2147 = vmatprep.subr.mxu1 %v5766_v48  ;;  %4162 = vmatprep.subr.mxu0 %v6857_v60 }
 0x403   :  { %2148 = vmatpush1.msra.mxu1 %v5773_v11  ;;  %4163 = vmatpush3.msra.mxu0 %v5778_v47 }
 0x404   :  { %2149 = vmatprep.subr.mxu1 %v5787_v50  ;;  %4164 = vmatprep.subr.mxu0 %v6857_v60 }
 0x405   :  { %2150 = vmatpush1.msra.mxu1 %v5794_v16  ;;  %4165 = vmatpush3.msra.mxu0 %v5799_v8 }
 0x406   :  { %2151 = vmatprep.subr.mxu1 %v5806_v49  ;;  %4166 = vmatprep.subr.mxu0 %v6857_v60  ;;  %v1855_v49 = vld [vmem:[#allocation2 + $0x2c] sm:$0xf] }
 0x407   :  { %2152 = vmatpush1.msra.mxu1 %v5813_v12  ;;  %4167 = vmatpush3.msra.mxu0 %v6891_v56 }
 0x408   :  { %2153 = vmatprep.subr.mxu1 %v6892_v57  ;;  %4168 = vmatprep.subr.mxu0 %v6857_v60 }
 0x409   :  { %2154 = vmatpush1.msra.mxu1 %v6893_v38  ;;  %2187 = vmatprep.mubr.f32.mxu1 %v6857_v60 }
 0x40a   :  { %4169 = vmatpush3.msra.mxu0 %v6894_v1  ;;  %4170 = vmatprep.mubr.msk.f32.mxu0 %vm4675_vm3, %v6857_v60 }
 0x40b   :  { %2342 = vmatprep.subr.mxu1 %v6895_v24  ;;  %4173 = vmatprep.subr.mxu0 %v6857_v60 }
 0x4aa   :  { %v1970_v25 = vpop.f32.mrf.mxu1  ;;  %v2041_v27 = vpop.f32.mrf.mxu0 }
 0x4ab   :  { %v2045_v32 = vadd.f32 %v1970_v25, %v1854_v53  ;;  %v2062_v24 = vadd.f32 %v5461_v17, %v2041_v27  ;;  %v6194_v27 = vld [vmem:[%s6790_s8 + $0x138] sm:$0xff] }
 0x4ac   :  { %v4137_v37 = vpop.f32.mrf.mxu0  ;;  %v1972_v39 = vpop.f32.mrf.mxu1 }
 0x4ad   :  { %v3586_v52 = vmul.f32 -1.442695, %v2045_v32  ;;  %v2055_v40 = vadd.f32 %v2053_v58, %v1972_v39 }
 0x4af   :  { %4457 = vpow2.f32 %v3586_v52  ;;  %v3587_v23 = vmul.f32 -1.442695, %v2055_v40  ;;  %v6199_v40 = vld [vmem:[%s6790_s8 + $0x148] sm:$0xff] }
 0x4b1   :  { %4459 = vpow2.f32 %v3587_v23  ;;  %v6206_v23 = vld [vmem:[%s6790_s8 + $0x128] sm:$0xff] }
 0x4bc   :  { %v4458_v51 = vpop.eup %4457 }
 0x4bd   :  { %v2049_v1 = vadd.f32 1.0, %v4458_v51  ;;  %v6213_v51 = vld [vmem:[%s6790_s8 + $0x120] sm:$0xff] }
 0x4be   :  { %v4460_v38 = vpop.eup %4459 }
 0x4bf   :  { %4461 = vrcp.f32 %v2049_v1  ;;  %v2059_v57 = vadd.f32 1.0, %v4460_v38  ;;  %v6180_v38 = vld [vmem:[%s6790_s8 + $0x160] sm:$0xff] }
 0x4c0   :  { %v6187_v1 = vld [vmem:[%s6790_s8 + $0x140] sm:$0xff] }
 0x4c1   :  { %4463 = vrcp.f32 %v2059_v57  ;;  %v6175_v57 = vld [vmem:[%s6790_s8 + $0x150] sm:$0xff] }
 0x4cc   :  { %v4462_v56 = vpop.eup %4461 }
 0x4cd   :  { %v2063_v12 = vmul.f32 %v4462_v56, %v2062_v24  ;;  %v6168_v56 = vld [vmem:[%s6790_s8 + $0x158] sm:$0xff]  ;;  %v6218_v24 = vld [vmem:[%s6790_s8 + $0x130] sm:$0xff] }
 0x4ce   :  { %v4464_v32 = vpop.eup %4463 }
 0x4cf   :  { %v2064_v25 = vadd.f32 %v2063_v12, %v1855_v49  ;;  %v2066_v37 = vsub.f32 1.0, %v4464_v32  ;;  %v2068_v39 = vmul.f32 %v4464_v32, %v5963_v54  ;;  %v6150_v54 = vld [vmem:[%s6790_s8 + $0x170] sm:$0xff]  ;;  %v6232_v32 = vld [vmem:[%s6790_s8 + $0x108] sm:$0xff] }
 0x4d1   :  { %4465 = vtanh.f32 %v2064_v25  ;;  %v6225_v25 = vld [vmem:[%s6790_s8 + $0x110] sm:$0xff] }
 0x4de   :  { %v4466_v52 = vpop.eup %4465 }
 0x4df   :  { %v2067_v53 = vmul.f32 %v4466_v52, %v2066_v37  ;;  %v6237_v37 = vld [vmem:[%s6790_s8 + $0x118] sm:$0xff] }
 0x4e0   :  { %v6244_v52 = vld [vmem:[%s6790_s8 + $0xf8] sm:$0xff] }
 0x4e1   :  { %v6045_v58 = vadd.f32 %v2068_v39, %v2067_v53  ;;  %v6251_v53 = vld [vmem:[%s6790_s8 + $0xf0] sm:$0xff]  ;;  %v6256_v39 = vld [vmem:[%s6790_s8 + $0x100] sm:$0xff] }
 0x4e3   :  { %2071 = vst [vmem:[#allocation3 + $0xc] sm:$0xf] %v6045_v58  ;;  %2188 = vmatmul.mubr.f32.vlgmr.msra.gmra.mxu1 %v6045_v58  ;;  %4171 = vmatmul.mubr.f32.vlgmr.msra.gmra.mxu0 %v6045_v58 }
 0x4e4   :  { %2343 = vmatpush1.msra.mxu1 %v5539_v2  ;;  %4174 = vmatpush3.msra.mxu0 %v5544_v4 }
 0x4e5   :  { %2344 = vmatprep.subr.mxu1 %v5551_v6  ;;  %4175 = vmatprep.subr.mxu0 %v6857_v60 }
 0x4e6   :  { %2345 = vmatpush1.msra.mxu1 %v5558_v9  ;;  %4176 = vmatpush3.msra.mxu0 %v5563_v10 }
 0x4e7   :  { %2346 = vmatprep.subr.mxu1 %v5572_v18  ;;  %4177 = vmatprep.subr.mxu0 %v6857_v60 }
 0x4e8   :  { %2347 = vmatpush1.msra.mxu1 %v5579_v20  ;;  %4178 = vmatpush3.msra.mxu0 %v5584_v22 }
 0x4e9   :  { %2348 = vmatprep.subr.mxu1 %v5591_v26  ;;  %4179 = vmatprep.subr.mxu0 %v6857_v60 }
 0x4ea   :  { %2349 = vmatpush1.msra.mxu1 %v5598_v28  ;;  %4180 = vmatpush3.msra.mxu0 %v5603_v30  ;;  %v3223_v12 = vld [vmem:[#allocation3 + $0xe] sm:$0x1]  ;;  %v3355_v49 = vld [vmem:[#allocation3 + $0xf] sm:$0x1] }
 0x4eb   :  { %2350 = vmatprep.subr.mxu1 %v5612_v21  ;;  %4181 = vmatprep.subr.mxu0 %v6857_v60  ;;  %v3257_v17 = vrot.slane %v3223_v12, 5  ;;  %v3389_v2 = vrot.slane %v3355_v49, 5  ;;  %v6270_v12 = vld [vmem:[%s6790_s8 + $0xd8] sm:$0xff]  ;;  %v6282_v49 = vld [vmem:[%s6790_s8 + $0xc8] sm:$0xff] }
 0x4ec   :  { %2351 = vmatpush1.msra.mxu1 %v5619_v31  ;;  %4182 = vmatpush3.msra.mxu0 %v5624_v33 }
 0x4ed   :  { %2352 = vmatprep.subr.mxu1 %v5631_v34  ;;  %4183 = vmatprep.subr.mxu0 %v6857_v60  ;;  %v6072_v4 = vsel %vm2989_vm6, %v3257_v17, %v5990_v29  ;;  %v6078_v6 = vsel %vm2989_vm6, %v3389_v2, %v5996_v55  ;;  %v6156_v29 = vld [vmem:[%s6790_s8 + $0x168] sm:$0xff]  ;;  %v6161_v55 = vld [vmem:[%s6790_s8 + $0x178] sm:$0xff]  ;;  %v6289_v2 = vld [vmem:[%s6790_s8 + $0xc0] sm:$0xff] }
 0x4ee   :  { %2353 = vmatpush1.msra.mxu1 %v5638_v35  ;;  %4184 = vmatpush3.msra.mxu0 %v5643_v36  ;;  %v6275_v17 = vld [vmem:[%s6790_s8 + $0xe8] sm:$0xff] }
 0x4ef   :  { %2354 = vmatprep.subr.mxu1 %v5652_v14  ;;  %4185 = vmatprep.subr.mxu0 %v6857_v60  ;;  %v6896_v14 = vld [vmem:[#allocation54_spill] sm:$0xff] }
 0x4f0   :  { %2355 = vmatpush1.msra.mxu1 %v5659_v59  ;;  %4186 = vmatpush3.msra.mxu0 %v5664_v62  ;;  %v6127_v62 = vld [vmem:[%s6791_s9] ss:$0 sm:$0xff] }
 0x4f1   :  { %2356 = vmatprep.subr.mxu1 %v5671_v61  ;;  %4187 = vmatprep.subr.mxu0 %v6857_v60 }
 0x4f2   :  { %2357 = vmatpush1.msra.mxu1 %v5678_v15  ;;  %4188 = vmatpush3.msra.mxu0 %v5683_v0  ;;  %v2074_v15 = vld [vmem:[#allocation2 + $0x38] sm:$0xf] }
 0x4f3   :  { %2358 = vmatprep.subr.mxu1 %v5688_v13  ;;  %4189 = vmatprep.subr.mxu0 %v6857_v60  ;;  %v6899_v13 = vld [vmem:[#allocation58_spill] sm:$0xff] }
 0x4f4   :  { %2359 = vmatpush1.msra.mxu1 %v5697_v45  ;;  %4190 = vmatpush3.msra.mxu0 %v5702_v44  ;;  %v6897_v44 = vld [vmem:[#allocation55_spill] sm:$0xff]  ;;  %v6898_v45 = vld [vmem:[#allocation56_spill] sm:$0xff] }
 0x4f5   :  { %2360 = vmatprep.subr.mxu1 %v5707_v42  ;;  %4191 = vmatprep.subr.mxu0 %v6857_v60 }
 0x4f6   :  { %2361 = vmatpush1.msra.mxu1 %v5714_v19  ;;  %4192 = vmatpush3.msra.mxu0 %v5719_v3  ;;  %v6901_v3 = vld [vmem:[#allocation60_spill] sm:$0xff] }
 0x4f7   :  { %2362 = vmatprep.subr.mxu1 %v5726_v41  ;;  %4193 = vmatprep.subr.mxu0 %v6857_v60 }
 0x4f8   :  { %2363 = vmatpush1.msra.mxu1 %v5733_v63  ;;  %4194 = vmatpush3.msra.mxu0 %v5738_v46  ;;  %v6900_v63 = vld [vmem:[#allocation59_spill] sm:$0xff] }
 0x4f9   :  { %2364 = vmatprep.subr.mxu1 %v5747_v43  ;;  %4195 = vmatprep.subr.mxu0 %v6857_v60 }
 0x4fa   :  { %2365 = vmatpush1.msra.mxu1 %v5754_v5  ;;  %4196 = vmatpush3.msra.mxu0 %v5759_v7  ;;  %v2073_v5 = vld [vmem:[#allocation2 + $0x30] sm:$0xff] }
 0x4fb   :  { %2366 = vmatprep.subr.mxu1 %v5766_v48  ;;  %4197 = vmatprep.subr.mxu0 %v6857_v60  ;;  %v2272_v43 = vrot.slane %v2073_v5, 4 }
 0x4fc   :  { %2367 = vmatpush1.msra.mxu1 %v5773_v11  ;;  %4198 = vmatpush3.msra.mxu0 %v5778_v47 }
 0x4fd   :  { %2368 = vmatprep.subr.mxu1 %v5787_v50  ;;  %4199 = vmatprep.subr.mxu0 %v6857_v60 }
 0x4fe   :  { %2369 = vmatpush1.msra.mxu1 %v5794_v16  ;;  %4200 = vmatpush3.msra.mxu0 %v5799_v8 }
 0x4ff   :  { %2370 = vmatprep.subr.mxu1 %v6896_v14  ;;  %4201 = vmatprep.subr.mxu0 %v6857_v60  ;;  %v6306_v14 = vld [vmem:[%s6790_s8 + $0xa8] sm:$0xff] }
 0x500   :  { %2371 = vmatpush1.msra.mxu1 %v6897_v44  ;;  %4202 = vmatpush3.msra.mxu0 %v6898_v45  ;;  %v6311_v44 = vld [vmem:[%s6790_s8 + $0xb8] sm:$0xff] }
 0x501   :  { %2372 = vmatprep.subr.mxu1 %v6899_v13  ;;  %4203 = vmatprep.subr.mxu0 %v6857_v60  ;;  %v6316_v45 = vld [vmem:[%s6790_s8 + $0x98] sm:$0xff]  ;;  %v6323_v13 = vld [vmem:[%s6790_s8 + $0x90] sm:$0xff] }
 0x502   :  { %2373 = vmatpush1.msra.mxu1 %v6900_v63  ;;  %2406 = vmatprep.mubr.f32.mxu1 %v6857_v60  ;;  %v6328_v63 = vld [vmem:[%s6790_s8 + $0xa0] sm:$0xff] }
 0x503   :  { %4204 = vmatpush3.msra.mxu0 %v6901_v3  ;;  %4205 = vmatprep.mubr.msk.f32.mxu0 %vm4675_vm3, %v6857_v60  ;;  %v6335_v3 = vld [vmem:[%s6790_s8 + $0x80] sm:$0xff] }
 0x504   :  { %4208 = vmatprep.subr.mxu0 %v6857_v60  ;;  %2561 = vmatprep.subr.mxu1 %v6150_v54 }
 0x5a3   :  { %v2189_v7 = vpop.f32.mrf.mxu1  ;;  %v2260_v8 = vpop.f32.mrf.mxu0 }
 0x5a4   :  { %v2264_v11 = vadd.f32 %v2189_v7, %v2073_v5  ;;  %v2281_v0 = vadd.f32 %v6127_v62, %v2260_v8  ;;  %v6342_v5 = vld [vmem:[%s6790_s8 + $0x78] sm:$0xff]  ;;  %v6347_v7 = vld [vmem:[%s6790_s8 + $0x88] sm:$0xff] }
 0x5a5   :  { %v4172_v16 = vpop.f32.mrf.mxu0  ;;  %v2191_v42 = vpop.f32.mrf.mxu1  ;;  %v6354_v8 = vld [vmem:[%s6790_s8 + $0x68] sm:$0xff] }
 0x5a6   :  { %v3588_v41 = vmul.f32 -1.442695, %v2264_v11  ;;  %v2274_v46 = vadd.f32 %v2272_v43, %v2191_v42  ;;  %v6361_v11 = vld [vmem:[%s6790_s8 + $0x60] sm:$0xff]  ;;  %v6366_v16 = vld [vmem:[%s6790_s8 + $0x70] sm:$0xff]  ;;  %v6380_v42 = vld [vmem:[%s6790_s8 + $0x48] sm:$0xff] }
 0x5a7   :  { %v6385_v43 = vld [vmem:[%s6790_s8 + $0x58] sm:$0xff] }
 0x5a8   :  { %4467 = vpow2.f32 %v3588_v41  ;;  %v3589_v47 = vmul.f32 -1.442695, %v2274_v46  ;;  %v6373_v41 = vld [vmem:[%s6790_s8 + $0x50] sm:$0xff]  ;;  %v6392_v46 = vld [vmem:[%s6790_s8 + $0x38] sm:$0xff] }
 0x5aa   :  { %4469 = vpow2.f32 %v3589_v47  ;;  %v6399_v47 = vld [vmem:[%s6790_s8 + $0x30] sm:$0xff] }
 0x5b5   :  { %v4468_v48 = vpop.eup %4467 }
 0x5b6   :  { %v2268_v50 = vadd.f32 1.0, %v4468_v48  ;;  %v6404_v48 = vld [vmem:[%s6790_s8 + $0x40] sm:$0xff] }
 0x5b7   :  { %v4470_v59 = vpop.eup %4469 }
 0x5b8   :  { %4471 = vrcp.f32 %v2268_v50  ;;  %v2278_v61 = vadd.f32 1.0, %v4470_v59  ;;  %v6411_v50 = vld [vmem:[%s6790_s8 + $0x20] sm:$0xff]  ;;  %v6418_v59 = vld [vmem:[%s6790_s8 + $0x18] sm:$0xff] }
 0x5b9   :  { %6902 = vst [vmem:[#allocation47_spill] sm:$0xff] %v6411_v50  ;;  %6903 = vst [vmem:[#allocation54_spill] sm:$0xff] %v6418_v59 }
 0x5ba   :  { %4473 = vrcp.f32 %v2278_v61  ;;  %v6423_v61 = vld [vmem:[%s6790_s8 + $0x28] sm:$0xff] }
 0x5bb   :  { %6904 = vst [vmem:[#allocation55_spill] sm:$0xff] %v6423_v61 }
 0x5c5   :  { %v4472_v9 = vpop.eup %4471 }
 0x5c6   :  { %v2282_v10 = vmul.f32 %v4472_v9, %v2281_v0  ;;  %v6430_v0 = vld [vmem:[%s6790_s8 + $0x8] sm:$0xff]  ;;  %v6437_v9 = vld [vmem:[%s6790_s8] sm:$0xff] }
 0x5c7   :  { %v4474_v20 = vpop.eup %4473  ;;  %6905 = vst [vmem:[#allocation56_spill] sm:$0xff] %v6430_v0  ;;  %6906 = vst [vmem:[#allocation58_spill] sm:$0xff] %v6437_v9 }
 0x5c8   :  { %v2283_v18 = vadd.f32 %v2282_v10, %v2074_v15  ;;  %v2285_v22 = vsub.f32 1.0, %v4474_v20  ;;  %v2287_v30 = vmul.f32 %v4474_v20, %v6045_v58  ;;  %v6263_v58 = vld [vmem:[%s6790_s8 + $0xe0] sm:$0xff]  ;;  %v6442_v10 = vld [vmem:[%s6790_s8 + $0x10] sm:$0xff] }
 0x5c9   :  { %6907 = vst [vmem:[#allocation59_spill] sm:$0xff] %v6442_v10  ;;  %v2292_v15 = vld [vmem:[#allocation2 + $0x3c] sm:$0xff] }
 0x5ca   :  { %4475 = vtanh.f32 %v2283_v18 }
 0x5d7   :  { %v4476_v26 = vpop.eup %4475 }
 0x5d8   :  { %v2286_v28 = vmul.f32 %v4476_v26, %v2285_v22 }
 0x5da   :  { %v6131_v19 = vadd.f32 %v2287_v30, %v2286_v28 }
 0x5dc   :  { %2290 = vst [vmem:[#allocation3 + $0x10] sm:$0xf] %v6131_v19  ;;  %2407 = vmatmul.mubr.f32.vlgmr.msra.gmra.mxu1 %v6131_v19  ;;  %4206 = vmatmul.mubr.f32.vlgmr.msra.gmra.mxu0 %v6131_v19 }
 0x5dd   :  { %2625 = vmatprep.mubr.f32.mxu1 %v6857_v60  ;;  %4240 = vmatprep.mubr.msk.f32.mxu0 %vm4675_vm3, %v6857_v60 }
 0x5de   :  { %2562 = vmatpush1.msra.mxu1 %v6156_v29  ;;  %4209 = vmatpush3.msra.mxu0 %v6161_v55 }
 0x5df   :  { %2563 = vmatprep.subr.mxu1 %v6168_v56  ;;  %4210 = vmatprep.subr.mxu0 %v6857_v60 }
 0x5e0   :  { %2564 = vmatpush1.msra.mxu1 %v6175_v57  ;;  %4211 = vmatpush3.msra.mxu0 %v6180_v38 }
 0x5e1   :  { %2565 = vmatprep.subr.mxu1 %v6187_v1  ;;  %4212 = vmatprep.subr.mxu0 %v6857_v60 }
 0x5e2   :  { %2566 = vmatpush1.msra.mxu1 %v6194_v27  ;;  %4213 = vmatpush3.msra.mxu0 %v6199_v40 }
 0x5e3   :  { %v3224_v21 = vld [vmem:[#allocation3 + $0x12] sm:$0x1]  ;;  %v3356_v33 = vld [vmem:[#allocation3 + $0x13] sm:$0x1]  ;;  %2567 = vmatprep.subr.mxu1 %v6206_v23  ;;  %4214 = vmatprep.subr.mxu0 %v6857_v60 }
 0x5e4   :  { %v3259_v31 = vrot.slane %v3224_v21, 4  ;;  %v3391_v34 = vrot.slane %v3356_v33, 4  ;;  %2568 = vmatpush1.msra.mxu1 %v6213_v51  ;;  %4215 = vmatpush3.msra.mxu0 %v6218_v24  ;;  %v2491_v21 = vrot.slane %v2292_v15, 4 }
 0x5e5   :  { %2569 = vmatprep.subr.mxu1 %v6225_v25  ;;  %4216 = vmatprep.subr.mxu0 %v6857_v60 }
 0x5e6   :  { %v6141_v35 = vsel %vm2992_vm7, %v3259_v31, %v6072_v4  ;;  %v6145_v36 = vsel %vm2992_vm7, %v3391_v34, %v6078_v6  ;;  %2570 = vmatpush1.msra.mxu1 %v6232_v32  ;;  %4217 = vmatpush3.msra.mxu0 %v6237_v37  ;;  %v6294_v4 = vld [vmem:[%s6790_s8 + $0xd0] sm:$0xff] }
 0x5e7   :  { %2571 = vmatprep.subr.mxu1 %v6244_v52  ;;  %4218 = vmatprep.subr.mxu0 %v6857_v60  ;;  %v6299_v6 = vld [vmem:[%s6790_s8 + $0xb0] sm:$0xff] }
 0x5e8   :  { %2572 = vmatpush1.msra.mxu1 %v6251_v53  ;;  %4219 = vmatpush3.msra.mxu0 %v6256_v39 }
 0x5e9   :  { %2573 = vmatprep.subr.mxu1 %v6263_v58  ;;  %4220 = vmatprep.subr.mxu0 %v6857_v60 }
 0x5ea   :  { %2574 = vmatpush1.msra.mxu1 %v6270_v12  ;;  %4221 = vmatpush3.msra.mxu0 %v6275_v17 }
 0x5eb   :  { %2575 = vmatprep.subr.mxu1 %v6282_v49  ;;  %4222 = vmatprep.subr.mxu0 %v6857_v60 }
 0x5ec   :  { %2576 = vmatpush1.msra.mxu1 %v6289_v2  ;;  %4223 = vmatpush3.msra.mxu0 %v6294_v4 }
 0x5ed   :  { %2577 = vmatprep.subr.mxu1 %v6299_v6  ;;  %4224 = vmatprep.subr.mxu0 %v6857_v60 }
 0x5ee   :  { %2578 = vmatpush1.msra.mxu1 %v6306_v14  ;;  %4225 = vmatpush3.msra.mxu0 %v6311_v44 }
 0x5ef   :  { %2579 = vmatprep.subr.mxu1 %v6316_v45  ;;  %4226 = vmatprep.subr.mxu0 %v6857_v60 }
 0x5f0   :  { %2580 = vmatpush1.msra.mxu1 %v6323_v13  ;;  %4227 = vmatpush3.msra.mxu0 %v6328_v63 }
 0x5f1   :  { %2581 = vmatprep.subr.mxu1 %v6335_v3  ;;  %4228 = vmatprep.subr.mxu0 %v6857_v60 }
 0x5f2   :  { %2582 = vmatpush1.msra.mxu1 %v6342_v5  ;;  %4229 = vmatpush3.msra.mxu0 %v6347_v7 }
 0x5f3   :  { %2583 = vmatprep.subr.mxu1 %v6354_v8  ;;  %4230 = vmatprep.subr.mxu0 %v6857_v60 }
 0x5f4   :  { %2584 = vmatpush1.msra.mxu1 %v6361_v11  ;;  %4231 = vmatpush3.msra.mxu0 %v6366_v16 }
 0x5f5   :  { %2585 = vmatprep.subr.mxu1 %v6373_v41  ;;  %4232 = vmatprep.subr.mxu0 %v6857_v60 }
 0x5f6   :  { %2586 = vmatpush1.msra.mxu1 %v6380_v42  ;;  %4233 = vmatpush3.msra.mxu0 %v6385_v43 }
 0x5f7   :  { %2587 = vmatprep.subr.mxu1 %v6392_v46  ;;  %4234 = vmatprep.subr.mxu0 %v6857_v60 }
 0x5f8   :  { %2588 = vmatpush1.msra.mxu1 %v6399_v47  ;;  %4235 = vmatpush3.msra.mxu0 %v6404_v48 }
 0x5f9   :  { %2589 = vmatprep.subr.mxu1 %v6411_v50  ;;  %4236 = vmatprep.subr.mxu0 %v6857_v60  ;;  %v2293_v50 = vld [vmem:[#allocation2 + $0x44] sm:$0xf] }
 0x5fa   :  { %2590 = vmatpush1.msra.mxu1 %v6418_v59  ;;  %4237 = vmatpush3.msra.mxu0 %v6423_v61 }
 0x5fb   :  { %2591 = vmatprep.subr.mxu1 %v6430_v0  ;;  %4238 = vmatprep.subr.mxu0 %v6857_v60 }
 0x5fc   :  { %2592 = vmatpush1.msra.mxu1 %v6437_v9  ;;  %4239 = vmatpush3.msra.mxu0 %v6442_v10 }
 0x5fd   :  { %2780 = vmatprep.subr.mxu1 %v6150_v54  ;;  %4243 = vmatprep.subr.mxu0 %v6857_v60 }
 0x69c   :  { %v2408_v18 = vpop.f32.mrf.mxu1  ;;  %v2479_v20 = vpop.f32.mrf.mxu0 }
 0x69d   :  { %v2483_v22 = vadd.f32 %v2408_v18, %v2292_v15  ;;  %v2500_v54 = vadd.f32 %v6127_v62, %v2479_v20 }
 0x69e   :  { %v4207_v26 = vpop.f32.mrf.mxu0  ;;  %v2410_v30 = vpop.f32.mrf.mxu1 }
 0x69f   :  { %v3590_v28 = vmul.f32 -1.442695, %v2483_v22  ;;  %v2493_v31 = vadd.f32 %v2491_v21, %v2410_v30 }
 0x6a1   :  { %4477 = vpow2.f32 %v3590_v28  ;;  %v3591_v33 = vmul.f32 -1.442695, %v2493_v31 }
 0x6a3   :  { %4479 = vpow2.f32 %v3591_v33 }
 0x6ae   :  { %v4478_v34 = vpop.eup %4477 }
 0x6af   :  { %v2487_v9 = vadd.f32 1.0, %v4478_v34  ;;  %v6922_v34 = vld [vmem:[#allocation20_spill] sm:$0xff] }
 0x6b0   :  { %v4480_v10 = vpop.eup %4479 }
 0x6b1   :  { %4481 = vrcp.f32 %v2487_v9  ;;  %v2497_v0 = vadd.f32 1.0, %v4480_v10  ;;  %v6921_v10 = vld [vmem:[#allocation39_spill] sm:$0xff] }
 0x6b3   :  { %4483 = vrcp.f32 %v2497_v0 }
 0x6be   :  { %v4482_v61 = vpop.eup %4481 }
 0x6bf   :  { %v2501_v59 = vmul.f32 %v4482_v61, %v2500_v54 }
 0x6c0   :  { %v4484_v22 = vpop.eup %4483 }
 0x6c1   :  { %v2502_v18 = vadd.f32 %v2501_v59, %v2293_v50  ;;  %v2504_v26 = vsub.f32 1.0, %v4484_v22  ;;  %v2506_v30 = vmul.f32 %v4484_v22, %v6131_v19  ;;  %v6920_v59 = vld [vmem:[#allocation23_spill] sm:$0xff] }
 0x6c3   :  { %4485 = vtanh.f32 %v2502_v18 }
 0x6d0   :  { %v4486_v28 = vpop.eup %4485 }
 0x6d1   :  { %v2505_v15 = vmul.f32 %v4486_v28, %v2504_v26  ;;  %v6923_v26 = vld [vmem:[#allocation36_spill] sm:$0xff] }
 0x6d3   :  { %v6454_v21 = vadd.f32 %v2506_v30, %v2505_v15  ;;  %v6924_v30 = vld [vmem:[#allocation21_spill] sm:$0xff] }
 0x6d5   :  { %2509 = vst [vmem:[#allocation3 + $0x14] sm:$0xf] %v6454_v21  ;;  %2626 = vmatmul.mubr.f32.vlgmr.msra.gmra.mxu1 %v6454_v21  ;;  %4241 = vmatmul.mubr.f32.vlgmr.msra.gmra.mxu0 %v6454_v21 }
 0x6d6   :  { %2781 = vmatpush1.msra.mxu1 %v6156_v29  ;;  %4244 = vmatpush3.msra.mxu0 %v6161_v55 }
 0x6d7   :  { %2782 = vmatprep.subr.mxu1 %v6168_v56  ;;  %4245 = vmatprep.subr.mxu0 %v6857_v60 }
 0x6d8   :  { %2783 = vmatpush1.msra.mxu1 %v6175_v57  ;;  %4246 = vmatpush3.msra.mxu0 %v6180_v38 }
 0x6d9   :  { %2784 = vmatprep.subr.mxu1 %v6187_v1  ;;  %4247 = vmatprep.subr.mxu0 %v6857_v60  ;;  %v6910_v1 = vld [vmem:[#allocation55_spill] sm:$0xff] }
 0x6da   :  { %2785 = vmatpush1.msra.mxu1 %v6194_v27  ;;  %4248 = vmatpush3.msra.mxu0 %v6199_v40  ;;  %v6911_v27 = vld [vmem:[#allocation56_spill] sm:$0xff]  ;;  %v6912_v40 = vld [vmem:[#allocation58_spill] sm:$0xff] }
 0x6db   :  { %2786 = vmatprep.subr.mxu1 %v6206_v23  ;;  %4249 = vmatprep.subr.mxu0 %v6857_v60  ;;  %v6913_v23 = vld [vmem:[#allocation59_spill] sm:$0xff] }
 0x6dc   :  { %2787 = vmatpush1.msra.mxu1 %v6213_v51  ;;  %4250 = vmatpush3.msra.mxu0 %v6218_v24  ;;  %v3225_v19 = vld [vmem:[#allocation3 + $0x16] sm:$0x1]  ;;  %v3357_v55 = vld [vmem:[#allocation3 + $0x17] sm:$0x1]  ;;  %v2511_v51 = vld [vmem:[#allocation2 + $0x48] sm:$0xff] }
 0x6dd   :  { %2788 = vmatprep.subr.mxu1 %v6225_v25  ;;  %4251 = vmatprep.subr.mxu0 %v6857_v60  ;;  %v3261_v29 = vrot.slane %v3225_v19, 3  ;;  %v3393_v56 = vrot.slane %v3357_v55, 3 }
 0x6de   :  { %2789 = vmatpush1.msra.mxu1 %v6232_v32  ;;  %4252 = vmatpush3.msra.mxu0 %v6237_v37 }
 0x6df   :  { %2790 = vmatprep.subr.mxu1 %v6244_v52  ;;  %4253 = vmatprep.subr.mxu0 %v6857_v60  ;;  %v6481_v57 = vsel %vm2995_vm8, %v3261_v29, %v6141_v35  ;;  %v6487_v38 = vsel %vm2995_vm8, %v3393_v56, %v6145_v36  ;;  %v6908_v35 = vld [vmem:[#allocation47_spill] sm:$0xff]  ;;  %v6909_v36 = vld [vmem:[#allocation54_spill] sm:$0xff]  ;;  %v6925_v29 = vld [vmem:[#allocation37_spill] sm:$0xff] }
 0x6e0   :  { %2791 = vmatpush1.msra.mxu1 %v6251_v53  ;;  %4254 = vmatpush3.msra.mxu0 %v6256_v39  ;;  %v2710_v39 = vrot.slane %v2511_v51, 4 }
 0x6e1   :  { %2792 = vmatprep.subr.mxu1 %v6263_v58  ;;  %4255 = vmatprep.subr.mxu0 %v6857_v60 }
 0x6e2   :  { %2793 = vmatpush1.msra.mxu1 %v6270_v12  ;;  %4256 = vmatpush3.msra.mxu0 %v6275_v17 }
 0x6e3   :  { %2794 = vmatprep.subr.mxu1 %v6282_v49  ;;  %4257 = vmatprep.subr.mxu0 %v6857_v60 }
 0x6e4   :  { %2795 = vmatpush1.msra.mxu1 %v6289_v2  ;;  %4258 = vmatpush3.msra.mxu0 %v6294_v4 }
 0x6e5   :  { %2796 = vmatprep.subr.mxu1 %v6299_v6  ;;  %4259 = vmatprep.subr.mxu0 %v6857_v60 }
 0x6e6   :  { %2797 = vmatpush1.msra.mxu1 %v6306_v14  ;;  %4260 = vmatpush3.msra.mxu0 %v6311_v44 }
 0x6e7   :  { %2798 = vmatprep.subr.mxu1 %v6316_v45  ;;  %4261 = vmatprep.subr.mxu0 %v6857_v60  ;;  %v2512_v45 = vld [vmem:[#allocation2 + $0x50] sm:$0xf] }
 0x6e8   :  { %2799 = vmatpush1.msra.mxu1 %v6323_v13  ;;  %4262 = vmatpush3.msra.mxu0 %v6328_v63  ;;  %v6538_v63 = vld [vmem:[%s6785_s3] ss:$0 sm:$0xff]  ;;  %s4676_s3 = smov [#allocation5]  }
 0x6e9   :  { %2800 = vmatprep.subr.mxu1 %v6335_v3  ;;  %4263 = vmatprep.subr.mxu0 %v6857_v60  ;;  %v6914_v3 = vld [vmem:[#allocation24_spill] sm:$0xff]  ;;  %v429_v61 = vadd.f32 %v6538_v63, %v6920_v59  ;;  %v509_v20 = vadd.f32 %v6538_v63, %v6921_v10  ;;  %v424_v54 = vadd.f32 %v6922_v34, %v6538_v63  ;;  %v6940_v34 = vld [vmem:[#allocation13_spill] sm:$0xff]  ;;  %s3489_s26 = sshll.u32 %s4676_s3, 4  ;;  %s3490_s26 = int_to_ptr.vmem [resolvable:$true] %s3489_s26 }
 0x6ea   :  { %2801 = vmatpush1.msra.mxu1 %v6342_v5  ;;  %4264 = vmatpush3.msra.mxu0 %v6347_v7  ;;  %v444_v5 = vadd.f32 %v6914_v3, %v6538_v63  ;;  %v6915_v7 = vld [vmem:[#allocation40_spill] sm:$0xff]  ;;  %v504_v28 = vadd.f32 %v6923_v26, %v6538_v63  ;;  %v499_v55 = vadd.f32 %v6538_v63, %v6925_v29  ;;  %v6933_v3 = vld [vmem:[#allocation33_spill] sm:$0xff]  ;;  %v6943_v29 = vld [vmem:[#allocation26_spill] sm:$0xff]  ;;  %s4652_s27 = scalar_lea.vmem %s3490_s26, 512  ;;  %p4657_p1 = scmp.lt.s32.totalorder %s3490_s26, %s3490_s26 }
 0x6eb   :  { %2802 = vmatprep.subr.mxu1 %v6354_v8  ;;  %4265 = vmatprep.subr.mxu0 %v6857_v60  ;;  %v524_v8 = vadd.f32 %v6915_v7, %v6538_v63  ;;  %v6941_v26 = vld [vmem:[#allocation29_spill] sm:$0xff]  ;;  %p4653_p0 = scmp.ne.s32.totalorder %s3490_s26, %s4652_s27  ;;  %p4658_p2 = scmp.lt.s32.totalorder %s4652_s27, %s4652_s27 }
 0x6ec   :  { %2803 = vmatpush1.msra.mxu1 %v6361_v11  ;;  %4266 = vmatpush3.msra.mxu0 %v6366_v16  ;;  %v6916_v11 = vld [vmem:[#allocation25_spill] sm:$0xff] }
 0x6ed   :  { %2804 = vmatprep.subr.mxu1 %v6373_v41  ;;  %4267 = vmatprep.subr.mxu0 %v6857_v60  ;;  %v439_v16 = vadd.f32 %v6538_v63, %v6916_v11  ;;  %v6917_v41 = vld [vmem:[#allocation41_spill] sm:$0xff]  ;;  %p4659_p3 = por %p4658_p2, %p4657_p1 }
 0x6ee   :  { %2805 = vmatpush1.msra.mxu1 %v6380_v42  ;;  %4268 = vmatpush3.msra.mxu0 %v6385_v43  ;;  %v519_v42 = vadd.f32 %v6538_v63, %v6917_v41  ;;  %v6918_v43 = vld [vmem:[#allocation22_spill] sm:$0xff] }
 0x6ef   :  { %2806 = vmatprep.subr.mxu1 %v6392_v46  ;;  %4269 = vmatprep.subr.mxu0 %v6857_v60  ;;  %v434_v46 = vadd.f32 %v6918_v43, %v6538_v63  ;;  %v6935_v41 = vld [vmem:[#allocation30_spill] sm:$0xff]  ;;  %p4660_p4 = pnand %p4659_p3, %p4653_p0 }
 0x6f0   :  { %2807 = vmatpush1.msra.mxu1 %v6399_v47  ;;  %4270 = vmatpush3.msra.mxu0 %v6404_v48  ;;  %v6919_v48 = vld [vmem:[#allocation38_spill] sm:$0xff] }
 0x6f1   :  { %2808 = vmatprep.subr.mxu1 %v6908_v35  ;;  %4271 = vmatprep.subr.mxu0 %v6857_v60  ;;  %v514_v50 = vadd.f32 %v6919_v48, %v6538_v63  ;;  %v6926_v35 = vld [vmem:[#allocation18_spill] sm:$0xff] }
 0x6f2   :  { %2809 = vmatpush1.msra.mxu1 %v6909_v36  ;;  %4272 = vmatpush3.msra.mxu0 %v6910_v1  ;;  %v414_v36 = vadd.f32 %v6926_v35, %v6538_v63  ;;  %v6944_v35 = vld [vmem:[#allocation11_spill] sm:$0xff] }
 0x6f3   :  { %2810 = vmatprep.subr.mxu1 %v6911_v27  ;;  %4273 = vmatprep.subr.mxu0 %v6857_v60  ;;  %v6927_v27 = vld [vmem:[#allocation34_spill] sm:$0xff] }
 0x6f4   :  { %2811 = vmatpush1.msra.mxu1 %v6912_v40  ;;  %4274 = vmatpush3.msra.mxu0 %v6913_v23  ;;  %v494_v40 = vadd.f32 %v6927_v27, %v6538_v63  ;;  %v6945_v27 = vld [vmem:[#allocation27_spill] sm:$0xff] }
 0x6f5   :  { %2844 = vmatprep.mubr.f32.mxu1 %v6857_v60  ;;  %4275 = vmatprep.mubr.msk.f32.mxu0 %vm4675_vm3, %v6857_v60 }
 0x6f6   :  { %4278 = vmatprep.subr.mxu1 %v6857_v60  ;;  %4313 = vmatprep.subr.mxu0 %v6857_v60 }
 0x795   :  { %v2627_v24 = vpop.f32.mrf.mxu1  ;;  %v2698_v25 = vpop.f32.mrf.mxu0 }
 0x796   :  { %v2702_v32 = vadd.f32 %v2627_v24, %v2511_v51  ;;  %v2719_v6 = vadd.f32 %v6127_v62, %v2698_v25 }
 0x797   :  { %v4242_v37 = vpop.f32.mrf.mxu0  ;;  %v2629_v53 = vpop.f32.mrf.mxu1 }
 0x798   :  { %v3592_v52 = vmul.f32 -1.442695, %v2702_v32  ;;  %v2712_v58 = vadd.f32 %v2710_v39, %v2629_v53  ;;  %v6928_v37 = vld [vmem:[#allocation19_spill] sm:$0xff] }
 0x79a   :  { %4487 = vpow2.f32 %v3592_v52  ;;  %v3593_v12 = vmul.f32 -1.442695, %v2712_v58  ;;  %v409_v52 = vadd.f32 %v6538_v63, %v6928_v37  ;;  %v6929_v58 = vld [vmem:[#allocation35_spill] sm:$0xff] }
 0x79c   :  { %4489 = vpow2.f32 %v3593_v12  ;;  %v489_v12 = vadd.f32 %v6538_v63, %v6929_v58 }
 0x7a7   :  { %v4488_v17 = vpop.eup %4487 }
 0x7a8   :  { %v2706_v49 = vadd.f32 1.0, %v4488_v17 }
 0x7a9   :  { %v4490_v2 = vpop.eup %4489 }
 0x7aa   :  { %4491 = vrcp.f32 %v2706_v49  ;;  %v2716_v4 = vadd.f32 1.0, %v4490_v2  ;;  %v6930_v2 = vld [vmem:[#allocation16_spill] sm:$0xff] }
 0x7ac   :  { %4493 = vrcp.f32 %v2716_v4  ;;  %v404_v4 = vadd.f32 %v6930_v2, %v6538_v63 }
 0x7b7   :  { %v4492_v14 = vpop.eup %4491 }
 0x7b8   :  { %v2720_v44 = vmul.f32 %v4492_v14, %v2719_v6  ;;  %v6931_v6 = vld [vmem:[#allocation32_spill] sm:$0xff] }
 0x7b9   :  { %v4494_v47 = vpop.eup %4493  ;;  %v484_v14 = vadd.f32 %v6931_v6, %v6538_v63 }
 0x7ba   :  { %v2721_v13 = vadd.f32 %v2720_v44, %v2512_v45  ;;  %v2723_v0 = vsub.f32 1.0, %v4494_v47  ;;  %v2725_v33 = vmul.f32 %v4494_v47, %v6454_v21  ;;  %v419_v21 = vadd.f32 %v6538_v63, %v6924_v30  ;;  %v6942_v30 = vld [vmem:[#allocation10_spill] sm:$0xff] }
 0x7bc   :  { %4495 = vtanh.f32 %v2721_v13 }
 0x7bd   :  { %4497 = vtanh.f32 %v444_v5  ;;  %v479_v5 = vadd.f32 %v6538_v63, %v6933_v3 }
 0x7be   :  { %4499 = vtanh.f32 %v524_v8  ;;  %v6934_v8 = vld [vmem:[#allocation14_spill] sm:$0xff] }
 0x7bf   :  { %4501 = vtanh.f32 %v439_v16  ;;  %v394_v11 = vadd.f32 %v6934_v8, %v6538_v63 }
 0x7c0   :  { %4503 = vtanh.f32 %v519_v42  ;;  %v474_v42 = vadd.f32 %v6935_v41, %v6538_v63  ;;  %v2731_v41 = vld [vmem:[#allocation2 + $0x5c] sm:$0xf] }
 0x7c1   :  { %4505 = vtanh.f32 %v434_v46  ;;  %v6936_v46 = vld [vmem:[#allocation15_spill] sm:$0xff] }
 0x7c2   :  { %4507 = vtanh.f32 %v514_v50  ;;  %v389_v47 = vadd.f32 %v6538_v63, %v6936_v46  ;;  %v6937_v50 = vld [vmem:[#allocation31_spill] sm:$0xff]  ;;  %v6946_v46 = vld [vmem:[#allocation8_spill] sm:$0xff] }
 0x7c3   :  { %4509 = vtanh.f32 %v429_v61  ;;  %v469_v59 = vadd.f32 %v6538_v63, %v6937_v50 }
 0x7c4   :  { %4511 = vtanh.f32 %v509_v20  ;;  %v6939_v20 = vld [vmem:[#allocation28_spill] sm:$0xff] }
 0x7c5   :  { %4513 = vtanh.f32 %v424_v54  ;;  %v379_v54 = vadd.f32 %v6538_v63, %v6940_v34  ;;  %v2952_v34 = vld [vmem:[#allocation3 + $0x8] sm:$0x1] }
 0x7c6   :  { %4515 = vtanh.f32 %v504_v28  ;;  %v459_v28 = vadd.f32 %v6538_v63, %v6941_v26 }
 0x7c7   :  { %4517 = vtanh.f32 %v419_v21  ;;  %v374_v21 = vadd.f32 %v6942_v30, %v6538_v63  ;;  %v3090_v30 = vld [vmem:[#allocation3 + $0x9] sm:$0x1] }
 0x7c8   :  { %4519 = vtanh.f32 %v499_v55  ;;  %v454_v55 = vadd.f32 %v6943_v29, %v6538_v63  ;;  %v3091_v29 = vld [vmem:[#allocation3 + $0xd] sm:$0x1] }
 0x7c9   :  { %v4496_v9 = vpop.eup %4495  ;;  %4521 = vtanh.f32 %v414_v36  ;;  %v369_v36 = vadd.f32 %v6538_v63, %v6944_v35  ;;  %v2985_v35 = vrot.slane %v2952_v34, 6 }
 0x7ca   :  { %v2724_v31 = vmul.f32 %v4496_v9, %v2723_v0  ;;  %v4498_v22 = vpop.eup %4497  ;;  %4523 = vtanh.f32 %v494_v40  ;;  %v6938_v0 = vld [vmem:[#allocation12_spill] sm:$0xff]  ;;  %v449_v40 = vadd.f32 %v6538_v63, %v6945_v27 }
 0x7cb   :  { %v4500_v15 = vpop.eup %4499  ;;  %4525 = vtanh.f32 %v409_v52  ;;  %v384_v9 = vadd.f32 %v6938_v0, %v6538_v63  ;;  %v6948_v0 = vld [vmem:[#allocation9_spill] sm:$0xff]  ;;  %v2950_v27 = vld [vmem:[#allocation3] sm:$0x1] }
 0x7cc   :  { %v6559_v18 = vadd.f32 %v2725_v33, %v2724_v31  ;;  %v4502_v19 = vpop.eup %4501  ;;  %4527 = vtanh.f32 %v489_v12  ;;  %v464_v31 = vadd.f32 %v6939_v20, %v6538_v63  ;;  %v2730_v12 = vld [vmem:[#allocation2 + $0x54] sm:$0xff]  ;;  %v2951_v20 = vld [vmem:[#allocation3 + $0x4] sm:$0x1] }
 0x7cd   :  { %v4504_v56 = vpop.eup %4503  ;;  %4529 = vtanh.f32 %v404_v4 }
 0x7ce   :  { %2728 = vst [vmem:[#allocation3 + $0x18] sm:$0xf] %v6559_v18  ;;  %2845 = vmatmul.mubr.f32.vlgmr.msra.gmra.mxu1 %v6559_v18  ;;  %4276 = vmatmul.mubr.f32.vlgmr.msra.gmra.mxu0 %v6559_v18  ;;  %v4506_v1 = vpop.eup %4505  ;;  %4531 = vtanh.f32 %v484_v14 }
 0x7cf   :  { %4279 = vmatpush3.xpose.msra.mxu1 %v4498_v22  ;;  %4314 = vmatpush3.xpose.msra.mxu0 %v4500_v15  ;;  %v4508_v51 = vpop.eup %4507 }
 0x7d0   :  { %4280 = vmatprep.subr.mxu1 %v6857_v60  ;;  %4315 = vmatprep.subr.mxu0 %v6857_v60  ;;  %v4510_v39 = vpop.eup %4509 }
 0x7d1   :  { %4310 = vmatprep.mubr.msk.f32.mxu1 %vm4675_vm3, %v6857_v60  ;;  %4345 = vmatprep.mubr.msk.f32.mxu0 %vm4675_vm3, %v6857_v60  ;;  %v4512_v49 = vpop.eup %4511 }
 0x7d3   :  { %4281 = vmatpush3.xpose.msra.mxu1 %v4502_v19  ;;  %4316 = vmatpush3.xpose.msra.mxu0 %v4504_v56 }
 0x7d4   :  { %4282 = vmatprep.subr.mxu1 %v6857_v60  ;;  %4317 = vmatprep.subr.mxu0 %v6857_v60 }
 0x7d5   :  { %v3226_v23 = vld [vmem:[#allocation3 + $0x1a] sm:$0x1]  ;;  %v3358_v25 = vld [vmem:[#allocation3 + $0x1b] sm:$0x1] }
 0x7d6   :  { %v3263_v24 = vrot.slane %v3226_v23, 2  ;;  %v3395_v32 = vrot.slane %v3358_v25, 2 }
 0x7d7   :  { %4283 = vmatpush3.xpose.msra.mxu1 %v4506_v1  ;;  %4318 = vmatpush3.xpose.msra.mxu0 %v4508_v51 }
 0x7d8   :  { %4284 = vmatprep.subr.mxu1 %v6857_v60  ;;  %4319 = vmatprep.subr.mxu0 %v6857_v60  ;;  %v6588_v53 = vsel %vm2998_vm9, %v3263_v24, %v6481_v57  ;;  %v6594_v17 = vsel %vm2998_vm9, %v3395_v32, %v6487_v38  ;;  %v4514_v57 = vpop.eup %4513  ;;  %v6932_v38 = vld [vmem:[#allocation17_spill] sm:$0xff] }
 0x7d9   :  { %v4516_v44 = vpop.eup %4515  ;;  %v399_v45 = vadd.f32 %v6538_v63, %v6932_v38 }
 0x7da   :  { %v4518_v13 = vpop.eup %4517 }
 0x7db   :  { %4285 = vmatpush3.xpose.msra.mxu1 %v4510_v39  ;;  %4320 = vmatpush3.xpose.msra.mxu0 %v4512_v49  ;;  %v4520_v7 = vpop.eup %4519  ;;  %4533 = vtanh.f32 %v399_v45 }
 0x7dc   :  { %4286 = vmatprep.subr.mxu1 %v6857_v60  ;;  %4321 = vmatprep.subr.mxu0 %v6857_v60  ;;  %v4522_v16 = vpop.eup %4521  ;;  %4535 = vtanh.f32 %v479_v5 }
 0x7dd   :  { %v4524_v43 = vpop.eup %4523  ;;  %4537 = vtanh.f32 %v394_v11 }
 0x7de   :  { %v4526_v48 = vpop.eup %4525  ;;  %4539 = vtanh.f32 %v474_v42 }
 0x7df   :  { %4287 = vmatpush3.xpose.msra.mxu1 %v4514_v57  ;;  %4322 = vmatpush3.xpose.msra.mxu0 %v4516_v44  ;;  %v4528_v61 = vpop.eup %4527  ;;  %4541 = vtanh.f32 %v389_v47  ;;  %v2929_v44 = vrot.slane %v2730_v12, 4  ;;  %v684_v47 = vadd.f32 %v6946_v46, %v6538_v63 }
 0x7e0   :  { %4288 = vmatprep.subr.mxu1 %v6857_v60  ;;  %4323 = vmatprep.subr.mxu0 %v6857_v60  ;;  %v4530_v10 = vpop.eup %4529  ;;  %4543 = vtanh.f32 %v469_v59 }
 0x7e1   :  { %v4532_v33 = vpop.eup %4531  ;;  %4545 = vtanh.f32 %v384_v9  ;;  %v679_v9 = vadd.f32 %v6538_v63, %v6948_v0  ;;  %v6955_v0 = vld [vmem:[#allocation75_spill] sm:$0xff] }
 0x7e2   :  { %4547 = vtanh.f32 %v464_v31  ;;  %v6949_v31 = vld [vmem:[#allocation61_spill] sm:$0xff] }
 0x7e3   :  { %4289 = vmatpush3.xpose.msra.mxu1 %v4518_v13  ;;  %4324 = vmatpush3.xpose.msra.mxu0 %v4520_v7  ;;  %4549 = vtanh.f32 %v379_v54  ;;  %v3089_v54 = vld [vmem:[#allocation3 + $0x5] sm:$0x1] }
 0x7e4   :  { %4290 = vmatprep.subr.mxu1 %v6857_v60  ;;  %4325 = vmatprep.subr.mxu0 %v6857_v60  ;;  %4551 = vtanh.f32 %v459_v28 }
 0x7e5   :  { %4553 = vtanh.f32 %v374_v21  ;;  %v2954_v21 = vld [vmem:[#allocation3 + $0x10] sm:$0x1] }
 0x7e6   :  { %4555 = vtanh.f32 %v454_v55 }
 0x7e7   :  { %4291 = vmatpush3.xpose.msra.mxu1 %v4522_v16  ;;  %4326 = vmatpush3.xpose.msra.mxu0 %v4524_v43  ;;  %4557 = vtanh.f32 %v369_v36  ;;  %v3092_v36 = vld [vmem:[#allocation3 + $0x11] sm:$0x1] }
 0x7e8   :  { %4292 = vmatprep.subr.mxu1 %v6857_v60  ;;  %4327 = vmatprep.subr.mxu0 %v6857_v60  ;;  %v4534_v22 = vpop.eup %4533  ;;  %4559 = vtanh.f32 %v449_v40 }
 0x7e9   :  { %v4536_v15 = vpop.eup %4535 }
 0x7ea   :  { %v4538_v19 = vpop.eup %4537 }
 0x7eb   :  { %4293 = vmatpush3.xpose.msra.mxu1 %v4526_v48  ;;  %4328 = vmatpush3.xpose.msra.mxu0 %v4528_v61  ;;  %v4540_v56 = vpop.eup %4539  ;;  %v6947_v48 = vld [vmem:[#allocation63_spill] sm:$0xff] }
 0x7ec   :  { %4294 = vmatprep.subr.mxu1 %v6857_v60  ;;  %4329 = vmatprep.subr.mxu0 %v6857_v60  ;;  %v4542_v1 = vpop.eup %4541  ;;  %v604_v50 = vadd.f32 %v6947_v48, %v6538_v63 }
 0x7ed   :  { %v4544_v23 = vpop.eup %4543 }
 0x7ee   :  { %v4546_v51 = vpop.eup %4545 }
 0x7ef   :  { %4295 = vmatpush3.xpose.msra.mxu1 %v4530_v10  ;;  %4330 = vmatpush3.xpose.msra.mxu0 %v4532_v33  ;;  %v4548_v24 = vpop.eup %4547  ;;  %v594_v33 = vadd.f32 %v6949_v31, %v6538_v63 }
 0x7f0   :  { %4296 = vmatprep.subr.mxu1 %v6857_v60  ;;  %4331 = vmatprep.subr.mxu0 %v6857_v60  ;;  %v4550_v25 = vpop.eup %4549 }
 0x7f1   :  { %v4552_v32 = vpop.eup %4551 }
 0x7f2   :  { %v4554_v37 = vpop.eup %4553 }
 0x7f3   :  { %4297 = vmatpush3.xpose.msra.mxu1 %v4534_v22  ;;  %4332 = vmatpush3.xpose.msra.mxu0 %v4536_v15  ;;  %v4556_v52 = vpop.eup %4555  ;;  %v6950_v22 = vld [vmem:[#allocation64_spill] sm:$0xff]  ;;  %v2953_v15 = vld [vmem:[#allocation3 + $0xc] sm:$0x1] }
 0x7f4   :  { %4298 = vmatprep.subr.mxu1 %v6857_v60  ;;  %4333 = vmatprep.subr.mxu0 %v6857_v60  ;;  %v4558_v39 = vpop.eup %4557  ;;  %v599_v26 = vadd.f32 %v6538_v63, %v6950_v22  ;;  %v2988_v40 = vrot.slane %v2953_v15, 5  ;;  %v6956_v15 = vld [vmem:[#allocation57_spill] sm:$0xff] }
 0x7f5   :  { %v4560_v58 = vpop.eup %4559 }
 0x7f7   :  { %4299 = vmatpush3.xpose.msra.mxu1 %v4538_v19  ;;  %4334 = vmatpush3.xpose.msra.mxu0 %v4540_v56  ;;  %v2982_v19 = vrot.slane %v2951_v20, 7  ;;  %v2955_v56 = vld [vmem:[#allocation3 + $0x14] sm:$0x1] }
 0x7f8   :  { %4300 = vmatprep.subr.mxu1 %v6857_v60  ;;  %4335 = vmatprep.subr.mxu0 %v6857_v60 }
 0x7fb   :  { %4301 = vmatpush3.xpose.msra.mxu1 %v4542_v1  ;;  %4336 = vmatpush3.xpose.msra.mxu0 %v4544_v23  ;;  %v3121_v1 = vrot.slane %v3089_v54, 7  ;;  %v3093_v23 = vld [vmem:[#allocation3 + $0x15] sm:$0x1] }
 0x7fc   :  { %4302 = vmatprep.subr.mxu1 %v6857_v60  ;;  %4337 = vmatprep.subr.mxu0 %v6857_v60 }
 0x7ff   :  { %4303 = vmatpush3.xpose.msra.mxu1 %v4546_v51  ;;  %4338 = vmatpush3.xpose.msra.mxu0 %v4548_v24  ;;  %v3123_v51 = vrot.slane %v3090_v30, 6  ;;  %v2956_v24 = vld [vmem:[#allocation3 + $0x18] sm:$0x1]  ;;  %v579_v30 = vadd.f32 %v6538_v63, %v6956_v15 }
 0x800   :  { %4304 = vmatprep.subr.mxu1 %v6857_v60  ;;  %4339 = vmatprep.subr.mxu0 %v6857_v60 }
 0x803   :  { %4305 = vmatpush3.xpose.msra.mxu1 %v4550_v25  ;;  %4340 = vmatpush3.xpose.msra.mxu0 %v4552_v32  ;;  %v2991_v25 = vrot.slane %v2954_v21, 4  ;;  %v3094_v32 = vld [vmem:[#allocation3 + $0x19] sm:$0x1]  ;;  %v6957_v21 = vld [vmem:[#allocation76_spill] sm:$0xff] }
 0x804   :  { %4306 = vmatprep.subr.mxu1 %v6857_v60  ;;  %4341 = vmatprep.subr.mxu0 %v6857_v60 }
 0x807   :  { %4307 = vmatpush3.xpose.msra.mxu1 %v4554_v37  ;;  %4342 = vmatpush3.xpose.msra.mxu0 %v4556_v52  ;;  %v3125_v37 = vrot.slane %v3091_v29, 5  ;;  %v6952_v52 = vld [vmem:[#allocation62_spill] sm:$0xff] }
 0x808   :  { %4308 = vmatprep.subr.mxu1 %v6857_v60  ;;  %4343 = vmatprep.subr.mxu0 %v6857_v60 }
 0x80b   :  { %4309 = vmatpush3.xpose.msra.mxu1 %v4558_v39  ;;  %4344 = vmatpush3.xpose.msra.mxu0 %v4560_v58  ;;  %v589_v39 = vadd.f32 %v6538_v63, %v6952_v52  ;;  %v2984_v58 = vsel %vm2983_vm4, %v2982_v19, %v2950_v27  ;;  %v659_v19 = vadd.f32 %v6538_v63, %v6957_v21 }
 0x80c   :  { %4348 = vmatprep.subr.mxu1 %v6857_v60  ;;  %4383 = vmatprep.subr.mxu0 %v6857_v60 }
 0x88e   :  { %v2846_v49 = vpop.f32.mrf.mxu1  ;;  %v2917_v2 = vpop.f32.mrf.mxu0 }
 0x88f   :  { %v2921_v4 = vadd.f32 %v2846_v49, %v2730_v12  ;;  %v2938_v8 = vadd.f32 %v6127_v62, %v2917_v2  ;;  %v2994_v12 = vrot.slane %v2955_v56, 3  ;;  %v3088_v49 = vld [vmem:[#allocation3 + $0x1] sm:$0x1]  ;;  %v3127_v2 = vrot.slane %v3092_v36, 4  ;;  %v6959_v56 = vld [vmem:[#allocation73_spill] sm:$0xff] }
 0x890   :  { %v4277_v57 = vpop.f32.mrf.mxu0  ;;  %v2848_v14 = vpop.f32.mrf.mxu1 }
 0x891   :  { %v3594_v6 = vmul.f32 -1.442695, %v2921_v4  ;;  %v2931_v38 = vadd.f32 %v2929_v44, %v2848_v14  ;;  %v2987_v4 = vsel %vm2986_vm5, %v2985_v35, %v2984_v58  ;;  %v3122_v57 = vsel %vm2983_vm4, %v3121_v1, %v3088_v49  ;;  %v6960_v1 = vld [vmem:[#allocation52_spill] sm:$0xff]  ;;  %v6964_v58 = vld [vmem:[#allocation50_spill] sm:$0xff] }
 0x892   :  { %v2990_v14 = vsel %vm2989_vm6, %v2988_v40, %v2987_v4  ;;  %v2997_v44 = vrot.slane %v2956_v24, 2  ;;  %v654_v35 = vadd.f32 %v6959_v56, %v6538_v63  ;;  %v569_v27 = vadd.f32 %v6538_v63, %v6960_v1  ;;  %v6961_v40 = vld [vmem:[#allocation74_spill] sm:$0xff]  ;;  %v6962_v24 = vld [vmem:[#allocation49_spill] sm:$0xff] }
 0x893   :  { %4561 = vpow2.f32 %v3594_v6  ;;  %v3595_v45 = vmul.f32 -1.442695, %v2931_v38  ;;  %v3129_v6 = vrot.slane %v3093_v23, 3  ;;  %v3124_v38 = vsel %vm2986_vm5, %v3123_v51, %v3122_v57 }
 0x894   :  { %v649_v23 = vadd.f32 %v6538_v63, %v6961_v40  ;;  %v6978_v1 = vlaneseq }
 0x895   :  { %4563 = vpow2.f32 %v3595_v45  ;;  %v3131_v45 = vrot.slane %v3094_v32, 2 }
 0x8a0   :  { %v4562_v13 = vpop.eup %4561 }
 0x8a1   :  { %v2925_v3 = vadd.f32 1.0, %v4562_v13  ;;  %v6953_v13 = vld [vmem:[#allocation78_spill] sm:$0xff] }
 0x8a2   :  { %v4564_v5 = vpop.eup %4563 }
 0x8a3   :  { %4565 = vrcp.f32 %v2925_v3  ;;  %v2935_v7 = vadd.f32 1.0, %v4564_v5  ;;  %v669_v3 = vadd.f32 %v6538_v63, %v6953_v13  ;;  %v2993_v5 = vsel %vm2992_vm7, %v2991_v25, %v2990_v14 }
 0x8a4   :  { %v564_v25 = vadd.f32 %v6962_v24, %v6538_v63 }
 0x8a5   :  { %4567 = vrcp.f32 %v2935_v7  ;;  %v3126_v7 = vsel %vm2989_vm6, %v3125_v37, %v3124_v38  ;;  %v6963_v37 = vld [vmem:[#allocation71_spill] sm:$0xff]  ;;  %v6967_v38 = vld [vmem:[#allocation69_spill] sm:$0xff] }
 0x8a6   :  { %v644_v52 = vadd.f32 %v6963_v37, %v6538_v63 }
 0x8b0   :  { %v4566_v11 = vpop.eup %4565 }
 0x8b1   :  { %v2939_v16 = vmul.f32 %v4566_v11, %v2938_v8  ;;  %v6954_v8 = vld [vmem:[#allocation53_spill] sm:$0xff] }
 0x8b2   :  { %v4568_v43 = vpop.eup %4567  ;;  %v584_v11 = vadd.f32 %v6954_v8, %v6538_v63  ;;  %v6969_v8 = vld [vmem:[#allocation70_spill] sm:$0xff] }
 0x8b3   :  { %v2940_v42 = vadd.f32 %v2939_v16, %v2731_v41  ;;  %v2942_v59 = vsub.f32 1.0, %v4568_v43  ;;  %v2944_v62 = vmul.f32 %v4568_v43, %v6559_v18  ;;  %v6951_v18 = vld [vmem:[#allocation77_spill] sm:$0xff]  ;;  %v2996_v41 = vsel %vm2995_vm8, %v2994_v12, %v2993_v5 }
 0x8b4   :  { %v674_v55 = vadd.f32 %v6951_v18, %v6538_v63  ;;  %v3128_v43 = vsel %vm2992_vm7, %v3127_v2, %v3126_v7  ;;  %v6958_v18 = vld [vmem:[#allocation51_spill] sm:$0xff]  ;;  %v559_v12 = vadd.f32 %v6538_v63, %v6964_v58  ;;  %v6965_v2 = vld [vmem:[#allocation72_spill] sm:$0xff] }
 0x8b5   :  { %4569 = vtanh.f32 %v2940_v42  ;;  %v3130_v48 = vsel %vm2995_vm8, %v3129_v6, %v3128_v43  ;;  %v639_v4 = vadd.f32 %v6538_v63, %v6965_v2  ;;  %v6966_v6 = vld [vmem:[#allocation46_spill] sm:$0xff] }
 0x8b6   :  { %4571 = vtanh.f32 %v684_v47  ;;  %v554_v14 = vadd.f32 %v6966_v6, %v6538_v63 }
 0x8b7   :  { %4573 = vtanh.f32 %v604_v50 }
 0x8b8   :  { %4575 = vtanh.f32 %v679_v9  ;;  %v664_v9 = vadd.f32 %v6955_v0, %v6538_v63  ;;  %v6973_v0 = vld [vmem:[#allocation68_spill] sm:$0xff] }
 0x8b9   :  { %4577 = vtanh.f32 %v594_v33 }
 0x8ba   :  { %4579 = vtanh.f32 %v599_v26 }
 0x8bb   :  { %4581 = vtanh.f32 %v674_v55  ;;  %v574_v55 = vadd.f32 %v6958_v18, %v6538_v63 }
 0x8bc   :  { %4583 = vtanh.f32 %v589_v39 }
 0x8bd   :  { %4585 = vtanh.f32 %v669_v3  ;;  %v6968_v3 = vld [vmem:[#allocation48_spill] sm:$0xff] }
 0x8be   :  { %4587 = vtanh.f32 %v584_v11  ;;  %v549_v5 = vadd.f32 %v6538_v63, %v6968_v3  ;;  %v629_v11 = vadd.f32 %v6538_v63, %v6969_v8 }
 0x8bf   :  { %4589 = vtanh.f32 %v664_v9  ;;  %v619_v9 = vadd.f32 %v6538_v63, %v6973_v0 }
 0x8c0   :  { %4591 = vtanh.f32 %v579_v30 }
 0x8c1   :  { %4593 = vtanh.f32 %v659_v19 }
 0x8c2   :  { %v4570_v61 = vpop.eup %4569  ;;  %4595 = vtanh.f32 %v574_v55 }
 0x8c3   :  { %v2943_v10 = vmul.f32 %v4570_v61, %v2942_v59  ;;  %v4572_v31 = vpop.eup %4571  ;;  %4597 = vtanh.f32 %v654_v35 }
 0x8c4   :  { %v4574_v22 = vpop.eup %4573  ;;  %4599 = vtanh.f32 %v569_v27  ;;  %v2949_v27 = vand.u32 127, %v6978_v1 }
 0x8c5   :  { %v2945_v28 = vadd.f32 %v2944_v62, %v2943_v10  ;;  %v2999_v10 = vsel %vm2998_vm9, %v2997_v44, %v2996_v41  ;;  %v3132_v62 = vsel %vm2998_vm9, %v3131_v45, %v3130_v48  ;;  %4601 = vtanh.f32 %v649_v23  ;;  %v6970_v41 = vld [vmem:[#allocation44_spill] sm:$0xff] }
 0x8c6   :  { %4603 = vtanh.f32 %v564_v25  ;;  %v634_v45 = vadd.f32 %v6967_v38, %v6538_v63  ;;  %vm3074_vm11 = vcmp.lt.s32.totalorder %v2949_v27, 4 }
 0x8c7   :  { %2947 = vst [vmem:[#allocation3 + $0x1c] sm:$0xf] %v2945_v28  ;;  %v4576_v28 = vpop.eup %4575  ;;  %4605 = vtanh.f32 %v644_v52 }
 0x8c8   :  { %4607 = vtanh.f32 %v559_v12 }
 0x8ce   :  { %v2957_v16 = vld [vmem:[#allocation3 + $0x1c] sm:$0x1]  ;;  %v3095_v42 = vld [vmem:[#allocation3 + $0x1d] sm:$0x1]  ;;  %v3227_v46 = vld [vmem:[#allocation3 + $0x1e] sm:$0x1] }
 0x8cf   :  { %v3000_v47 = vrot.slane %v2957_v16, 1  ;;  %v3133_v50 = vrot.slane %v3095_v42, 1  ;;  %v3265_v59 = vrot.slane %v3227_v46, 1  ;;  %v3359_v61 = vld [vmem:[#allocation3 + $0x1f] sm:$0x1]  ;;  %v544_v42 = vadd.f32 %v6970_v41, %v6538_v63 }
 0x8d0   :  { %v3397_v20 = vrot.slane %v3359_v61, 1  ;;  %v6971_v46 = vld [vmem:[#allocation67_spill] sm:$0xff] }
 0x8d1   :  { %v3002_v33 = vsel %vm3001_vm10, %v3000_v47, %v2999_v10  ;;  %v3134_v34 = vsel %vm3001_vm10, %v3133_v50, %v3132_v62  ;;  %v6692_v54 = vsel %vm3001_vm10, %v3265_v59, %v6588_v53  ;;  %v4578_v53 = vpop.eup %4577  ;;  %4609 = vtanh.f32 %v639_v4  ;;  %v6972_v50 = vld [vmem:[#allocation45_spill] sm:$0xff]  ;;  %v6974_v62 = vld [vmem:[#allocation42_spill] sm:$0xff] }
 0x8d2   :  { %4311 = vmatmul.mubr.f32.vlgmr.msra.gmra.mxu1 %v3002_v33  ;;  %4346 = vmatmul.mubr.f32.vlgmr.msra.gmra.mxu0 %v3134_v34  ;;  %v6696_v26 = vsel %vm3001_vm10, %v3397_v20, %v6594_v17  ;;  %v4580_v17 = vpop.eup %4579  ;;  %4611 = vtanh.f32 %v554_v14  ;;  %v624_v47 = vadd.f32 %v6971_v46, %v6538_v63  ;;  %v539_v59 = vadd.f32 %v6538_v63, %v6972_v50  ;;  %v6975_v33 = vld [vmem:[#allocation65_spill] sm:$0xff] }
 0x8d3   :  { %4349 = vmatpush3.xpose.msra.mxu1 %v4574_v22  ;;  %4384 = vmatpush3.xpose.msra.mxu0 %v4572_v31  ;;  %v4582_v29 = vpop.eup %4581  ;;  %4613 = vtanh.f32 %v634_v45  ;;  %v534_v20 = vadd.f32 %v6974_v62, %v6538_v63  ;;  %v614_v34 = vadd.f32 %v6975_v33, %v6538_v63 }
 0x8d4   :  { %4350 = vmatprep.subr.mxu1 %v6857_v60  ;;  %4385 = vmatprep.subr.mxu0 %v6857_v60  ;;  %v4584_v36 = vpop.eup %4583  ;;  %4615 = vtanh.f32 %v549_v5 }
 0x8d5   :  { %4380 = vmatprep.mubr.msk.f32.mxu1 %vm4675_vm3, %v6857_v60  ;;  %4415 = vmatprep.mubr.msk.f32.mxu0 %vm4675_vm3, %v6857_v60  ;;  %v4586_v51 = vpop.eup %4585  ;;  %4617 = vtanh.f32 %v629_v11 }
 0x8d6   :  { %v4588_v32 = vpop.eup %4587  ;;  %4619 = vtanh.f32 %v544_v42 }
 0x8d7   :  { %4351 = vmatpush3.xpose.msra.mxu1 %v4580_v17  ;;  %4386 = vmatpush3.xpose.msra.mxu0 %v4576_v28  ;;  %v4590_v39 = vpop.eup %4589  ;;  %4621 = vtanh.f32 %v624_v47  ;;  %v6976_v28 = vld [vmem:[#allocation43_spill] sm:$0xff] }
 0x8d8   :  { %4352 = vmatprep.subr.mxu1 %v6857_v60  ;;  %4387 = vmatprep.subr.mxu0 %v6857_v60  ;;  %v4592_v49 = vpop.eup %4591  ;;  %4623 = vtanh.f32 %v539_v59  ;;  %v529_v15 = vadd.f32 %v6538_v63, %v6976_v28 }
 0x8d9   :  { %v4594_v57 = vpop.eup %4593  ;;  %4625 = vtanh.f32 %v619_v9 }
 0x8da   :  { %v4596_v44 = vpop.eup %4595  ;;  %4627 = vtanh.f32 %v534_v20 }
 0x8db   :  { %4353 = vmatpush3.xpose.msra.mxu1 %v4578_v53  ;;  %4388 = vmatpush3.xpose.msra.mxu0 %v4582_v29  ;;  %v4598_v13 = vpop.eup %4597  ;;  %4629 = vtanh.f32 %v614_v34  ;;  %v6977_v53 = vld [vmem:[#allocation66_spill] sm:$0xff] }
 0x8dc   :  { %4354 = vmatprep.subr.mxu1 %v6857_v60  ;;  %4389 = vmatprep.subr.mxu0 %v6857_v60  ;;  %v4600_v7 = vpop.eup %4599  ;;  %v609_v21 = vadd.f32 %v6538_v63, %v6977_v53  ;;  %4631 = vtanh.f32 %v529_v15 }
 0x8dd   :  { %v4602_v16 = vpop.eup %4601 }
 0x8de   :  { %v4604_v43 = vpop.eup %4603  ;;  %4633 = vtanh.f32 %v609_v21 }
 0x8df   :  { %4355 = vmatpush3.xpose.msra.mxu1 %v4584_v36  ;;  %4390 = vmatpush3.xpose.msra.mxu0 %v4586_v51  ;;  %v4606_v48 = vpop.eup %4605 }
 0x8e0   :  { %4356 = vmatprep.subr.mxu1 %v6857_v60  ;;  %4391 = vmatprep.subr.mxu0 %v6857_v60  ;;  %v4608_v61 = vpop.eup %4607 }
 0x8e1   :  { %v4610_v10 = vpop.eup %4609 }
 0x8e2   :  { %v4612_v31 = vpop.eup %4611 }
 0x8e3   :  { %4357 = vmatpush3.xpose.msra.mxu1 %v4588_v32  ;;  %4392 = vmatpush3.xpose.msra.mxu0 %v4590_v39  ;;  %v4614_v22 = vpop.eup %4613 }
 0x8e4   :  { %4358 = vmatprep.subr.mxu1 %v6857_v60  ;;  %4393 = vmatprep.subr.mxu0 %v6857_v60  ;;  %v4616_v30 = vpop.eup %4615 }
 0x8e5   :  { %v4618_v19 = vpop.eup %4617 }
 0x8e6   :  { %v4620_v17 = vpop.eup %4619 }
 0x8e7   :  { %4359 = vmatpush3.xpose.msra.mxu1 %v4592_v49  ;;  %4394 = vmatpush3.xpose.msra.mxu0 %v4594_v57  ;;  %v4622_v29 = vpop.eup %4621 }
 0x8e8   :  { %4360 = vmatprep.subr.mxu1 %v6857_v60  ;;  %4395 = vmatprep.subr.mxu0 %v6857_v60  ;;  %v4624_v18 = vpop.eup %4623 }
 0x8e9   :  { %v4626_v55 = vpop.eup %4625 }
 0x8ea   :  { %v4628_v63 = vpop.eup %4627 }
 0x8eb   :  { %4361 = vmatpush3.xpose.msra.mxu1 %v4596_v44  ;;  %4396 = vmatpush3.xpose.msra.mxu0 %v4598_v13  ;;  %v4630_v56 = vpop.eup %4629 }
 0x8ec   :  { %4362 = vmatprep.subr.mxu1 %v6857_v60  ;;  %4397 = vmatprep.subr.mxu0 %v6857_v60  ;;  %v4632_v35 = vpop.eup %4631 }
 0x8ed   :  { %v4634_v36 = vpop.eup %4633 }
 0x8ef   :  { %4363 = vmatpush3.xpose.msra.mxu1 %v4600_v7  ;;  %4398 = vmatpush3.xpose.msra.mxu0 %v4602_v16 }
 0x8f0   :  { %4364 = vmatprep.subr.mxu1 %v6857_v60  ;;  %4399 = vmatprep.subr.mxu0 %v6857_v60 }
 0x8f3   :  { %4365 = vmatpush3.xpose.msra.mxu1 %v4604_v43  ;;  %4400 = vmatpush3.xpose.msra.mxu0 %v4606_v48 }
 0x8f4   :  { %4366 = vmatprep.subr.mxu1 %v6857_v60  ;;  %4401 = vmatprep.subr.mxu0 %v6857_v60 }
 0x8f7   :  { %4367 = vmatpush3.xpose.msra.mxu1 %v4608_v61  ;;  %4402 = vmatpush3.xpose.msra.mxu0 %v4610_v10 }
 0x8f8   :  { %4368 = vmatprep.subr.mxu1 %v6857_v60  ;;  %4403 = vmatprep.subr.mxu0 %v6857_v60 }
 0x8fb   :  { %4369 = vmatpush3.xpose.msra.mxu1 %v4612_v31  ;;  %4404 = vmatpush3.xpose.msra.mxu0 %v4614_v22 }
 0x8fc   :  { %4370 = vmatprep.subr.mxu1 %v6857_v60  ;;  %4405 = vmatprep.subr.mxu0 %v6857_v60 }
 0x8ff   :  { %4371 = vmatpush3.xpose.msra.mxu1 %v4616_v30  ;;  %4406 = vmatpush3.xpose.msra.mxu0 %v4618_v19 }
 0x900   :  { %4372 = vmatprep.subr.mxu1 %v6857_v60  ;;  %4407 = vmatprep.subr.mxu0 %v6857_v60 }
 0x903   :  { %4373 = vmatpush3.xpose.msra.mxu1 %v4620_v17  ;;  %4408 = vmatpush3.xpose.msra.mxu0 %v4622_v29 }
 0x904   :  { %4374 = vmatprep.subr.mxu1 %v6857_v60  ;;  %4409 = vmatprep.subr.mxu0 %v6857_v60 }
 0x907   :  { %4375 = vmatpush3.xpose.msra.mxu1 %v4624_v18  ;;  %4410 = vmatpush3.xpose.msra.mxu0 %v4626_v55 }
 0x908   :  { %4376 = vmatprep.subr.mxu1 %v6857_v60  ;;  %4411 = vmatprep.subr.mxu0 %v6857_v60 }
 0x90b   :  { %4377 = vmatpush3.xpose.msra.mxu1 %v4628_v63  ;;  %4412 = vmatpush3.xpose.msra.mxu0 %v4630_v56 }
 0x90c   :  { %4378 = vmatprep.subr.mxu1 %v6857_v60  ;;  %4413 = vmatprep.subr.mxu0 %v6857_v60 }
 0x90f   :  { %4379 = vmatpush3.xpose.msra.mxu1 %v4632_v35  ;;  %4414 = vmatpush3.xpose.msra.mxu0 %v4634_v36 }
 0x912   :  { %4381 = vmatmul.mubr.f32.vlgmr.msra.gmra.mxu1 %v6692_v54  ;;  %4416 = vmatmul.mubr.f32.vlgmr.msra.gmra.mxu0 %v6696_v26 }
 0x992   :  { %v3070_v40 = vpop.f32.mrf.mxu1  ;;  %v3202_v23 = vpop.f32.mrf.mxu0 }
 0x993   :  { %v3075_v51 = vsel %vm3074_vm11, %v3070_v40, -1e+30  ;;  %v3206_v32 = vsel %vm3074_vm11, %v3202_v23, -1e+30 }
 0x994   :  { %v4347_v24 = vpop.f32.mrf.mxu0  ;;  %3076 = vmax.xlane.f32.xlu0 %v3075_v51  ;;  %v4312_v25 = vpop.f32.mrf.mxu1 }
 0x998   :  { %3207 = vmax.xlane.f32.xlu0 %v3206_v32 }
 0x9d2   :  { %v3334_v60 = vpop.f32.mrf.mxu1  ;;  %v3466_v37 = vpop.f32.mrf.mxu0 }
 0x9d3   :  { %v3338_v52 = vsel %vm3074_vm11, %v3334_v60, -1e+30  ;;  %v3470_v54 = vsel %vm3074_vm11, %v3466_v37, -1e+30 }
 0x9d4   :  { %v4417_v39 = vpop.f32.mrf.mxu0  ;;  %3339 = vmax.xlane.f32.xlu1 %v3338_v52  ;;  %v4382_v58 = vpop.f32.mrf.mxu1 }
 0x9d8   :  { %3471 = vmax.xlane.f32.xlu1 %v3470_v54 }
 0xa1d   :  { %v3077_v26 = vpop.xlane.xlu0 %3076 }
 0xa1e   :  { %v3078_v12 = vsub.f32 %v3075_v51, %v3077_v26 }
 0xa20   :  { %v3079_v49 = vmul.f32 1.442695, %v3078_v12 }
 0xa21   :  { %v3208_v2 = vpop.xlane.xlu0 %3207 }
 0xa22   :  { %4635 = vpow2.f32 %v3079_v49  ;;  %v3209_v4 = vsub.f32 %v3206_v32, %v3208_v2 }
 0xa24   :  { %v3210_v57 = vmul.f32 1.442695, %v3209_v4 }
 0xa26   :  { %4637 = vpow2.f32 %v3210_v57 }
 0xa2f   :  { %v4636_v6 = vpop.eup %4635 }
 0xa30   :  { %3081 = vadd.xlane.f32.xlu0 %v4636_v6 }
 0xa33   :  { %v4638_v14 = vpop.eup %4637 }
 0xa34   :  { %3212 = vadd.xlane.f32.xlu1 %v4638_v14 }
 0xa5d   :  { %v3340_v44 = vpop.xlane.xlu1 %3339 }
 0xa5e   :  { %v3341_v38 = vsub.f32 %v3338_v52, %v3340_v44 }
 0xa60   :  { %v3342_v45 = vmul.f32 1.442695, %v3341_v38 }
 0xa61   :  { %v3472_v13 = vpop.xlane.xlu1 %3471 }
 0xa62   :  { %4639 = vpow2.f32 %v3342_v45  ;;  %v3473_v3 = vsub.f32 %v3470_v54, %v3472_v13 }
 0xa64   :  { %v3474_v5 = vmul.f32 1.442695, %v3473_v3 }
 0xa66   :  { %4641 = vpow2.f32 %v3474_v5 }
 0xa6f   :  { %v4640_v7 = vpop.eup %4639 }
 0xa70   :  { %3344 = vadd.xlane.f32.xlu0 %v4640_v7 }
 0xa73   :  { %v4642_v8 = vpop.eup %4641 }
 0xa74   :  { %3476 = vadd.xlane.f32.xlu1 %v4642_v8 }
 0xab9   :  { %v3082_v11 = vpop.xlane.xlu0 %3081 }
 0xaba   :  { %4643 = vlog2.f32 %v3082_v11 }
 0xabd   :  { %v3213_v16 = vpop.xlane.xlu1 %3212 }
 0xabe   :  { %4645 = vlog2.f32 %v3213_v16 }
 0xac7   :  { %v4644_v41 = vpop.eup %4643 }
 0xac8   :  { %v3084_v42 = vmul.f32 0.6931472, %v4644_v41 }
 0xaca   :  { %v3085_v43 = vadd.f32 %v3084_v42, %v3077_v26 }
 0xacb   :  { %v4646_v46 = vpop.eup %4645 }
 0xacc   :  { %v3086_v47 = vsub.f32 %v3075_v51, %v3085_v43  ;;  %v3215_v48 = vmul.f32 0.6931472, %v4646_v46 }
 0xace   :  { %3087 = vst [vmem:[#allocation5] sm:$0xff] %v3086_v47  ;;  %v3216_v50 = vadd.f32 %v3215_v48, %v3208_v2 }
 0xad0   :  { %v3217_v59 = vsub.f32 %v3206_v32, %v3216_v50 }
 0xad2   :  { %3219 = vst [vmem:[#allocation5 + $0x8] sm:$0xff] %v3217_v59 }
 0xaf9   :  { %v3345_v61 = vpop.xlane.xlu0 %3344 }
 0xafa   :  { %4647 = vlog2.f32 %v3345_v61 }
 0xafd   :  { %v3477_v0 = vpop.xlane.xlu1 %3476 }
 0xafe   :  { %4649 = vlog2.f32 %v3477_v0 }
 0xb07   :  { %v4648_v9 = vpop.eup %4647 }
 0xb08   :  { %v3347_v10 = vmul.f32 0.6931472, %v4648_v9 }
 0xb0a   :  { %v3348_v62 = vadd.f32 %v3347_v10, %v3340_v44 }
 0xb0b   :  { %v4650_v20 = vpop.eup %4649 }
 0xb0c   :  { %v3349_v31 = vsub.f32 %v3338_v52, %v3348_v62  ;;  %v3479_v33 = vmul.f32 0.6931472, %v4650_v20 }
 0xb0e   :  { %3351 = vst [vmem:[#allocation5 + $0x10] sm:$0xff] %v3349_v31  ;;  %v3480_v34 = vadd.f32 %v3479_v33, %v3472_v13 }
 0xb10   :  { %v3481_v22 = vsub.f32 %v3470_v54, %v3480_v34 }
 0xb12   :  { %3483 = vst [vmem:[#allocation5 + $0x18] sm:$0xff] %v3481_v22 }
 0xb13   :  { %4663 = shalt.err (!%p4660_p4)
}
 0xb14   :  { %s4677_s28 = smov 128   ;;  %s4678_s29 = smov 8  }
 0xb15   :  { %3495 = dma.vmem_to_hbm [thread:$0]  %s3490_s26, 512, %s6792_s10, [#allocation6], %s4677_s28, %s4677_s28, %s4678_s29  }
 0xb16   :  { %4672 = dma.done.wait [#allocation6], 512  }
 0xb17   :  { %4673 = vsyncadd [#allocation6], 4294966784 }
 0xb18   :  { %3499 = vsyncpa [#allocation6], 1 }

</bundles_post_ra>
